<compile_context>
chip_gen: v5e
topology: v5e:2x2
jax: 0.10.0
libtpu: 0.0.40
codegen_flags: <defaults>
</compile_context>

<pallas_src>
import functools

import numpy as np
import jax
import jax.numpy as jnp
from jax import lax
from jax.experimental import pallas as pl
from jax.experimental.pallas import tpu as pltpu

VMEM_SPEC = pl.BlockSpec(memory_space=pltpu.MemorySpace.VMEM)

# Fixed architecture geometry (after x.permute(0,3,2,1): C=53, H=16, W=2).
H, W = 16, 2
C_IN, C1, C2 = 53, 64, 32
HW = H * W          # 32 feature-map rows per batch element (row = 2*h + w)
BLK = 40            # rows reserved per batch element (32 valid + 8 zero pad)
PAD = 8             # leading zero-pad rows (>= 3 absorbs 3x3 row shifts, 8-aligned)


def _conv3x3(src_ref, w_ref, tap_base, cout, win, m_even, m_odd):
    """3x3 same-padding conv on the zero-padded row layout.

    Each tap (dh,dw) is a shifted static slice of the padded (rows, 64) scratch
    multiplied by a width-boundary mask, then an MXU matmul against the packed
    per-tap weight; all 9 taps accumulate in f32.
    """
    acc = jnp.zeros((win, cout), jnp.float32)
    for dh in (-1, 0, 1):
        for dw in (-1, 0, 1):
            t = (dh + 1) * 3 + (dw + 1)
            s = 2 * dh + dw                      # flat row shift for (dh, dw)
            src = src_ref[PAD + s: PAD + s + win, :]
            if dw == -1:                         # left neighbor only valid at w==1
                src = src * m_odd
            elif dw == 1:                        # right neighbor only valid at w==0
                src = src * m_even
            acc = acc + jnp.dot(src.astype(jnp.bfloat16), w_ref[tap_base + t],
                                preferred_element_type=jnp.float32)
    return acc


def _basic_block(in_ref, tmp_ref, w_ref, cout, win, m_even, m_odd, m_valid):
    """relu(bn2(conv2(relu(bn1(conv1(x))))) + bn_sc(conv1x1_sc(x))), BN folded."""
    h = _conv3x3(in_ref, w_ref, 0, cout, win, m_even, m_odd)
    h = jnp.maximum(h, 0.0) * m_valid            # zero the inter-batch pad rows
    tmp_ref[PAD: PAD + win, 0:cout] = h          # stays in VMEM
    acc = _conv3x3(tmp_ref, w_ref, 9, cout, win, m_even, m_odd)
    xin = in_ref[PAD: PAD + win, :]              # 1x1 shortcut conv (no shift/mask)
    acc = acc + jnp.dot(xin.astype(jnp.bfloat16), w_ref[18],
                        preferred_element_type=jnp.float32)
    return jnp.maximum(acc, 0.0) * m_valid


def _cnn_kernel(x_ref, u_ref, wb1_ref, wb2_ref, w3_ref, hm_ref, out_ref,
                bufx, buf1, buf2, buf3, *, batch):
    win = BLK * batch - PAD                      # rows actually computed per conv
    f32 = jnp.float32

    # ---- zero the padded scratch feature maps (pad rows / channels stay 0) ----
    for buf in (bufx, buf1, buf2, buf3):
        buf[...] = jnp.zeros(buf.shape, f32)

    # ---- layout masks from iota (no modulo: BLK is a multiple of 8) ----------
    j = lax.broadcasted_iota(jnp.int32, (win, 1), 0)
    in_blk = [(j >= BLK * b) & (j < BLK * b + HW) for b in range(batch)]
    m_valid = jnp.where(functools.reduce(jnp.logical_or, in_blk), 1.0, 0.0)
    m_even = jnp.where(jnp.bitwise_and(j, 1) == 0, 1.0, 0.0)   # row has w == 0
    m_odd = 1.0 - m_even                                       # row has w == 1

    # ---- stage the (b,h,w)-ordered input rows into the zero-padded layout ----
    for b in range(batch):
        bufx[PAD + BLK * b: PAD + BLK * b + HW, 0:C_IN] = x_ref[b * HW:(b + 1) * HW, :]

    # ---- layer9: BasicBlock(53->64) ; layer10: BasicBlock(64->32) ------------
    o1 = _basic_block(bufx, buf1, wb1_ref, C1, win, m_even, m_odd, m_valid)
    buf2[PAD: PAD + win, :] = o1
    o2 = _basic_block(buf2, buf3, wb2_ref, C2, win, m_even, m_odd, m_valid)  # (win,32)

    # ---- layer11 AvgPool2d((4,1)) + flatten + embed + fc3 + fc5, per batch ----
    # Pool scale (1/4) and the torch CHW flatten order are folded into w3 rows.
    for b in range(batch):
        acc3 = hm_ref[0:1, :]                                    # fc3 bias (1,32)
        for g in range(4):
            r0 = BLK * b + 8 * g
            blk = o2[r0: r0 + 8, :]                              # h in [4g,4g+4), w in {0,1}
            pooled = blk[0:2] + blk[2:4] + blk[4:6] + blk[6:8]   # (2,32), rows = w
            for w in range(2):
                q = g * 2 + w
                acc3 = acc3 + jnp.dot(pooled[w:w + 1, :].astype(jnp.bfloat16),
                                      w3_ref[q * 32:(q + 1) * 32, :],
                                      preferred_element_type=jnp.float32)
        # embed: sigmoid(unrela_x[:, :2] @ We + be)   (K=2 -> do it elementwise)
        u_b = u_ref[b:b + 1, :]
        emb = jax.nn.sigmoid(u_b[0:1, 0:1] * hm_ref[1:2, 0:2]
                             + u_b[0:1, 1:2] * hm_ref[2:3, 0:2]
                             + hm_ref[3:4, 0:2])                 # (1,2)
        acc3 = (acc3 + emb[0:1, 0:1] * w3_ref[256:257, :]
                     + emb[0:1, 1:2] * w3_ref[257:258, :])
        h3 = jax.nn.sigmoid(acc3)                                # fc3 output (1,32)
        # fc5: (1,32) @ (32,2) + b5, as two lane reductions against packed w5 rows
        out_ref[b:b + 1, 0:1] = (jnp.sum(h3 * hm_ref[5:6, :], axis=-1, keepdims=True)
                                 + hm_ref[4:5, 0:1])
        out_ref[b:b + 1, 1:2] = (jnp.sum(h3 * hm_ref[6:7, :], axis=-1, keepdims=True)
                                 + hm_ref[4:5, 1:2])


@jax.jit
def cnn_forward(params, x, unrela_x):
    # x: (B, 2, 16, 53); x.permute(0,3,2,1) -> NCHW (B,53,16,2).  Channels-last
    # rows in (b, h, w) order: row (b,h,w) = x[b, w, h, :].
    B = x.shape[0]
    x_rows = jnp.transpose(x, (0, 2, 1, 3)).reshape(B * HW, C_IN)
    u = unrela_x[:, :2]
    rows = BLK * B + PAD
    kernel = functools.partial(_cnn_kernel, batch=B)
    # TODO(synk): for large batch, add a grid over batch blocks with
    # dimension_semantics=("parallel",) so v7x's two TensorCores both work and
    # VMEM residency scales; at B=2 a single gridless call is optimal.
    return pl.pallas_call(
        kernel,
        out_shape=jax.ShapeDtypeStruct((B, 2), jnp.float32),
        in_specs=[VMEM_SPEC] * 6,
        out_specs=VMEM_SPEC,
        scratch_shapes=[pltpu.VMEM((rows, C1), jnp.float32)] * 4,
    )(x_rows, u, params["w_b1"], params["w_b2"], params["w3"], params["hm"])


def init_params(key):
    eps = 1e-5
    bn_scale = jnp.float32(1.0 / np.sqrt(1.0 + eps))   # eval BN (default stats) folded
    ks = jax.random.split(key, 12)
    f32 = jnp.float32

    def taps(k, cin, cout):                      # 3x3 conv as 9 (Cin,Cout) taps
        w = jax.random.normal(k, (9, cin, cout), f32) * 0.05 * bn_scale
        return jnp.pad(w, ((0, 0), (0, C1 - cin), (0, 0)))   # zero-pad K to 64

    def onebyone(k, cin, cout):                  # 1x1 shortcut conv
        w = jax.random.normal(k, (cin, cout), f32) * 0.05 * bn_scale
        return jnp.pad(w, ((0, C1 - cin), (0, 0)))[None]

    # packed conv weights: [conv1 taps 0..8 | conv2 taps 9..17 | shortcut 18]
    w_b1 = jnp.concatenate([taps(ks[0], C_IN, C1), taps(ks[1], C1, C1),
                            onebyone(ks[2], C_IN, C1)], axis=0).astype(jnp.bfloat16)
    w_b2 = jnp.concatenate([taps(ks[3], C1, C2), taps(ks[4], C2, C2),
                            onebyone(ks[5], C1, C2)], axis=0).astype(jnp.bfloat16)

    # fc3: Linear(258, 32).  Torch input index for the first 256 features is the
    # NCHW flatten c*8 + g*2 + w; re-order rows to the kernel's pooled layout
    # q*32 + c (q = g*2 + w) and fold in the AvgPool 1/4 scale, once at init.
    w3_t = jax.random.normal(ks[6], (258, 32), f32) * 0.05
    wa = jnp.transpose(w3_t[:256].reshape(32, 8, 32), (1, 0, 2)).reshape(256, 32) * 0.25
    w3 = jnp.concatenate([wa, w3_t[256:]], axis=0).astype(jnp.bfloat16)   # (258,32)

    we = jax.random.normal(ks[7], (2, 2), f32) * 0.5       # embed Linear(2,2) (in,out)
    be = jax.random.normal(ks[8], (2,), f32) * 0.1
    b3 = jax.random.normal(ks[9], (32,), f32) * 0.1
    w5 = jax.random.normal(ks[10], (32, 2), f32) * 0.1
    b5 = jax.random.normal(ks[11], (2,), f32) * 0.1

    # small head params packed into one (8,32) f32 buffer (fewer tiny DMAs):
    # row0=b3, row1=we[0], row2=we[1], row3=be, row4=b5, row5=w5[:,0], row6=w5[:,1]
    hm = jnp.zeros((8, 32), f32)
    hm = hm.at[0, :].set(b3)
    hm = hm.at[1, 0:2].set(we[0])
    hm = hm.at[2, 0:2].set(we[1])
    hm = hm.at[3, 0:2].set(be)
    hm = hm.at[4, 0:2].set(b5)
    hm = hm.at[5, :].set(w5[:, 0])
    hm = hm.at[6, :].set(w5[:, 1])
    return {"w_b1": w_b1, "w_b2": w_b2, "w3": w3, "hm": hm}


if __name__ == "__main__":
    key = jax.random.PRNGKey(0)
    kp, kx, ku = jax.random.split(key, 3)
    params = init_params(kp)
    x = jax.random.normal(kx, (2, 2, 16, 53), jnp.float32)
    unrela_x = jax.random.normal(ku, (2, 4), jnp.float32)
    out = cnn_forward(params, x, unrela_x)
    jax.block_until_ready(out)
    assert out.shape == (2, 2) and out.dtype == jnp.float32
    print("KERNEL_OK")
</pallas_src>

<mosaic_0001>
module attributes {stable_mosaic.version = 11 : i64} {
  func.func @_cnn_kernel(%arg0: memref<64x53xf32, #tpu.memory_space<vmem>>, %arg1: memref<2x2xf32, #tpu.memory_space<vmem>>, %arg2: memref<19x64x64xbf16, #tpu.memory_space<vmem>>, %arg3: memref<19x64x32xbf16, #tpu.memory_space<vmem>>, %arg4: memref<258x32xbf16, #tpu.memory_space<vmem>>, %arg5: memref<8x32xf32, #tpu.memory_space<vmem>>, %arg6: memref<2x2xf32, #tpu.memory_space<vmem>>, %arg7: memref<88x64xf32, #tpu.memory_space<vmem>>, %arg8: memref<88x64xf32, #tpu.memory_space<vmem>>, %arg9: memref<88x64xf32, #tpu.memory_space<vmem>>, %arg10: memref<88x64xf32, #tpu.memory_space<vmem>>) attributes {dimension_semantics = [], scalar_prefetch = 0 : i64, scratch_operands = 4 : i64, tpu.core_type = #tpu.core_type<tc>} {
    %cst = arith.constant 0.000000e+00 : f32
    %0 = vector.broadcast %cst : f32 to vector<88x64xf32>
    %c0 = arith.constant 0 : index
    %c0_0 = arith.constant 0 : index
    %1 = vector.load %arg7[%c0, %c0_0] : memref<88x64xf32, #tpu.memory_space<vmem>>, vector<88x64xf32>
    tpu.vector_store %arg7[%c0, %c0_0], %0 {strides = array<i32>} : memref<88x64xf32, #tpu.memory_space<vmem>>, vector<88x64xf32>,
    %cst_1 = arith.constant 0.000000e+00 : f32
    %2 = vector.broadcast %cst_1 : f32 to vector<88x64xf32>
    %c0_2 = arith.constant 0 : index
    %c0_3 = arith.constant 0 : index
    %3 = vector.load %arg8[%c0_2, %c0_3] : memref<88x64xf32, #tpu.memory_space<vmem>>, vector<88x64xf32>
    tpu.vector_store %arg8[%c0_2, %c0_3], %2 {strides = array<i32>} : memref<88x64xf32, #tpu.memory_space<vmem>>, vector<88x64xf32>,
    %cst_4 = arith.constant 0.000000e+00 : f32
    %4 = vector.broadcast %cst_4 : f32 to vector<88x64xf32>
    %c0_5 = arith.constant 0 : index
    %c0_6 = arith.constant 0 : index
    %5 = vector.load %arg9[%c0_5, %c0_6] : memref<88x64xf32, #tpu.memory_space<vmem>>, vector<88x64xf32>
    tpu.vector_store %arg9[%c0_5, %c0_6], %4 {strides = array<i32>} : memref<88x64xf32, #tpu.memory_space<vmem>>, vector<88x64xf32>,
    %cst_7 = arith.constant 0.000000e+00 : f32
    %6 = vector.broadcast %cst_7 : f32 to vector<88x64xf32>
    %c0_8 = arith.constant 0 : index
    %c0_9 = arith.constant 0 : index
    %7 = vector.load %arg10[%c0_8, %c0_9] : memref<88x64xf32, #tpu.memory_space<vmem>>, vector<88x64xf32>
    tpu.vector_store %arg10[%c0_8, %c0_9], %6 {strides = array<i32>} : memref<88x64xf32, #tpu.memory_space<vmem>>, vector<88x64xf32>,
    %8 = tpu.iota {dimensions = array<i32: 0>} : vector<72x1xi32>
    %c0_i32 = arith.constant 0 : i32
    %9 = vector.broadcast %c0_i32 : i32 to vector<72x1xi32>
    %10 = arith.cmpi sge, %8, %9 : vector<72x1xi32>
    %c32_i32 = arith.constant 32 : i32
    %11 = vector.broadcast %c32_i32 : i32 to vector<72x1xi32>
    %12 = arith.cmpi slt, %8, %11 : vector<72x1xi32>
    %13 = arith.andi %10, %12 : vector<72x1xi1>
    %c40_i32 = arith.constant 40 : i32
    %14 = vector.broadcast %c40_i32 : i32 to vector<72x1xi32>
    %15 = arith.cmpi sge, %8, %14 : vector<72x1xi32>
    %c72_i32 = arith.constant 72 : i32
    %16 = vector.broadcast %c72_i32 : i32 to vector<72x1xi32>
    %17 = arith.cmpi slt, %8, %16 : vector<72x1xi32>
    %18 = arith.andi %15, %17 : vector<72x1xi1>
    %19 = arith.ori %13, %18 : vector<72x1xi1>
    %cst_10 = arith.constant 1.000000e+00 : f32
    %cst_11 = arith.constant 0.000000e+00 : f32
    %20 = vector.broadcast %cst_10 : f32 to vector<72x1xf32>
    %21 = vector.broadcast %cst_11 : f32 to vector<72x1xf32>
    %22 = arith.select %19, %20, %21 : vector<72x1xi1>, vector<72x1xf32>
    %c1_i32 = arith.constant 1 : i32
    %23 = vector.broadcast %c1_i32 : i32 to vector<72x1xi32>
    %24 = arith.andi %8, %23 : vector<72x1xi32>
    %c0_i32_12 = arith.constant 0 : i32
    %25 = vector.broadcast %c0_i32_12 : i32 to vector<72x1xi32>
    %26 = arith.cmpi eq, %24, %25 : vector<72x1xi32>
    %cst_13 = arith.constant 1.000000e+00 : f32
    %cst_14 = arith.constant 0.000000e+00 : f32
    %27 = vector.broadcast %cst_13 : f32 to vector<72x1xf32>
    %28 = vector.broadcast %cst_14 : f32 to vector<72x1xf32>
    %29 = arith.select %26, %27, %28 : vector<72x1xi1>, vector<72x1xf32>
    %cst_15 = arith.constant 1.000000e+00 : f32
    %30 = vector.broadcast %cst_15 : f32 to vector<72x1xf32>
    %31 = arith.subf %30, %29 : vector<72x1xf32>
    %c0_16 = arith.constant 0 : index
    %c0_17 = arith.constant 0 : index
    %32 = vector.load %arg0[%c0_16, %c0_17] : memref<64x53xf32, #tpu.memory_space<vmem>>, vector<32x53xf32>
    %c8 = arith.constant 8 : index
    %c0_18 = arith.constant 0 : index
    %33 = vector.load %arg7[%c8, %c0_18] : memref<88x64xf32, #tpu.memory_space<vmem>>, vector<32x53xf32>
    tpu.vector_store %arg7[%c8, %c0_18], %32 {strides = array<i32>} : memref<88x64xf32, #tpu.memory_space<vmem>>, vector<32x53xf32>,
    %c32 = arith.constant 32 : index
    %c0_19 = arith.constant 0 : index
    %34 = vector.load %arg0[%c32, %c0_19] : memref<64x53xf32, #tpu.memory_space<vmem>>, vector<32x53xf32>
    %c48 = arith.constant 48 : index
    %c0_20 = arith.constant 0 : index
    %35 = vector.load %arg7[%c48, %c0_20] : memref<88x64xf32, #tpu.memory_space<vmem>>, vector<32x53xf32>
    tpu.vector_store %arg7[%c48, %c0_20], %34 {strides = array<i32>} : memref<88x64xf32, #tpu.memory_space<vmem>>, vector<32x53xf32>,
    %cst_21 = arith.constant 0.000000e+00 : f32
    %36 = vector.broadcast %cst_21 : f32 to vector<72x64xf32>
    %c5 = arith.constant 5 : index
    %c0_22 = arith.constant 0 : index
    %37 = vector.load %arg7[%c5, %c0_22] : memref<88x64xf32, #tpu.memory_space<vmem>>, vector<72x64xf32>
    %38 = vector.broadcast %31 : vector<72x1xf32> to vector<72x64xf32>
    %39 = arith.mulf %37, %38 : vector<72x64xf32>
    %40 = arith.truncf %39 : vector<72x64xf32> to vector<72x64xbf16>
    %c0_23 = arith.constant 0 : index
    %c0_24 = arith.constant 0 : index
    %c0_25 = arith.constant 0 : index
    %41 = vector.load %arg2[%c0_23, %c0_24, %c0_25] : memref<19x64x64xbf16, #tpu.memory_space<vmem>>, vector<1x64x64xbf16>
    %42 = vector.shape_cast %41 : vector<1x64x64xbf16> to vector<64x64xbf16>
    %cst_26 = arith.constant dense<0.000000e+00> : vector<72x64xf32>
    %43 = tpu.matmul %40, %42, %cst_26 {dimension_numbers = #tpu.dot_dimension_numbers<[1], [0], [0], [1], [0, 0, 1, 1], [], []>} : vector<72x64xbf16>, vector<64x64xbf16>, vector<72x64xf32> -> vector<72x64xf32>
    %44 = arith.addf %36, %43 : vector<72x64xf32>
    %c6 = arith.constant 6 : index
    %c0_27 = arith.constant 0 : index
    %45 = vector.load %arg7[%c6, %c0_27] : memref<88x64xf32, #tpu.memory_space<vmem>>, vector<72x64xf32>
    %46 = arith.truncf %45 : vector<72x64xf32> to vector<72x64xbf16>
    %c1 = arith.constant 1 : index
    %c0_28 = arith.constant 0 : index
    %c0_29 = arith.constant 0 : index
    %47 = vector.load %arg2[%c1, %c0_28, %c0_29] : memref<19x64x64xbf16, #tpu.memory_space<vmem>>, vector<1x64x64xbf16>
    %48 = vector.shape_cast %47 : vector<1x64x64xbf16> to vector<64x64xbf16>
    %cst_30 = arith.constant dense<0.000000e+00> : vector<72x64xf32>
    %49 = tpu.matmul %46, %48, %cst_30 {dimension_numbers = #tpu.dot_dimension_numbers<[1], [0], [0], [1], [0, 0, 1, 1], [], []>} : vector<72x64xbf16>, vector<64x64xbf16>, vector<72x64xf32> -> vector<72x64xf32>
    %50 = arith.addf %44, %49 : vector<72x64xf32>
    %c7 = arith.constant 7 : index
    %c0_31 = arith.constant 0 : index
    %51 = vector.load %arg7[%c7, %c0_31] : memref<88x64xf32, #tpu.memory_space<vmem>>, vector<72x64xf32>
    %52 = vector.broadcast %29 : vector<72x1xf32> to vector<72x64xf32>
    %53 = arith.mulf %51, %52 : vector<72x64xf32>
    %54 = arith.truncf %53 : vector<72x64xf32> to vector<72x64xbf16>
    %c2 = arith.constant 2 : index
    %c0_32 = arith.constant 0 : index
    %c0_33 = arith.constant 0 : index
    %55 = vector.load %arg2[%c2, %c0_32, %c0_33] : memref<19x64x64xbf16, #tpu.memory_space<vmem>>, vector<1x64x64xbf16>
    %56 = vector.shape_cast %55 : vector<1x64x64xbf16> to vector<64x64xbf16>
    %cst_34 = arith.constant dense<0.000000e+00> : vector<72x64xf32>
    %57 = tpu.matmul %54, %56, %cst_34 {dimension_numbers = #tpu.dot_dimension_numbers<[1], [0], [0], [1], [0, 0, 1, 1], [], []>} : vector<72x64xbf16>, vector<64x64xbf16>, vector<72x64xf32> -> vector<72x64xf32>
    %58 = arith.addf %50, %57 : vector<72x64xf32>
    %c7_35 = arith.constant 7 : index
    %c0_36 = arith.constant 0 : index
    %59 = vector.load %arg7[%c7_35, %c0_36] : memref<88x64xf32, #tpu.memory_space<vmem>>, vector<72x64xf32>
    %60 = vector.broadcast %31 : vector<72x1xf32> to vector<72x64xf32>
    %61 = arith.mulf %59, %60 : vector<72x64xf32>
    %62 = arith.truncf %61 : vector<72x64xf32> to vector<72x64xbf16>
    %c3 = arith.constant 3 : index
    %c0_37 = arith.constant 0 : index
    %c0_38 = arith.constant 0 : index
    %63 = vector.load %arg2[%c3, %c0_37, %c0_38] : memref<19x64x64xbf16, #tpu.memory_space<vmem>>, vector<1x64x64xbf16>
    %64 = vector.shape_cast %63 : vector<1x64x64xbf16> to vector<64x64xbf16>
    %cst_39 = arith.constant dense<0.000000e+00> : vector<72x64xf32>
    %65 = tpu.matmul %62, %64, %cst_39 {dimension_numbers = #tpu.dot_dimension_numbers<[1], [0], [0], [1], [0, 0, 1, 1], [], []>} : vector<72x64xbf16>, vector<64x64xbf16>, vector<72x64xf32> -> vector<72x64xf32>
    %66 = arith.addf %58, %65 : vector<72x64xf32>
    %c8_40 = arith.constant 8 : index
    %c0_41 = arith.constant 0 : index
    %67 = vector.load %arg7[%c8_40, %c0_41] : memref<88x64xf32, #tpu.memory_space<vmem>>, vector<72x64xf32>
    %68 = arith.truncf %67 : vector<72x64xf32> to vector<72x64xbf16>
    %c4 = arith.constant 4 : index
    %c0_42 = arith.constant 0 : index
    %c0_43 = arith.constant 0 : index
    %69 = vector.load %arg2[%c4, %c0_42, %c0_43] : memref<19x64x64xbf16, #tpu.memory_space<vmem>>, vector<1x64x64xbf16>
    %70 = vector.shape_cast %69 : vector<1x64x64xbf16> to vector<64x64xbf16>
    %cst_44 = arith.constant dense<0.000000e+00> : vector<72x64xf32>
    %71 = tpu.matmul %68, %70, %cst_44 {dimension_numbers = #tpu.dot_dimension_numbers<[1], [0], [0], [1], [0, 0, 1, 1], [], []>} : vector<72x64xbf16>, vector<64x64xbf16>, vector<72x64xf32> -> vector<72x64xf32>
    %72 = arith.addf %66, %71 : vector<72x64xf32>
    %c9 = arith.constant 9 : index
    %c0_45 = arith.constant 0 : index
    %73 = vector.load %arg7[%c9, %c0_45] : memref<88x64xf32, #tpu.memory_space<vmem>>, vector<72x64xf32>
    %74 = vector.broadcast %29 : vector<72x1xf32> to vector<72x64xf32>
    %75 = arith.mulf %73, %74 : vector<72x64xf32>
    %76 = arith.truncf %75 : vector<72x64xf32> to vector<72x64xbf16>
    %c5_46 = arith.constant 5 : index
    %c0_47 = arith.constant 0 : index
    %c0_48 = arith.constant 0 : index
    %77 = vector.load %arg2[%c5_46, %c0_47, %c0_48] : memref<19x64x64xbf16, #tpu.memory_space<vmem>>, vector<1x64x64xbf16>
    %78 = vector.shape_cast %77 : vector<1x64x64xbf16> to vector<64x64xbf16>
    %cst_49 = arith.constant dense<0.000000e+00> : vector<72x64xf32>
    %79 = tpu.matmul %76, %78, %cst_49 {dimension_numbers = #tpu.dot_dimension_numbers<[1], [0], [0], [1], [0, 0, 1, 1], [], []>} : vector<72x64xbf16>, vector<64x64xbf16>, vector<72x64xf32> -> vector<72x64xf32>
    %80 = arith.addf %72, %79 : vector<72x64xf32>
    %c9_50 = arith.constant 9 : index
    %c0_51 = arith.constant 0 : index
    %81 = vector.load %arg7[%c9_50, %c0_51] : memref<88x64xf32, #tpu.memory_space<vmem>>, vector<72x64xf32>
    %82 = vector.broadcast %31 : vector<72x1xf32> to vector<72x64xf32>
    %83 = arith.mulf %81, %82 : vector<72x64xf32>
    %84 = arith.truncf %83 : vector<72x64xf32> to vector<72x64xbf16>
    %c6_52 = arith.constant 6 : index
    %c0_53 = arith.constant 0 : index
    %c0_54 = arith.constant 0 : index
    %85 = vector.load %arg2[%c6_52, %c0_53, %c0_54] : memref<19x64x64xbf16, #tpu.memory_space<vmem>>, vector<1x64x64xbf16>
    %86 = vector.shape_cast %85 : vector<1x64x64xbf16> to vector<64x64xbf16>
    %cst_55 = arith.constant dense<0.000000e+00> : vector<72x64xf32>
    %87 = tpu.matmul %84, %86, %cst_55 {dimension_numbers = #tpu.dot_dimension_numbers<[1], [0], [0], [1], [0, 0, 1, 1], [], []>} : vector<72x64xbf16>, vector<64x64xbf16>, vector<72x64xf32> -> vector<72x64xf32>
    %88 = arith.addf %80, %87 : vector<72x64xf32>
    %c10 = arith.constant 10 : index
    %c0_56 = arith.constant 0 : index
    %89 = vector.load %arg7[%c10, %c0_56] : memref<88x64xf32, #tpu.memory_space<vmem>>, vector<72x64xf32>
    %90 = arith.truncf %89 : vector<72x64xf32> to vector<72x64xbf16>
    %c7_57 = arith.constant 7 : index
    %c0_58 = arith.constant 0 : index
    %c0_59 = arith.constant 0 : index
    %91 = vector.load %arg2[%c7_57, %c0_58, %c0_59] : memref<19x64x64xbf16, #tpu.memory_space<vmem>>, vector<1x64x64xbf16>
    %92 = vector.shape_cast %91 : vector<1x64x64xbf16> to vector<64x64xbf16>
    %cst_60 = arith.constant dense<0.000000e+00> : vector<72x64xf32>
    %93 = tpu.matmul %90, %92, %cst_60 {dimension_numbers = #tpu.dot_dimension_numbers<[1], [0], [0], [1], [0, 0, 1, 1], [], []>} : vector<72x64xbf16>, vector<64x64xbf16>, vector<72x64xf32> -> vector<72x64xf32>
    %94 = arith.addf %88, %93 : vector<72x64xf32>
    %c11 = arith.constant 11 : index
    %c0_61 = arith.constant 0 : index
    %95 = vector.load %arg7[%c11, %c0_61] : memref<88x64xf32, #tpu.memory_space<vmem>>, vector<72x64xf32>
    %96 = vector.broadcast %29 : vector<72x1xf32> to vector<72x64xf32>
    %97 = arith.mulf %95, %96 : vector<72x64xf32>
    %98 = arith.truncf %97 : vector<72x64xf32> to vector<72x64xbf16>
    %c8_62 = arith.constant 8 : index
    %c0_63 = arith.constant 0 : index
    %c0_64 = arith.constant 0 : index
    %99 = vector.load %arg2[%c8_62, %c0_63, %c0_64] : memref<19x64x64xbf16, #tpu.memory_space<vmem>>, vector<1x64x64xbf16>
    %100 = vector.shape_cast %99 : vector<1x64x64xbf16> to vector<64x64xbf16>
    %cst_65 = arith.constant dense<0.000000e+00> : vector<72x64xf32>
    %101 = tpu.matmul %98, %100, %cst_65 {dimension_numbers = #tpu.dot_dimension_numbers<[1], [0], [0], [1], [0, 0, 1, 1], [], []>} : vector<72x64xbf16>, vector<64x64xbf16>, vector<72x64xf32> -> vector<72x64xf32>
    %102 = arith.addf %94, %101 : vector<72x64xf32>
    %cst_66 = arith.constant 0.000000e+00 : f32
    %103 = vector.broadcast %cst_66 : f32 to vector<72x64xf32>
    %104 = arith.maximumf %102, %103 : vector<72x64xf32>
    %105 = vector.broadcast %22 : vector<72x1xf32> to vector<72x64xf32>
    %106 = arith.mulf %104, %105 : vector<72x64xf32>
    %c8_67 = arith.constant 8 : index
    %c0_68 = arith.constant 0 : index
    %107 = vector.load %arg8[%c8_67, %c0_68] : memref<88x64xf32, #tpu.memory_space<vmem>>, vector<72x64xf32>
    tpu.vector_store %arg8[%c8_67, %c0_68], %106 {strides = array<i32>} : memref<88x64xf32, #tpu.memory_space<vmem>>, vector<72x64xf32>,
    %cst_69 = arith.constant 0.000000e+00 : f32
    %108 = vector.broadcast %cst_69 : f32 to vector<72x64xf32>
    %c5_70 = arith.constant 5 : index
    %c0_71 = arith.constant 0 : index
    %109 = vector.load %arg8[%c5_70, %c0_71] : memref<88x64xf32, #tpu.memory_space<vmem>>, vector<72x64xf32>
    %110 = vector.broadcast %31 : vector<72x1xf32> to vector<72x64xf32>
    %111 = arith.mulf %109, %110 : vector<72x64xf32>
    %112 = arith.truncf %111 : vector<72x64xf32> to vector<72x64xbf16>
    %c9_72 = arith.constant 9 : index
    %c0_73 = arith.constant 0 : index
    %c0_74 = arith.constant 0 : index
    %113 = vector.load %arg2[%c9_72, %c0_73, %c0_74] : memref<19x64x64xbf16, #tpu.memory_space<vmem>>, vector<1x64x64xbf16>
    %114 = vector.shape_cast %113 : vector<1x64x64xbf16> to vector<64x64xbf16>
    %cst_75 = arith.constant dense<0.000000e+00> : vector<72x64xf32>
    %115 = tpu.matmul %112, %114, %cst_75 {dimension_numbers = #tpu.dot_dimension_numbers<[1], [0], [0], [1], [0, 0, 1, 1], [], []>} : vector<72x64xbf16>, vector<64x64xbf16>, vector<72x64xf32> -> vector<72x64xf32>
    %116 = arith.addf %108, %115 : vector<72x64xf32>
    %c6_76 = arith.constant 6 : index
    %c0_77 = arith.constant 0 : index
    %117 = vector.load %arg8[%c6_76, %c0_77] : memref<88x64xf32, #tpu.memory_space<vmem>>, vector<72x64xf32>
    %118 = arith.truncf %117 : vector<72x64xf32> to vector<72x64xbf16>
    %c10_78 = arith.constant 10 : index
    %c0_79 = arith.constant 0 : index
    %c0_80 = arith.constant 0 : index
    %119 = vector.load %arg2[%c10_78, %c0_79, %c0_80] : memref<19x64x64xbf16, #tpu.memory_space<vmem>>, vector<1x64x64xbf16>
    %120 = vector.shape_cast %119 : vector<1x64x64xbf16> to vector<64x64xbf16>
    %cst_81 = arith.constant dense<0.000000e+00> : vector<72x64xf32>
    %121 = tpu.matmul %118, %120, %cst_81 {dimension_numbers = #tpu.dot_dimension_numbers<[1], [0], [0], [1], [0, 0, 1, 1], [], []>} : vector<72x64xbf16>, vector<64x64xbf16>, vector<72x64xf32> -> vector<72x64xf32>
    %122 = arith.addf %116, %121 : vector<72x64xf32>
    %c7_82 = arith.constant 7 : index
    %c0_83 = arith.constant 0 : index
    %123 = vector.load %arg8[%c7_82, %c0_83] : memref<88x64xf32, #tpu.memory_space<vmem>>, vector<72x64xf32>
    %124 = vector.broadcast %29 : vector<72x1xf32> to vector<72x64xf32>
    %125 = arith.mulf %123, %124 : vector<72x64xf32>
    %126 = arith.truncf %125 : vector<72x64xf32> to vector<72x64xbf16>
    %c11_84 = arith.constant 11 : index
    %c0_85 = arith.constant 0 : index
    %c0_86 = arith.constant 0 : index
    %127 = vector.load %arg2[%c11_84, %c0_85, %c0_86] : memref<19x64x64xbf16, #tpu.memory_space<vmem>>, vector<1x64x64xbf16>
    %128 = vector.shape_cast %127 : vector<1x64x64xbf16> to vector<64x64xbf16>
    %cst_87 = arith.constant dense<0.000000e+00> : vector<72x64xf32>
    %129 = tpu.matmul %126, %128, %cst_87 {dimension_numbers = #tpu.dot_dimension_numbers<[1], [0], [0], [1], [0, 0, 1, 1], [], []>} : vector<72x64xbf16>, vector<64x64xbf16>, vector<72x64xf32> -> vector<72x64xf32>
    %130 = arith.addf %122, %129 : vector<72x64xf32>
    %c7_88 = arith.constant 7 : index
    %c0_89 = arith.constant 0 : index
    %131 = vector.load %arg8[%c7_88, %c0_89] : memref<88x64xf32, #tpu.memory_space<vmem>>, vector<72x64xf32>
    %132 = vector.broadcast %31 : vector<72x1xf32> to vector<72x64xf32>
    %133 = arith.mulf %131, %132 : vector<72x64xf32>
    %134 = arith.truncf %133 : vector<72x64xf32> to vector<72x64xbf16>
    %c12 = arith.constant 12 : index
    %c0_90 = arith.constant 0 : index
    %c0_91 = arith.constant 0 : index
    %135 = vector.load %arg2[%c12, %c0_90, %c0_91] : memref<19x64x64xbf16, #tpu.memory_space<vmem>>, vector<1x64x64xbf16>
    %136 = vector.shape_cast %135 : vector<1x64x64xbf16> to vector<64x64xbf16>
    %cst_92 = arith.constant dense<0.000000e+00> : vector<72x64xf32>
    %137 = tpu.matmul %134, %136, %cst_92 {dimension_numbers = #tpu.dot_dimension_numbers<[1], [0], [0], [1], [0, 0, 1, 1], [], []>} : vector<72x64xbf16>, vector<64x64xbf16>, vector<72x64xf32> -> vector<72x64xf32>
    %138 = arith.addf %130, %137 : vector<72x64xf32>
    %c8_93 = arith.constant 8 : index
    %c0_94 = arith.constant 0 : index
    %139 = vector.load %arg8[%c8_93, %c0_94] : memref<88x64xf32, #tpu.memory_space<vmem>>, vector<72x64xf32>
    %140 = arith.truncf %139 : vector<72x64xf32> to vector<72x64xbf16>
    %c13 = arith.constant 13 : index
    %c0_95 = arith.constant 0 : index
    %c0_96 = arith.constant 0 : index
    %141 = vector.load %arg2[%c13, %c0_95, %c0_96] : memref<19x64x64xbf16, #tpu.memory_space<vmem>>, vector<1x64x64xbf16>
    %142 = vector.shape_cast %141 : vector<1x64x64xbf16> to vector<64x64xbf16>
    %cst_97 = arith.constant dense<0.000000e+00> : vector<72x64xf32>
    %143 = tpu.matmul %140, %142, %cst_97 {dimension_numbers = #tpu.dot_dimension_numbers<[1], [0], [0], [1], [0, 0, 1, 1], [], []>} : vector<72x64xbf16>, vector<64x64xbf16>, vector<72x64xf32> -> vector<72x64xf32>
    %144 = arith.addf %138, %143 : vector<72x64xf32>
    %c9_98 = arith.constant 9 : index
    %c0_99 = arith.constant 0 : index
    %145 = vector.load %arg8[%c9_98, %c0_99] : memref<88x64xf32, #tpu.memory_space<vmem>>, vector<72x64xf32>
    %146 = vector.broadcast %29 : vector<72x1xf32> to vector<72x64xf32>
    %147 = arith.mulf %145, %146 : vector<72x64xf32>
    %148 = arith.truncf %147 : vector<72x64xf32> to vector<72x64xbf16>
    %c14 = arith.constant 14 : index
    %c0_100 = arith.constant 0 : index
    %c0_101 = arith.constant 0 : index
    %149 = vector.load %arg2[%c14, %c0_100, %c0_101] : memref<19x64x64xbf16, #tpu.memory_space<vmem>>, vector<1x64x64xbf16>
    %150 = vector.shape_cast %149 : vector<1x64x64xbf16> to vector<64x64xbf16>
    %cst_102 = arith.constant dense<0.000000e+00> : vector<72x64xf32>
    %151 = tpu.matmul %148, %150, %cst_102 {dimension_numbers = #tpu.dot_dimension_numbers<[1], [0], [0], [1], [0, 0, 1, 1], [], []>} : vector<72x64xbf16>, vector<64x64xbf16>, vector<72x64xf32> -> vector<72x64xf32>
    %152 = arith.addf %144, %151 : vector<72x64xf32>
    %c9_103 = arith.constant 9 : index
    %c0_104 = arith.constant 0 : index
    %153 = vector.load %arg8[%c9_103, %c0_104] : memref<88x64xf32, #tpu.memory_space<vmem>>, vector<72x64xf32>
    %154 = vector.broadcast %31 : vector<72x1xf32> to vector<72x64xf32>
    %155 = arith.mulf %153, %154 : vector<72x64xf32>
    %156 = arith.truncf %155 : vector<72x64xf32> to vector<72x64xbf16>
    %c15 = arith.constant 15 : index
    %c0_105 = arith.constant 0 : index
    %c0_106 = arith.constant 0 : index
    %157 = vector.load %arg2[%c15, %c0_105, %c0_106] : memref<19x64x64xbf16, #tpu.memory_space<vmem>>, vector<1x64x64xbf16>
    %158 = vector.shape_cast %157 : vector<1x64x64xbf16> to vector<64x64xbf16>
    %cst_107 = arith.constant dense<0.000000e+00> : vector<72x64xf32>
    %159 = tpu.matmul %156, %158, %cst_107 {dimension_numbers = #tpu.dot_dimension_numbers<[1], [0], [0], [1], [0, 0, 1, 1], [], []>} : vector<72x64xbf16>, vector<64x64xbf16>, vector<72x64xf32> -> vector<72x64xf32>
    %160 = arith.addf %152, %159 : vector<72x64xf32>
    %c10_108 = arith.constant 10 : index
    %c0_109 = arith.constant 0 : index
    %161 = vector.load %arg8[%c10_108, %c0_109] : memref<88x64xf32, #tpu.memory_space<vmem>>, vector<72x64xf32>
    %162 = arith.truncf %161 : vector<72x64xf32> to vector<72x64xbf16>
    %c16 = arith.constant 16 : index
    %c0_110 = arith.constant 0 : index
    %c0_111 = arith.constant 0 : index
    %163 = vector.load %arg2[%c16, %c0_110, %c0_111] : memref<19x64x64xbf16, #tpu.memory_space<vmem>>, vector<1x64x64xbf16>
    %164 = vector.shape_cast %163 : vector<1x64x64xbf16> to vector<64x64xbf16>
    %cst_112 = arith.constant dense<0.000000e+00> : vector<72x64xf32>
    %165 = tpu.matmul %162, %164, %cst_112 {dimension_numbers = #tpu.dot_dimension_numbers<[1], [0], [0], [1], [0, 0, 1, 1], [], []>} : vector<72x64xbf16>, vector<64x64xbf16>, vector<72x64xf32> -> vector<72x64xf32>
    %166 = arith.addf %160, %165 : vector<72x64xf32>
    %c11_113 = arith.constant 11 : index
    %c0_114 = arith.constant 0 : index
    %167 = vector.load %arg8[%c11_113, %c0_114] : memref<88x64xf32, #tpu.memory_space<vmem>>, vector<72x64xf32>
    %168 = vector.broadcast %29 : vector<72x1xf32> to vector<72x64xf32>
    %169 = arith.mulf %167, %168 : vector<72x64xf32>
    %170 = arith.truncf %169 : vector<72x64xf32> to vector<72x64xbf16>
    %c17 = arith.constant 17 : index
    %c0_115 = arith.constant 0 : index
    %c0_116 = arith.constant 0 : index
    %171 = vector.load %arg2[%c17, %c0_115, %c0_116] : memref<19x64x64xbf16, #tpu.memory_space<vmem>>, vector<1x64x64xbf16>
    %172 = vector.shape_cast %171 : vector<1x64x64xbf16> to vector<64x64xbf16>
    %cst_117 = arith.constant dense<0.000000e+00> : vector<72x64xf32>
    %173 = tpu.matmul %170, %172, %cst_117 {dimension_numbers = #tpu.dot_dimension_numbers<[1], [0], [0], [1], [0, 0, 1, 1], [], []>} : vector<72x64xbf16>, vector<64x64xbf16>, vector<72x64xf32> -> vector<72x64xf32>
    %174 = arith.addf %166, %173 : vector<72x64xf32>
    %c8_118 = arith.constant 8 : index
    %c0_119 = arith.constant 0 : index
    %175 = vector.load %arg7[%c8_118, %c0_119] : memref<88x64xf32, #tpu.memory_space<vmem>>, vector<72x64xf32>
    %176 = arith.truncf %175 : vector<72x64xf32> to vector<72x64xbf16>
    %c18 = arith.constant 18 : index
    %c0_120 = arith.constant 0 : index
    %c0_121 = arith.constant 0 : index
    %177 = vector.load %arg2[%c18, %c0_120, %c0_121] : memref<19x64x64xbf16, #tpu.memory_space<vmem>>, vector<1x64x64xbf16>
    %178 = vector.shape_cast %177 : vector<1x64x64xbf16> to vector<64x64xbf16>
    %cst_122 = arith.constant dense<0.000000e+00> : vector<72x64xf32>
    %179 = tpu.matmul %176, %178, %cst_122 {dimension_numbers = #tpu.dot_dimension_numbers<[1], [0], [0], [1], [0, 0, 1, 1], [], []>} : vector<72x64xbf16>, vector<64x64xbf16>, vector<72x64xf32> -> vector<72x64xf32>
    %180 = arith.addf %174, %179 : vector<72x64xf32>
    %cst_123 = arith.constant 0.000000e+00 : f32
    %181 = vector.broadcast %cst_123 : f32 to vector<72x64xf32>
    %182 = arith.maximumf %180, %181 : vector<72x64xf32>
    %183 = vector.broadcast %22 : vector<72x1xf32> to vector<72x64xf32>
    %184 = arith.mulf %182, %183 : vector<72x64xf32>
    %c8_124 = arith.constant 8 : index
    %c0_125 = arith.constant 0 : index
    %185 = vector.load %arg9[%c8_124, %c0_125] : memref<88x64xf32, #tpu.memory_space<vmem>>, vector<72x64xf32>
    tpu.vector_store %arg9[%c8_124, %c0_125], %184 {strides = array<i32>} : memref<88x64xf32, #tpu.memory_space<vmem>>, vector<72x64xf32>,
    %cst_126 = arith.constant 0.000000e+00 : f32
    %186 = vector.broadcast %cst_126 : f32 to vector<72x32xf32>
    %c5_127 = arith.constant 5 : index
    %c0_128 = arith.constant 0 : index
    %187 = vector.load %arg9[%c5_127, %c0_128] : memref<88x64xf32, #tpu.memory_space<vmem>>, vector<72x64xf32>
    %188 = vector.broadcast %31 : vector<72x1xf32> to vector<72x64xf32>
    %189 = arith.mulf %187, %188 : vector<72x64xf32>
    %190 = arith.truncf %189 : vector<72x64xf32> to vector<72x64xbf16>
    %c0_129 = arith.constant 0 : index
    %c0_130 = arith.constant 0 : index
    %c0_131 = arith.constant 0 : index
    %191 = vector.load %arg3[%c0_129, %c0_130, %c0_131] : memref<19x64x32xbf16, #tpu.memory_space<vmem>>, vector<1x64x32xbf16>
    %192 = vector.shape_cast %191 : vector<1x64x32xbf16> to vector<64x32xbf16>
    %cst_132 = arith.constant dense<0.000000e+00> : vector<72x32xf32>
    %193 = tpu.matmul %190, %192, %cst_132 {dimension_numbers = #tpu.dot_dimension_numbers<[1], [0], [0], [1], [0, 0, 1, 1], [], []>} : vector<72x64xbf16>, vector<64x32xbf16>, vector<72x32xf32> -> vector<72x32xf32>
    %194 = arith.addf %186, %193 : vector<72x32xf32>
    %c6_133 = arith.constant 6 : index
    %c0_134 = arith.constant 0 : index
    %195 = vector.load %arg9[%c6_133, %c0_134] : memref<88x64xf32, #tpu.memory_space<vmem>>, vector<72x64xf32>
    %196 = arith.truncf %195 : vector<72x64xf32> to vector<72x64xbf16>
    %c1_135 = arith.constant 1 : index
    %c0_136 = arith.constant 0 : index
    %c0_137 = arith.constant 0 : index
    %197 = vector.load %arg3[%c1_135, %c0_136, %c0_137] : memref<19x64x32xbf16, #tpu.memory_space<vmem>>, vector<1x64x32xbf16>
    %198 = vector.shape_cast %197 : vector<1x64x32xbf16> to vector<64x32xbf16>
    %cst_138 = arith.constant dense<0.000000e+00> : vector<72x32xf32>
    %199 = tpu.matmul %196, %198, %cst_138 {dimension_numbers = #tpu.dot_dimension_numbers<[1], [0], [0], [1], [0, 0, 1, 1], [], []>} : vector<72x64xbf16>, vector<64x32xbf16>, vector<72x32xf32> -> vector<72x32xf32>
    %200 = arith.addf %194, %199 : vector<72x32xf32>
    %c7_139 = arith.constant 7 : index
    %c0_140 = arith.constant 0 : index
    %201 = vector.load %arg9[%c7_139, %c0_140] : memref<88x64xf32, #tpu.memory_space<vmem>>, vector<72x64xf32>
    %202 = vector.broadcast %29 : vector<72x1xf32> to vector<72x64xf32>
    %203 = arith.mulf %201, %202 : vector<72x64xf32>
    %204 = arith.truncf %203 : vector<72x64xf32> to vector<72x64xbf16>
    %c2_141 = arith.constant 2 : index
    %c0_142 = arith.constant 0 : index
    %c0_143 = arith.constant 0 : index
    %205 = vector.load %arg3[%c2_141, %c0_142, %c0_143] : memref<19x64x32xbf16, #tpu.memory_space<vmem>>, vector<1x64x32xbf16>
    %206 = vector.shape_cast %205 : vector<1x64x32xbf16> to vector<64x32xbf16>
    %cst_144 = arith.constant dense<0.000000e+00> : vector<72x32xf32>
    %207 = tpu.matmul %204, %206, %cst_144 {dimension_numbers = #tpu.dot_dimension_numbers<[1], [0], [0], [1], [0, 0, 1, 1], [], []>} : vector<72x64xbf16>, vector<64x32xbf16>, vector<72x32xf32> -> vector<72x32xf32>
    %208 = arith.addf %200, %207 : vector<72x32xf32>
    %c7_145 = arith.constant 7 : index
    %c0_146 = arith.constant 0 : index
    %209 = vector.load %arg9[%c7_145, %c0_146] : memref<88x64xf32, #tpu.memory_space<vmem>>, vector<72x64xf32>
    %210 = vector.broadcast %31 : vector<72x1xf32> to vector<72x64xf32>
    %211 = arith.mulf %209, %210 : vector<72x64xf32>
    %212 = arith.truncf %211 : vector<72x64xf32> to vector<72x64xbf16>
    %c3_147 = arith.constant 3 : index
    %c0_148 = arith.constant 0 : index
    %c0_149 = arith.constant 0 : index
    %213 = vector.load %arg3[%c3_147, %c0_148, %c0_149] : memref<19x64x32xbf16, #tpu.memory_space<vmem>>, vector<1x64x32xbf16>
    %214 = vector.shape_cast %213 : vector<1x64x32xbf16> to vector<64x32xbf16>
    %cst_150 = arith.constant dense<0.000000e+00> : vector<72x32xf32>
    %215 = tpu.matmul %212, %214, %cst_150 {dimension_numbers = #tpu.dot_dimension_numbers<[1], [0], [0], [1], [0, 0, 1, 1], [], []>} : vector<72x64xbf16>, vector<64x32xbf16>, vector<72x32xf32> -> vector<72x32xf32>
    %216 = arith.addf %208, %215 : vector<72x32xf32>
    %c8_151 = arith.constant 8 : index
    %c0_152 = arith.constant 0 : index
    %217 = vector.load %arg9[%c8_151, %c0_152] : memref<88x64xf32, #tpu.memory_space<vmem>>, vector<72x64xf32>
    %218 = arith.truncf %217 : vector<72x64xf32> to vector<72x64xbf16>
    %c4_153 = arith.constant 4 : index
    %c0_154 = arith.constant 0 : index
    %c0_155 = arith.constant 0 : index
    %219 = vector.load %arg3[%c4_153, %c0_154, %c0_155] : memref<19x64x32xbf16, #tpu.memory_space<vmem>>, vector<1x64x32xbf16>
    %220 = vector.shape_cast %219 : vector<1x64x32xbf16> to vector<64x32xbf16>
    %cst_156 = arith.constant dense<0.000000e+00> : vector<72x32xf32>
    %221 = tpu.matmul %218, %220, %cst_156 {dimension_numbers = #tpu.dot_dimension_numbers<[1], [0], [0], [1], [0, 0, 1, 1], [], []>} : vector<72x64xbf16>, vector<64x32xbf16>, vector<72x32xf32> -> vector<72x32xf32>
    %222 = arith.addf %216, %221 : vector<72x32xf32>
    %c9_157 = arith.constant 9 : index
    %c0_158 = arith.constant 0 : index
    %223 = vector.load %arg9[%c9_157, %c0_158] : memref<88x64xf32, #tpu.memory_space<vmem>>, vector<72x64xf32>
    %224 = vector.broadcast %29 : vector<72x1xf32> to vector<72x64xf32>
    %225 = arith.mulf %223, %224 : vector<72x64xf32>
    %226 = arith.truncf %225 : vector<72x64xf32> to vector<72x64xbf16>
    %c5_159 = arith.constant 5 : index
    %c0_160 = arith.constant 0 : index
    %c0_161 = arith.constant 0 : index
    %227 = vector.load %arg3[%c5_159, %c0_160, %c0_161] : memref<19x64x32xbf16, #tpu.memory_space<vmem>>, vector<1x64x32xbf16>
    %228 = vector.shape_cast %227 : vector<1x64x32xbf16> to vector<64x32xbf16>
    %cst_162 = arith.constant dense<0.000000e+00> : vector<72x32xf32>
    %229 = tpu.matmul %226, %228, %cst_162 {dimension_numbers = #tpu.dot_dimension_numbers<[1], [0], [0], [1], [0, 0, 1, 1], [], []>} : vector<72x64xbf16>, vector<64x32xbf16>, vector<72x32xf32> -> vector<72x32xf32>
    %230 = arith.addf %222, %229 : vector<72x32xf32>
    %c9_163 = arith.constant 9 : index
    %c0_164 = arith.constant 0 : index
    %231 = vector.load %arg9[%c9_163, %c0_164] : memref<88x64xf32, #tpu.memory_space<vmem>>, vector<72x64xf32>
    %232 = vector.broadcast %31 : vector<72x1xf32> to vector<72x64xf32>
    %233 = arith.mulf %231, %232 : vector<72x64xf32>
    %234 = arith.truncf %233 : vector<72x64xf32> to vector<72x64xbf16>
    %c6_165 = arith.constant 6 : index
    %c0_166 = arith.constant 0 : index
    %c0_167 = arith.constant 0 : index
    %235 = vector.load %arg3[%c6_165, %c0_166, %c0_167] : memref<19x64x32xbf16, #tpu.memory_space<vmem>>, vector<1x64x32xbf16>
    %236 = vector.shape_cast %235 : vector<1x64x32xbf16> to vector<64x32xbf16>
    %cst_168 = arith.constant dense<0.000000e+00> : vector<72x32xf32>
    %237 = tpu.matmul %234, %236, %cst_168 {dimension_numbers = #tpu.dot_dimension_numbers<[1], [0], [0], [1], [0, 0, 1, 1], [], []>} : vector<72x64xbf16>, vector<64x32xbf16>, vector<72x32xf32> -> vector<72x32xf32>
    %238 = arith.addf %230, %237 : vector<72x32xf32>
    %c10_169 = arith.constant 10 : index
    %c0_170 = arith.constant 0 : index
    %239 = vector.load %arg9[%c10_169, %c0_170] : memref<88x64xf32, #tpu.memory_space<vmem>>, vector<72x64xf32>
    %240 = arith.truncf %239 : vector<72x64xf32> to vector<72x64xbf16>
    %c7_171 = arith.constant 7 : index
    %c0_172 = arith.constant 0 : index
    %c0_173 = arith.constant 0 : index
    %241 = vector.load %arg3[%c7_171, %c0_172, %c0_173] : memref<19x64x32xbf16, #tpu.memory_space<vmem>>, vector<1x64x32xbf16>
    %242 = vector.shape_cast %241 : vector<1x64x32xbf16> to vector<64x32xbf16>
    %cst_174 = arith.constant dense<0.000000e+00> : vector<72x32xf32>
    %243 = tpu.matmul %240, %242, %cst_174 {dimension_numbers = #tpu.dot_dimension_numbers<[1], [0], [0], [1], [0, 0, 1, 1], [], []>} : vector<72x64xbf16>, vector<64x32xbf16>, vector<72x32xf32> -> vector<72x32xf32>
    %244 = arith.addf %238, %243 : vector<72x32xf32>
    %c11_175 = arith.constant 11 : index
    %c0_176 = arith.constant 0 : index
    %245 = vector.load %arg9[%c11_175, %c0_176] : memref<88x64xf32, #tpu.memory_space<vmem>>, vector<72x64xf32>
    %246 = vector.broadcast %29 : vector<72x1xf32> to vector<72x64xf32>
    %247 = arith.mulf %245, %246 : vector<72x64xf32>
    %248 = arith.truncf %247 : vector<72x64xf32> to vector<72x64xbf16>
    %c8_177 = arith.constant 8 : index
    %c0_178 = arith.constant 0 : index
    %c0_179 = arith.constant 0 : index
    %249 = vector.load %arg3[%c8_177, %c0_178, %c0_179] : memref<19x64x32xbf16, #tpu.memory_space<vmem>>, vector<1x64x32xbf16>
    %250 = vector.shape_cast %249 : vector<1x64x32xbf16> to vector<64x32xbf16>
    %cst_180 = arith.constant dense<0.000000e+00> : vector<72x32xf32>
    %251 = tpu.matmul %248, %250, %cst_180 {dimension_numbers = #tpu.dot_dimension_numbers<[1], [0], [0], [1], [0, 0, 1, 1], [], []>} : vector<72x64xbf16>, vector<64x32xbf16>, vector<72x32xf32> -> vector<72x32xf32>
    %252 = arith.addf %244, %251 : vector<72x32xf32>
    %cst_181 = arith.constant 0.000000e+00 : f32
    %253 = vector.broadcast %cst_181 : f32 to vector<72x32xf32>
    %254 = arith.maximumf %252, %253 : vector<72x32xf32>
    %255 = vector.broadcast %22 : vector<72x1xf32> to vector<72x32xf32>
    %256 = arith.mulf %254, %255 : vector<72x32xf32>
    %c8_182 = arith.constant 8 : index
    %c0_183 = arith.constant 0 : index
    %257 = vector.load %arg10[%c8_182, %c0_183] : memref<88x64xf32, #tpu.memory_space<vmem>>, vector<72x32xf32>
    tpu.vector_store %arg10[%c8_182, %c0_183], %256 {strides = array<i32>} : memref<88x64xf32, #tpu.memory_space<vmem>>, vector<72x32xf32>,
    %cst_184 = arith.constant 0.000000e+00 : f32
    %258 = vector.broadcast %cst_184 : f32 to vector<72x32xf32>
    %c5_185 = arith.constant 5 : index
    %c0_186 = arith.constant 0 : index
    %259 = vector.load %arg10[%c5_185, %c0_186] : memref<88x64xf32, #tpu.memory_space<vmem>>, vector<72x64xf32>
    %260 = vector.broadcast %31 : vector<72x1xf32> to vector<72x64xf32>
    %261 = arith.mulf %259, %260 : vector<72x64xf32>
    %262 = arith.truncf %261 : vector<72x64xf32> to vector<72x64xbf16>
    %c9_187 = arith.constant 9 : index
    %c0_188 = arith.constant 0 : index
    %c0_189 = arith.constant 0 : index
    %263 = vector.load %arg3[%c9_187, %c0_188, %c0_189] : memref<19x64x32xbf16, #tpu.memory_space<vmem>>, vector<1x64x32xbf16>
    %264 = vector.shape_cast %263 : vector<1x64x32xbf16> to vector<64x32xbf16>
    %cst_190 = arith.constant dense<0.000000e+00> : vector<72x32xf32>
    %265 = tpu.matmul %262, %264, %cst_190 {dimension_numbers = #tpu.dot_dimension_numbers<[1], [0], [0], [1], [0, 0, 1, 1], [], []>} : vector<72x64xbf16>, vector<64x32xbf16>, vector<72x32xf32> -> vector<72x32xf32>
    %266 = arith.addf %258, %265 : vector<72x32xf32>
    %c6_191 = arith.constant 6 : index
    %c0_192 = arith.constant 0 : index
    %267 = vector.load %arg10[%c6_191, %c0_192] : memref<88x64xf32, #tpu.memory_space<vmem>>, vector<72x64xf32>
    %268 = arith.truncf %267 : vector<72x64xf32> to vector<72x64xbf16>
    %c10_193 = arith.constant 10 : index
    %c0_194 = arith.constant 0 : index
    %c0_195 = arith.constant 0 : index
    %269 = vector.load %arg3[%c10_193, %c0_194, %c0_195] : memref<19x64x32xbf16, #tpu.memory_space<vmem>>, vector<1x64x32xbf16>
    %270 = vector.shape_cast %269 : vector<1x64x32xbf16> to vector<64x32xbf16>
    %cst_196 = arith.constant dense<0.000000e+00> : vector<72x32xf32>
    %271 = tpu.matmul %268, %270, %cst_196 {dimension_numbers = #tpu.dot_dimension_numbers<[1], [0], [0], [1], [0, 0, 1, 1], [], []>} : vector<72x64xbf16>, vector<64x32xbf16>, vector<72x32xf32> -> vector<72x32xf32>
    %272 = arith.addf %266, %271 : vector<72x32xf32>
    %c7_197 = arith.constant 7 : index
    %c0_198 = arith.constant 0 : index
    %273 = vector.load %arg10[%c7_197, %c0_198] : memref<88x64xf32, #tpu.memory_space<vmem>>, vector<72x64xf32>
    %274 = vector.broadcast %29 : vector<72x1xf32> to vector<72x64xf32>
    %275 = arith.mulf %273, %274 : vector<72x64xf32>
    %276 = arith.truncf %275 : vector<72x64xf32> to vector<72x64xbf16>
    %c11_199 = arith.constant 11 : index
    %c0_200 = arith.constant 0 : index
    %c0_201 = arith.constant 0 : index
    %277 = vector.load %arg3[%c11_199, %c0_200, %c0_201] : memref<19x64x32xbf16, #tpu.memory_space<vmem>>, vector<1x64x32xbf16>
    %278 = vector.shape_cast %277 : vector<1x64x32xbf16> to vector<64x32xbf16>
    %cst_202 = arith.constant dense<0.000000e+00> : vector<72x32xf32>
    %279 = tpu.matmul %276, %278, %cst_202 {dimension_numbers = #tpu.dot_dimension_numbers<[1], [0], [0], [1], [0, 0, 1, 1], [], []>} : vector<72x64xbf16>, vector<64x32xbf16>, vector<72x32xf32> -> vector<72x32xf32>
    %280 = arith.addf %272, %279 : vector<72x32xf32>
    %c7_203 = arith.constant 7 : index
    %c0_204 = arith.constant 0 : index
    %281 = vector.load %arg10[%c7_203, %c0_204] : memref<88x64xf32, #tpu.memory_space<vmem>>, vector<72x64xf32>
    %282 = vector.broadcast %31 : vector<72x1xf32> to vector<72x64xf32>
    %283 = arith.mulf %281, %282 : vector<72x64xf32>
    %284 = arith.truncf %283 : vector<72x64xf32> to vector<72x64xbf16>
    %c12_205 = arith.constant 12 : index
    %c0_206 = arith.constant 0 : index
    %c0_207 = arith.constant 0 : index
    %285 = vector.load %arg3[%c12_205, %c0_206, %c0_207] : memref<19x64x32xbf16, #tpu.memory_space<vmem>>, vector<1x64x32xbf16>
    %286 = vector.shape_cast %285 : vector<1x64x32xbf16> to vector<64x32xbf16>
    %cst_208 = arith.constant dense<0.000000e+00> : vector<72x32xf32>
    %287 = tpu.matmul %284, %286, %cst_208 {dimension_numbers = #tpu.dot_dimension_numbers<[1], [0], [0], [1], [0, 0, 1, 1], [], []>} : vector<72x64xbf16>, vector<64x32xbf16>, vector<72x32xf32> -> vector<72x32xf32>
    %288 = arith.addf %280, %287 : vector<72x32xf32>
    %c8_209 = arith.constant 8 : index
    %c0_210 = arith.constant 0 : index
    %289 = vector.load %arg10[%c8_209, %c0_210] : memref<88x64xf32, #tpu.memory_space<vmem>>, vector<72x64xf32>
    %290 = arith.truncf %289 : vector<72x64xf32> to vector<72x64xbf16>
    %c13_211 = arith.constant 13 : index
    %c0_212 = arith.constant 0 : index
    %c0_213 = arith.constant 0 : index
    %291 = vector.load %arg3[%c13_211, %c0_212, %c0_213] : memref<19x64x32xbf16, #tpu.memory_space<vmem>>, vector<1x64x32xbf16>
    %292 = vector.shape_cast %291 : vector<1x64x32xbf16> to vector<64x32xbf16>
    %cst_214 = arith.constant dense<0.000000e+00> : vector<72x32xf32>
    %293 = tpu.matmul %290, %292, %cst_214 {dimension_numbers = #tpu.dot_dimension_numbers<[1], [0], [0], [1], [0, 0, 1, 1], [], []>} : vector<72x64xbf16>, vector<64x32xbf16>, vector<72x32xf32> -> vector<72x32xf32>
    %294 = arith.addf %288, %293 : vector<72x32xf32>
    %c9_215 = arith.constant 9 : index
    %c0_216 = arith.constant 0 : index
    %295 = vector.load %arg10[%c9_215, %c0_216] : memref<88x64xf32, #tpu.memory_space<vmem>>, vector<72x64xf32>
    %296 = vector.broadcast %29 : vector<72x1xf32> to vector<72x64xf32>
    %297 = arith.mulf %295, %296 : vector<72x64xf32>
    %298 = arith.truncf %297 : vector<72x64xf32> to vector<72x64xbf16>
    %c14_217 = arith.constant 14 : index
    %c0_218 = arith.constant 0 : index
    %c0_219 = arith.constant 0 : index
    %299 = vector.load %arg3[%c14_217, %c0_218, %c0_219] : memref<19x64x32xbf16, #tpu.memory_space<vmem>>, vector<1x64x32xbf16>
    %300 = vector.shape_cast %299 : vector<1x64x32xbf16> to vector<64x32xbf16>
    %cst_220 = arith.constant dense<0.000000e+00> : vector<72x32xf32>
    %301 = tpu.matmul %298, %300, %cst_220 {dimension_numbers = #tpu.dot_dimension_numbers<[1], [0], [0], [1], [0, 0, 1, 1], [], []>} : vector<72x64xbf16>, vector<64x32xbf16>, vector<72x32xf32> -> vector<72x32xf32>
    %302 = arith.addf %294, %301 : vector<72x32xf32>
    %c9_221 = arith.constant 9 : index
    %c0_222 = arith.constant 0 : index
    %303 = vector.load %arg10[%c9_221, %c0_222] : memref<88x64xf32, #tpu.memory_space<vmem>>, vector<72x64xf32>
    %304 = vector.broadcast %31 : vector<72x1xf32> to vector<72x64xf32>
    %305 = arith.mulf %303, %304 : vector<72x64xf32>
    %306 = arith.truncf %305 : vector<72x64xf32> to vector<72x64xbf16>
    %c15_223 = arith.constant 15 : index
    %c0_224 = arith.constant 0 : index
    %c0_225 = arith.constant 0 : index
    %307 = vector.load %arg3[%c15_223, %c0_224, %c0_225] : memref<19x64x32xbf16, #tpu.memory_space<vmem>>, vector<1x64x32xbf16>
    %308 = vector.shape_cast %307 : vector<1x64x32xbf16> to vector<64x32xbf16>
    %cst_226 = arith.constant dense<0.000000e+00> : vector<72x32xf32>
    %309 = tpu.matmul %306, %308, %cst_226 {dimension_numbers = #tpu.dot_dimension_numbers<[1], [0], [0], [1], [0, 0, 1, 1], [], []>} : vector<72x64xbf16>, vector<64x32xbf16>, vector<72x32xf32> -> vector<72x32xf32>
    %310 = arith.addf %302, %309 : vector<72x32xf32>
    %c10_227 = arith.constant 10 : index
    %c0_228 = arith.constant 0 : index
    %311 = vector.load %arg10[%c10_227, %c0_228] : memref<88x64xf32, #tpu.memory_space<vmem>>, vector<72x64xf32>
    %312 = arith.truncf %311 : vector<72x64xf32> to vector<72x64xbf16>
    %c16_229 = arith.constant 16 : index
    %c0_230 = arith.constant 0 : index
    %c0_231 = arith.constant 0 : index
    %313 = vector.load %arg3[%c16_229, %c0_230, %c0_231] : memref<19x64x32xbf16, #tpu.memory_space<vmem>>, vector<1x64x32xbf16>
    %314 = vector.shape_cast %313 : vector<1x64x32xbf16> to vector<64x32xbf16>
    %cst_232 = arith.constant dense<0.000000e+00> : vector<72x32xf32>
    %315 = tpu.matmul %312, %314, %cst_232 {dimension_numbers = #tpu.dot_dimension_numbers<[1], [0], [0], [1], [0, 0, 1, 1], [], []>} : vector<72x64xbf16>, vector<64x32xbf16>, vector<72x32xf32> -> vector<72x32xf32>
    %316 = arith.addf %310, %315 : vector<72x32xf32>
    %c11_233 = arith.constant 11 : index
    %c0_234 = arith.constant 0 : index
    %317 = vector.load %arg10[%c11_233, %c0_234] : memref<88x64xf32, #tpu.memory_space<vmem>>, vector<72x64xf32>
    %318 = vector.broadcast %29 : vector<72x1xf32> to vector<72x64xf32>
    %319 = arith.mulf %317, %318 : vector<72x64xf32>
    %320 = arith.truncf %319 : vector<72x64xf32> to vector<72x64xbf16>
    %c17_235 = arith.constant 17 : index
    %c0_236 = arith.constant 0 : index
    %c0_237 = arith.constant 0 : index
    %321 = vector.load %arg3[%c17_235, %c0_236, %c0_237] : memref<19x64x32xbf16, #tpu.memory_space<vmem>>, vector<1x64x32xbf16>
    %322 = vector.shape_cast %321 : vector<1x64x32xbf16> to vector<64x32xbf16>
    %cst_238 = arith.constant dense<0.000000e+00> : vector<72x32xf32>
    %323 = tpu.matmul %320, %322, %cst_238 {dimension_numbers = #tpu.dot_dimension_numbers<[1], [0], [0], [1], [0, 0, 1, 1], [], []>} : vector<72x64xbf16>, vector<64x32xbf16>, vector<72x32xf32> -> vector<72x32xf32>
    %324 = arith.addf %316, %323 : vector<72x32xf32>
    %c8_239 = arith.constant 8 : index
    %c0_240 = arith.constant 0 : index
    %325 = vector.load %arg9[%c8_239, %c0_240] : memref<88x64xf32, #tpu.memory_space<vmem>>, vector<72x64xf32>
    %326 = arith.truncf %325 : vector<72x64xf32> to vector<72x64xbf16>
    %c18_241 = arith.constant 18 : index
    %c0_242 = arith.constant 0 : index
    %c0_243 = arith.constant 0 : index
    %327 = vector.load %arg3[%c18_241, %c0_242, %c0_243] : memref<19x64x32xbf16, #tpu.memory_space<vmem>>, vector<1x64x32xbf16>
    %328 = vector.shape_cast %327 : vector<1x64x32xbf16> to vector<64x32xbf16>
    %cst_244 = arith.constant dense<0.000000e+00> : vector<72x32xf32>
    %329 = tpu.matmul %326, %328, %cst_244 {dimension_numbers = #tpu.dot_dimension_numbers<[1], [0], [0], [1], [0, 0, 1, 1], [], []>} : vector<72x64xbf16>, vector<64x32xbf16>, vector<72x32xf32> -> vector<72x32xf32>
    %330 = arith.addf %324, %329 : vector<72x32xf32>
    %cst_245 = arith.constant 0.000000e+00 : f32
    %331 = vector.broadcast %cst_245 : f32 to vector<72x32xf32>
    %332 = arith.maximumf %330, %331 : vector<72x32xf32>
    %333 = vector.broadcast %22 : vector<72x1xf32> to vector<72x32xf32>
    %334 = arith.mulf %332, %333 : vector<72x32xf32>
    %c0_246 = arith.constant 0 : index
    %c0_247 = arith.constant 0 : index
    %335 = vector.load %arg5[%c0_246, %c0_247] : memref<8x32xf32, #tpu.memory_space<vmem>>, vector<1x32xf32>
    %336 = vector.extract_strided_slice %334 {offsets = [0, 0], sizes = [8, 32], strides = [1, 1]} : vector<72x32xf32> to vector<8x32xf32>
    %337 = vector.extract_strided_slice %336 {offsets = [0, 0], sizes = [2, 32], strides = [1, 1]} : vector<8x32xf32> to vector<2x32xf32>
    %338 = vector.extract_strided_slice %336 {offsets = [2, 0], sizes = [2, 32], strides = [1, 1]} : vector<8x32xf32> to vector<2x32xf32>
    %339 = arith.addf %337, %338 : vector<2x32xf32>
    %340 = vector.extract_strided_slice %336 {offsets = [4, 0], sizes = [2, 32], strides = [1, 1]} : vector<8x32xf32> to vector<2x32xf32>
    %341 = arith.addf %339, %340 : vector<2x32xf32>
    %342 = vector.extract_strided_slice %336 {offsets = [6, 0], sizes = [2, 32], strides = [1, 1]} : vector<8x32xf32> to vector<2x32xf32>
    %343 = arith.addf %341, %342 : vector<2x32xf32>
    %344 = vector.extract_strided_slice %343 {offsets = [0, 0], sizes = [1, 32], strides = [1, 1]} : vector<2x32xf32> to vector<1x32xf32>
    %345 = arith.truncf %344 : vector<1x32xf32> to vector<1x32xbf16>
    %c0_248 = arith.constant 0 : index
    %c0_249 = arith.constant 0 : index
    %346 = vector.load %arg4[%c0_248, %c0_249] : memref<258x32xbf16, #tpu.memory_space<vmem>>, vector<32x32xbf16>
    %cst_250 = arith.constant dense<0.000000e+00> : vector<1x32xf32>
    %347 = tpu.matmul %345, %346, %cst_250 {dimension_numbers = #tpu.dot_dimension_numbers<[1], [0], [0], [1], [0, 0, 1, 1], [], []>} : vector<1x32xbf16>, vector<32x32xbf16>, vector<1x32xf32> -> vector<1x32xf32>
    %348 = arith.addf %335, %347 : vector<1x32xf32>
    %349 = vector.extract_strided_slice %343 {offsets = [1, 0], sizes = [1, 32], strides = [1, 1]} : vector<2x32xf32> to vector<1x32xf32>
    %350 = arith.truncf %349 : vector<1x32xf32> to vector<1x32xbf16>
    %c32_251 = arith.constant 32 : index
    %c0_252 = arith.constant 0 : index
    %351 = vector.load %arg4[%c32_251, %c0_252] : memref<258x32xbf16, #tpu.memory_space<vmem>>, vector<32x32xbf16>
    %cst_253 = arith.constant dense<0.000000e+00> : vector<1x32xf32>
    %352 = tpu.matmul %350, %351, %cst_253 {dimension_numbers = #tpu.dot_dimension_numbers<[1], [0], [0], [1], [0, 0, 1, 1], [], []>} : vector<1x32xbf16>, vector<32x32xbf16>, vector<1x32xf32> -> vector<1x32xf32>
    %353 = arith.addf %348, %352 : vector<1x32xf32>
    %354 = vector.extract_strided_slice %334 {offsets = [8, 0], sizes = [8, 32], strides = [1, 1]} : vector<72x32xf32> to vector<8x32xf32>
    %355 = vector.extract_strided_slice %354 {offsets = [0, 0], sizes = [2, 32], strides = [1, 1]} : vector<8x32xf32> to vector<2x32xf32>
    %356 = vector.extract_strided_slice %354 {offsets = [2, 0], sizes = [2, 32], strides = [1, 1]} : vector<8x32xf32> to vector<2x32xf32>
    %357 = arith.addf %355, %356 : vector<2x32xf32>
    %358 = vector.extract_strided_slice %354 {offsets = [4, 0], sizes = [2, 32], strides = [1, 1]} : vector<8x32xf32> to vector<2x32xf32>
    %359 = arith.addf %357, %358 : vector<2x32xf32>
    %360 = vector.extract_strided_slice %354 {offsets = [6, 0], sizes = [2, 32], strides = [1, 1]} : vector<8x32xf32> to vector<2x32xf32>
    %361 = arith.addf %359, %360 : vector<2x32xf32>
    %362 = vector.extract_strided_slice %361 {offsets = [0, 0], sizes = [1, 32], strides = [1, 1]} : vector<2x32xf32> to vector<1x32xf32>
    %363 = arith.truncf %362 : vector<1x32xf32> to vector<1x32xbf16>
    %c64 = arith.constant 64 : index
    %c0_254 = arith.constant 0 : index
    %364 = vector.load %arg4[%c64, %c0_254] : memref<258x32xbf16, #tpu.memory_space<vmem>>, vector<32x32xbf16>
    %cst_255 = arith.constant dense<0.000000e+00> : vector<1x32xf32>
    %365 = tpu.matmul %363, %364, %cst_255 {dimension_numbers = #tpu.dot_dimension_numbers<[1], [0], [0], [1], [0, 0, 1, 1], [], []>} : vector<1x32xbf16>, vector<32x32xbf16>, vector<1x32xf32> -> vector<1x32xf32>
    %366 = arith.addf %353, %365 : vector<1x32xf32>
    %367 = vector.extract_strided_slice %361 {offsets = [1, 0], sizes = [1, 32], strides = [1, 1]} : vector<2x32xf32> to vector<1x32xf32>
    %368 = arith.truncf %367 : vector<1x32xf32> to vector<1x32xbf16>
    %c96 = arith.constant 96 : index
    %c0_256 = arith.constant 0 : index
    %369 = vector.load %arg4[%c96, %c0_256] : memref<258x32xbf16, #tpu.memory_space<vmem>>, vector<32x32xbf16>
    %cst_257 = arith.constant dense<0.000000e+00> : vector<1x32xf32>
    %370 = tpu.matmul %368, %369, %cst_257 {dimension_numbers = #tpu.dot_dimension_numbers<[1], [0], [0], [1], [0, 0, 1, 1], [], []>} : vector<1x32xbf16>, vector<32x32xbf16>, vector<1x32xf32> -> vector<1x32xf32>
    %371 = arith.addf %366, %370 : vector<1x32xf32>
    %372 = vector.extract_strided_slice %334 {offsets = [16, 0], sizes = [8, 32], strides = [1, 1]} : vector<72x32xf32> to vector<8x32xf32>
    %373 = vector.extract_strided_slice %372 {offsets = [0, 0], sizes = [2, 32], strides = [1, 1]} : vector<8x32xf32> to vector<2x32xf32>
    %374 = vector.extract_strided_slice %372 {offsets = [2, 0], sizes = [2, 32], strides = [1, 1]} : vector<8x32xf32> to vector<2x32xf32>
    %375 = arith.addf %373, %374 : vector<2x32xf32>
    %376 = vector.extract_strided_slice %372 {offsets = [4, 0], sizes = [2, 32], strides = [1, 1]} : vector<8x32xf32> to vector<2x32xf32>
    %377 = arith.addf %375, %376 : vector<2x32xf32>
    %378 = vector.extract_strided_slice %372 {offsets = [6, 0], sizes = [2, 32], strides = [1, 1]} : vector<8x32xf32> to vector<2x32xf32>
    %379 = arith.addf %377, %378 : vector<2x32xf32>
    %380 = vector.extract_strided_slice %379 {offsets = [0, 0], sizes = [1, 32], strides = [1, 1]} : vector<2x32xf32> to vector<1x32xf32>
    %381 = arith.truncf %380 : vector<1x32xf32> to vector<1x32xbf16>
    %c128 = arith.constant 128 : index
    %c0_258 = arith.constant 0 : index
    %382 = vector.load %arg4[%c128, %c0_258] : memref<258x32xbf16, #tpu.memory_space<vmem>>, vector<32x32xbf16>
    %cst_259 = arith.constant dense<0.000000e+00> : vector<1x32xf32>
    %383 = tpu.matmul %381, %382, %cst_259 {dimension_numbers = #tpu.dot_dimension_numbers<[1], [0], [0], [1], [0, 0, 1, 1], [], []>} : vector<1x32xbf16>, vector<32x32xbf16>, vector<1x32xf32> -> vector<1x32xf32>
    %384 = arith.addf %371, %383 : vector<1x32xf32>
    %385 = vector.extract_strided_slice %379 {offsets = [1, 0], sizes = [1, 32], strides = [1, 1]} : vector<2x32xf32> to vector<1x32xf32>
    %386 = arith.truncf %385 : vector<1x32xf32> to vector<1x32xbf16>
    %c160 = arith.constant 160 : index
    %c0_260 = arith.constant 0 : index
    %387 = vector.load %arg4[%c160, %c0_260] : memref<258x32xbf16, #tpu.memory_space<vmem>>, vector<32x32xbf16>
    %cst_261 = arith.constant dense<0.000000e+00> : vector<1x32xf32>
    %388 = tpu.matmul %386, %387, %cst_261 {dimension_numbers = #tpu.dot_dimension_numbers<[1], [0], [0], [1], [0, 0, 1, 1], [], []>} : vector<1x32xbf16>, vector<32x32xbf16>, vector<1x32xf32> -> vector<1x32xf32>
    %389 = arith.addf %384, %388 : vector<1x32xf32>
    %390 = vector.extract_strided_slice %334 {offsets = [24, 0], sizes = [8, 32], strides = [1, 1]} : vector<72x32xf32> to vector<8x32xf32>
    %391 = vector.extract_strided_slice %390 {offsets = [0, 0], sizes = [2, 32], strides = [1, 1]} : vector<8x32xf32> to vector<2x32xf32>
    %392 = vector.extract_strided_slice %390 {offsets = [2, 0], sizes = [2, 32], strides = [1, 1]} : vector<8x32xf32> to vector<2x32xf32>
    %393 = arith.addf %391, %392 : vector<2x32xf32>
    %394 = vector.extract_strided_slice %390 {offsets = [4, 0], sizes = [2, 32], strides = [1, 1]} : vector<8x32xf32> to vector<2x32xf32>
    %395 = arith.addf %393, %394 : vector<2x32xf32>
    %396 = vector.extract_strided_slice %390 {offsets = [6, 0], sizes = [2, 32], strides = [1, 1]} : vector<8x32xf32> to vector<2x32xf32>
    %397 = arith.addf %395, %396 : vector<2x32xf32>
    %398 = vector.extract_strided_slice %397 {offsets = [0, 0], sizes = [1, 32], strides = [1, 1]} : vector<2x32xf32> to vector<1x32xf32>
    %399 = arith.truncf %398 : vector<1x32xf32> to vector<1x32xbf16>
    %c192 = arith.constant 192 : index
    %c0_262 = arith.constant 0 : index
    %400 = vector.load %arg4[%c192, %c0_262] : memref<258x32xbf16, #tpu.memory_space<vmem>>, vector<32x32xbf16>
    %cst_263 = arith.constant dense<0.000000e+00> : vector<1x32xf32>
    %401 = tpu.matmul %399, %400, %cst_263 {dimension_numbers = #tpu.dot_dimension_numbers<[1], [0], [0], [1], [0, 0, 1, 1], [], []>} : vector<1x32xbf16>, vector<32x32xbf16>, vector<1x32xf32> -> vector<1x32xf32>
    %402 = arith.addf %389, %401 : vector<1x32xf32>
    %403 = vector.extract_strided_slice %397 {offsets = [1, 0], sizes = [1, 32], strides = [1, 1]} : vector<2x32xf32> to vector<1x32xf32>
    %404 = arith.truncf %403 : vector<1x32xf32> to vector<1x32xbf16>
    %c224 = arith.constant 224 : index
    %c0_264 = arith.constant 0 : index
    %405 = vector.load %arg4[%c224, %c0_264] : memref<258x32xbf16, #tpu.memory_space<vmem>>, vector<32x32xbf16>
    %cst_265 = arith.constant dense<0.000000e+00> : vector<1x32xf32>
    %406 = tpu.matmul %404, %405, %cst_265 {dimension_numbers = #tpu.dot_dimension_numbers<[1], [0], [0], [1], [0, 0, 1, 1], [], []>} : vector<1x32xbf16>, vector<32x32xbf16>, vector<1x32xf32> -> vector<1x32xf32>
    %407 = arith.addf %402, %406 : vector<1x32xf32>
    %c0_266 = arith.constant 0 : index
    %c0_267 = arith.constant 0 : index
    %408 = vector.load %arg1[%c0_266, %c0_267] : memref<2x2xf32, #tpu.memory_space<vmem>>, vector<1x2xf32>
    %409 = vector.extract_strided_slice %408 {offsets = [0, 0], sizes = [1, 1], strides = [1, 1]} : vector<1x2xf32> to vector<1x1xf32>
    %c1_268 = arith.constant 1 : index
    %c0_269 = arith.constant 0 : index
    %410 = vector.load %arg5[%c1_268, %c0_269] : memref<8x32xf32, #tpu.memory_space<vmem>>, vector<1x2xf32>
    %411 = vector.broadcast %409 : vector<1x1xf32> to vector<1x2xf32>
    %412 = arith.mulf %411, %410 : vector<1x2xf32>
    %413 = vector.extract_strided_slice %408 {offsets = [0, 1], sizes = [1, 1], strides = [1, 1]} : vector<1x2xf32> to vector<1x1xf32>
    %c2_270 = arith.constant 2 : index
    %c0_271 = arith.constant 0 : index
    %414 = vector.load %arg5[%c2_270, %c0_271] : memref<8x32xf32, #tpu.memory_space<vmem>>, vector<1x2xf32>
    %415 = vector.broadcast %413 : vector<1x1xf32> to vector<1x2xf32>
    %416 = arith.mulf %415, %414 : vector<1x2xf32>
    %417 = arith.addf %412, %416 : vector<1x2xf32>
    %c3_272 = arith.constant 3 : index
    %c0_273 = arith.constant 0 : index
    %418 = vector.load %arg5[%c3_272, %c0_273] : memref<8x32xf32, #tpu.memory_space<vmem>>, vector<1x2xf32>
    %419 = arith.addf %417, %418 : vector<1x2xf32>
    %420 = arith.negf %419 : vector<1x2xf32>
    %421 = math.exp %420 : vector<1x2xf32>
    %cst_274 = arith.constant 1.000000e+00 : f32
    %422 = vector.broadcast %cst_274 : f32 to vector<1x2xf32>
    %423 = arith.addf %422, %421 : vector<1x2xf32>
    %424 = arith.divf %422, %423 : vector<1x2xf32>
    %425 = vector.extract_strided_slice %424 {offsets = [0, 0], sizes = [1, 1], strides = [1, 1]} : vector<1x2xf32> to vector<1x1xf32>
    %c256 = arith.constant 256 : index
    %c0_275 = arith.constant 0 : index
    %426 = vector.load %arg4[%c256, %c0_275] : memref<258x32xbf16, #tpu.memory_space<vmem>>, vector<1x32xbf16>
    %427 = arith.extf %426 : vector<1x32xbf16> to vector<1x32xf32>
    %428 = vector.broadcast %425 : vector<1x1xf32> to vector<1x32xf32>
    %429 = arith.mulf %428, %427 : vector<1x32xf32>
    %430 = arith.addf %407, %429 : vector<1x32xf32>
    %431 = vector.extract_strided_slice %424 {offsets = [0, 1], sizes = [1, 1], strides = [1, 1]} : vector<1x2xf32> to vector<1x1xf32>
    %c257 = arith.constant 257 : index
    %c0_276 = arith.constant 0 : index
    %432 = vector.load %arg4[%c257, %c0_276] : memref<258x32xbf16, #tpu.memory_space<vmem>>, vector<1x32xbf16>
    %433 = arith.extf %432 : vector<1x32xbf16> to vector<1x32xf32>
    %434 = vector.broadcast %431 : vector<1x1xf32> to vector<1x32xf32>
    %435 = arith.mulf %434, %433 : vector<1x32xf32>
    %436 = arith.addf %430, %435 : vector<1x32xf32>
    %437 = arith.negf %436 : vector<1x32xf32>
    %438 = math.exp %437 : vector<1x32xf32>
    %cst_277 = arith.constant 1.000000e+00 : f32
    %439 = vector.broadcast %cst_277 : f32 to vector<1x32xf32>
    %440 = arith.addf %439, %438 : vector<1x32xf32>
    %441 = arith.divf %439, %440 : vector<1x32xf32>
    %c5_278 = arith.constant 5 : index
    %c0_279 = arith.constant 0 : index
    %442 = vector.load %arg5[%c5_278, %c0_279] : memref<8x32xf32, #tpu.memory_space<vmem>>, vector<1x32xf32>
    %443 = arith.mulf %441, %442 : vector<1x32xf32>
    %cst_280 = arith.constant dense<0.000000e+00> : vector<1xf32>
    %444 = vector.multi_reduction <add>, %443, %cst_280 [1] : vector<1x32xf32> to vector<1xf32>
    %445 = vector.shape_cast %444 : vector<1xf32> to vector<1x1xf32>
    %c4_281 = arith.constant 4 : index
    %c0_282 = arith.constant 0 : index
    %446 = vector.load %arg5[%c4_281, %c0_282] : memref<8x32xf32, #tpu.memory_space<vmem>>, vector<1x1xf32>
    %447 = arith.addf %445, %446 : vector<1x1xf32>
    %c0_283 = arith.constant 0 : index
    %c0_284 = arith.constant 0 : index
    %448 = vector.load %arg6[%c0_283, %c0_284] : memref<2x2xf32, #tpu.memory_space<vmem>>, vector<1x1xf32>
    tpu.vector_store %arg6[%c0_283, %c0_284], %447 {strides = array<i32>} : memref<2x2xf32, #tpu.memory_space<vmem>>, vector<1x1xf32>,
    %c6_285 = arith.constant 6 : index
    %c0_286 = arith.constant 0 : index
    %449 = vector.load %arg5[%c6_285, %c0_286] : memref<8x32xf32, #tpu.memory_space<vmem>>, vector<1x32xf32>
    %450 = arith.mulf %441, %449 : vector<1x32xf32>
    %cst_287 = arith.constant dense<0.000000e+00> : vector<1xf32>
    %451 = vector.multi_reduction <add>, %450, %cst_287 [1] : vector<1x32xf32> to vector<1xf32>
    %452 = vector.shape_cast %451 : vector<1xf32> to vector<1x1xf32>
    %c4_288 = arith.constant 4 : index
    %c1_289 = arith.constant 1 : index
    %453 = vector.load %arg5[%c4_288, %c1_289] : memref<8x32xf32, #tpu.memory_space<vmem>>, vector<1x1xf32>
    %454 = arith.addf %452, %453 : vector<1x1xf32>
    %c0_290 = arith.constant 0 : index
    %c1_291 = arith.constant 1 : index
    %455 = vector.load %arg6[%c0_290, %c1_291] : memref<2x2xf32, #tpu.memory_space<vmem>>, vector<1x1xf32>
    tpu.vector_store %arg6[%c0_290, %c1_291], %454 {strides = array<i32>} : memref<2x2xf32, #tpu.memory_space<vmem>>, vector<1x1xf32>,
    %c0_292 = arith.constant 0 : index
    %c0_293 = arith.constant 0 : index
    %456 = vector.load %arg5[%c0_292, %c0_293] : memref<8x32xf32, #tpu.memory_space<vmem>>, vector<1x32xf32>
    %457 = vector.extract_strided_slice %334 {offsets = [40, 0], sizes = [8, 32], strides = [1, 1]} : vector<72x32xf32> to vector<8x32xf32>
    %458 = vector.extract_strided_slice %457 {offsets = [0, 0], sizes = [2, 32], strides = [1, 1]} : vector<8x32xf32> to vector<2x32xf32>
    %459 = vector.extract_strided_slice %457 {offsets = [2, 0], sizes = [2, 32], strides = [1, 1]} : vector<8x32xf32> to vector<2x32xf32>
    %460 = arith.addf %458, %459 : vector<2x32xf32>
    %461 = vector.extract_strided_slice %457 {offsets = [4, 0], sizes = [2, 32], strides = [1, 1]} : vector<8x32xf32> to vector<2x32xf32>
    %462 = arith.addf %460, %461 : vector<2x32xf32>
    %463 = vector.extract_strided_slice %457 {offsets = [6, 0], sizes = [2, 32], strides = [1, 1]} : vector<8x32xf32> to vector<2x32xf32>
    %464 = arith.addf %462, %463 : vector<2x32xf32>
    %465 = vector.extract_strided_slice %464 {offsets = [0, 0], sizes = [1, 32], strides = [1, 1]} : vector<2x32xf32> to vector<1x32xf32>
    %466 = arith.truncf %465 : vector<1x32xf32> to vector<1x32xbf16>
    %c0_294 = arith.constant 0 : index
    %c0_295 = arith.constant 0 : index
    %467 = vector.load %arg4[%c0_294, %c0_295] : memref<258x32xbf16, #tpu.memory_space<vmem>>, vector<32x32xbf16>
    %cst_296 = arith.constant dense<0.000000e+00> : vector<1x32xf32>
    %468 = tpu.matmul %466, %467, %cst_296 {dimension_numbers = #tpu.dot_dimension_numbers<[1], [0], [0], [1], [0, 0, 1, 1], [], []>} : vector<1x32xbf16>, vector<32x32xbf16>, vector<1x32xf32> -> vector<1x32xf32>
    %469 = arith.addf %456, %468 : vector<1x32xf32>
    %470 = vector.extract_strided_slice %464 {offsets = [1, 0], sizes = [1, 32], strides = [1, 1]} : vector<2x32xf32> to vector<1x32xf32>
    %471 = arith.truncf %470 : vector<1x32xf32> to vector<1x32xbf16>
    %c32_297 = arith.constant 32 : index
    %c0_298 = arith.constant 0 : index
    %472 = vector.load %arg4[%c32_297, %c0_298] : memref<258x32xbf16, #tpu.memory_space<vmem>>, vector<32x32xbf16>
    %cst_299 = arith.constant dense<0.000000e+00> : vector<1x32xf32>
    %473 = tpu.matmul %471, %472, %cst_299 {dimension_numbers = #tpu.dot_dimension_numbers<[1], [0], [0], [1], [0, 0, 1, 1], [], []>} : vector<1x32xbf16>, vector<32x32xbf16>, vector<1x32xf32> -> vector<1x32xf32>
    %474 = arith.addf %469, %473 : vector<1x32xf32>
    %475 = vector.extract_strided_slice %334 {offsets = [48, 0], sizes = [8, 32], strides = [1, 1]} : vector<72x32xf32> to vector<8x32xf32>
    %476 = vector.extract_strided_slice %475 {offsets = [0, 0], sizes = [2, 32], strides = [1, 1]} : vector<8x32xf32> to vector<2x32xf32>
    %477 = vector.extract_strided_slice %475 {offsets = [2, 0], sizes = [2, 32], strides = [1, 1]} : vector<8x32xf32> to vector<2x32xf32>
    %478 = arith.addf %476, %477 : vector<2x32xf32>
    %479 = vector.extract_strided_slice %475 {offsets = [4, 0], sizes = [2, 32], strides = [1, 1]} : vector<8x32xf32> to vector<2x32xf32>
    %480 = arith.addf %478, %479 : vector<2x32xf32>
    %481 = vector.extract_strided_slice %475 {offsets = [6, 0], sizes = [2, 32], strides = [1, 1]} : vector<8x32xf32> to vector<2x32xf32>
    %482 = arith.addf %480, %481 : vector<2x32xf32>
    %483 = vector.extract_strided_slice %482 {offsets = [0, 0], sizes = [1, 32], strides = [1, 1]} : vector<2x32xf32> to vector<1x32xf32>
    %484 = arith.truncf %483 : vector<1x32xf32> to vector<1x32xbf16>
    %c64_300 = arith.constant 64 : index
    %c0_301 = arith.constant 0 : index
    %485 = vector.load %arg4[%c64_300, %c0_301] : memref<258x32xbf16, #tpu.memory_space<vmem>>, vector<32x32xbf16>
    %cst_302 = arith.constant dense<0.000000e+00> : vector<1x32xf32>
    %486 = tpu.matmul %484, %485, %cst_302 {dimension_numbers = #tpu.dot_dimension_numbers<[1], [0], [0], [1], [0, 0, 1, 1], [], []>} : vector<1x32xbf16>, vector<32x32xbf16>, vector<1x32xf32> -> vector<1x32xf32>
    %487 = arith.addf %474, %486 : vector<1x32xf32>
    %488 = vector.extract_strided_slice %482 {offsets = [1, 0], sizes = [1, 32], strides = [1, 1]} : vector<2x32xf32> to vector<1x32xf32>
    %489 = arith.truncf %488 : vector<1x32xf32> to vector<1x32xbf16>
    %c96_303 = arith.constant 96 : index
    %c0_304 = arith.constant 0 : index
    %490 = vector.load %arg4[%c96_303, %c0_304] : memref<258x32xbf16, #tpu.memory_space<vmem>>, vector<32x32xbf16>
    %cst_305 = arith.constant dense<0.000000e+00> : vector<1x32xf32>
    %491 = tpu.matmul %489, %490, %cst_305 {dimension_numbers = #tpu.dot_dimension_numbers<[1], [0], [0], [1], [0, 0, 1, 1], [], []>} : vector<1x32xbf16>, vector<32x32xbf16>, vector<1x32xf32> -> vector<1x32xf32>
    %492 = arith.addf %487, %491 : vector<1x32xf32>
    %493 = vector.extract_strided_slice %334 {offsets = [56, 0], sizes = [8, 32], strides = [1, 1]} : vector<72x32xf32> to vector<8x32xf32>
    %494 = vector.extract_strided_slice %493 {offsets = [0, 0], sizes = [2, 32], strides = [1, 1]} : vector<8x32xf32> to vector<2x32xf32>
    %495 = vector.extract_strided_slice %493 {offsets = [2, 0], sizes = [2, 32], strides = [1, 1]} : vector<8x32xf32> to vector<2x32xf32>
    %496 = arith.addf %494, %495 : vector<2x32xf32>
    %497 = vector.extract_strided_slice %493 {offsets = [4, 0], sizes = [2, 32], strides = [1, 1]} : vector<8x32xf32> to vector<2x32xf32>
    %498 = arith.addf %496, %497 : vector<2x32xf32>
    %499 = vector.extract_strided_slice %493 {offsets = [6, 0], sizes = [2, 32], strides = [1, 1]} : vector<8x32xf32> to vector<2x32xf32>
    %500 = arith.addf %498, %499 : vector<2x32xf32>
    %501 = vector.extract_strided_slice %500 {offsets = [0, 0], sizes = [1, 32], strides = [1, 1]} : vector<2x32xf32> to vector<1x32xf32>
    %502 = arith.truncf %501 : vector<1x32xf32> to vector<1x32xbf16>
    %c128_306 = arith.constant 128 : index
    %c0_307 = arith.constant 0 : index
    %503 = vector.load %arg4[%c128_306, %c0_307] : memref<258x32xbf16, #tpu.memory_space<vmem>>, vector<32x32xbf16>
    %cst_308 = arith.constant dense<0.000000e+00> : vector<1x32xf32>
    %504 = tpu.matmul %502, %503, %cst_308 {dimension_numbers = #tpu.dot_dimension_numbers<[1], [0], [0], [1], [0, 0, 1, 1], [], []>} : vector<1x32xbf16>, vector<32x32xbf16>, vector<1x32xf32> -> vector<1x32xf32>
    %505 = arith.addf %492, %504 : vector<1x32xf32>
    %506 = vector.extract_strided_slice %500 {offsets = [1, 0], sizes = [1, 32], strides = [1, 1]} : vector<2x32xf32> to vector<1x32xf32>
    %507 = arith.truncf %506 : vector<1x32xf32> to vector<1x32xbf16>
    %c160_309 = arith.constant 160 : index
    %c0_310 = arith.constant 0 : index
    %508 = vector.load %arg4[%c160_309, %c0_310] : memref<258x32xbf16, #tpu.memory_space<vmem>>, vector<32x32xbf16>
    %cst_311 = arith.constant dense<0.000000e+00> : vector<1x32xf32>
    %509 = tpu.matmul %507, %508, %cst_311 {dimension_numbers = #tpu.dot_dimension_numbers<[1], [0], [0], [1], [0, 0, 1, 1], [], []>} : vector<1x32xbf16>, vector<32x32xbf16>, vector<1x32xf32> -> vector<1x32xf32>
    %510 = arith.addf %505, %509 : vector<1x32xf32>
    %511 = vector.extract_strided_slice %334 {offsets = [64, 0], sizes = [8, 32], strides = [1, 1]} : vector<72x32xf32> to vector<8x32xf32>
    %512 = vector.extract_strided_slice %511 {offsets = [0, 0], sizes = [2, 32], strides = [1, 1]} : vector<8x32xf32> to vector<2x32xf32>
    %513 = vector.extract_strided_slice %511 {offsets = [2, 0], sizes = [2, 32], strides = [1, 1]} : vector<8x32xf32> to vector<2x32xf32>
    %514 = arith.addf %512, %513 : vector<2x32xf32>
    %515 = vector.extract_strided_slice %511 {offsets = [4, 0], sizes = [2, 32], strides = [1, 1]} : vector<8x32xf32> to vector<2x32xf32>
    %516 = arith.addf %514, %515 : vector<2x32xf32>
    %517 = vector.extract_strided_slice %511 {offsets = [6, 0], sizes = [2, 32], strides = [1, 1]} : vector<8x32xf32> to vector<2x32xf32>
    %518 = arith.addf %516, %517 : vector<2x32xf32>
    %519 = vector.extract_strided_slice %518 {offsets = [0, 0], sizes = [1, 32], strides = [1, 1]} : vector<2x32xf32> to vector<1x32xf32>
    %520 = arith.truncf %519 : vector<1x32xf32> to vector<1x32xbf16>
    %c192_312 = arith.constant 192 : index
    %c0_313 = arith.constant 0 : index
    %521 = vector.load %arg4[%c192_312, %c0_313] : memref<258x32xbf16, #tpu.memory_space<vmem>>, vector<32x32xbf16>
    %cst_314 = arith.constant dense<0.000000e+00> : vector<1x32xf32>
    %522 = tpu.matmul %520, %521, %cst_314 {dimension_numbers = #tpu.dot_dimension_numbers<[1], [0], [0], [1], [0, 0, 1, 1], [], []>} : vector<1x32xbf16>, vector<32x32xbf16>, vector<1x32xf32> -> vector<1x32xf32>
    %523 = arith.addf %510, %522 : vector<1x32xf32>
    %524 = vector.extract_strided_slice %518 {offsets = [1, 0], sizes = [1, 32], strides = [1, 1]} : vector<2x32xf32> to vector<1x32xf32>
    %525 = arith.truncf %524 : vector<1x32xf32> to vector<1x32xbf16>
    %c224_315 = arith.constant 224 : index
    %c0_316 = arith.constant 0 : index
    %526 = vector.load %arg4[%c224_315, %c0_316] : memref<258x32xbf16, #tpu.memory_space<vmem>>, vector<32x32xbf16>
    %cst_317 = arith.constant dense<0.000000e+00> : vector<1x32xf32>
    %527 = tpu.matmul %525, %526, %cst_317 {dimension_numbers = #tpu.dot_dimension_numbers<[1], [0], [0], [1], [0, 0, 1, 1], [], []>} : vector<1x32xbf16>, vector<32x32xbf16>, vector<1x32xf32> -> vector<1x32xf32>
    %528 = arith.addf %523, %527 : vector<1x32xf32>
    %c1_318 = arith.constant 1 : index
    %c0_319 = arith.constant 0 : index
    %529 = vector.load %arg1[%c1_318, %c0_319] : memref<2x2xf32, #tpu.memory_space<vmem>>, vector<1x2xf32>
    %530 = vector.extract_strided_slice %529 {offsets = [0, 0], sizes = [1, 1], strides = [1, 1]} : vector<1x2xf32> to vector<1x1xf32>
    %c1_320 = arith.constant 1 : index
    %c0_321 = arith.constant 0 : index
    %531 = vector.load %arg5[%c1_320, %c0_321] : memref<8x32xf32, #tpu.memory_space<vmem>>, vector<1x2xf32>
    %532 = vector.broadcast %530 : vector<1x1xf32> to vector<1x2xf32>
    %533 = arith.mulf %532, %531 : vector<1x2xf32>
    %534 = vector.extract_strided_slice %529 {offsets = [0, 1], sizes = [1, 1], strides = [1, 1]} : vector<1x2xf32> to vector<1x1xf32>
    %c2_322 = arith.constant 2 : index
    %c0_323 = arith.constant 0 : index
    %535 = vector.load %arg5[%c2_322, %c0_323] : memref<8x32xf32, #tpu.memory_space<vmem>>, vector<1x2xf32>
    %536 = vector.broadcast %534 : vector<1x1xf32> to vector<1x2xf32>
    %537 = arith.mulf %536, %535 : vector<1x2xf32>
    %538 = arith.addf %533, %537 : vector<1x2xf32>
    %c3_324 = arith.constant 3 : index
    %c0_325 = arith.constant 0 : index
    %539 = vector.load %arg5[%c3_324, %c0_325] : memref<8x32xf32, #tpu.memory_space<vmem>>, vector<1x2xf32>
    %540 = arith.addf %538, %539 : vector<1x2xf32>
    %541 = arith.negf %540 : vector<1x2xf32>
    %542 = math.exp %541 : vector<1x2xf32>
    %cst_326 = arith.constant 1.000000e+00 : f32
    %543 = vector.broadcast %cst_326 : f32 to vector<1x2xf32>
    %544 = arith.addf %543, %542 : vector<1x2xf32>
    %545 = arith.divf %543, %544 : vector<1x2xf32>
    %546 = vector.extract_strided_slice %545 {offsets = [0, 0], sizes = [1, 1], strides = [1, 1]} : vector<1x2xf32> to vector<1x1xf32>
    %c256_327 = arith.constant 256 : index
    %c0_328 = arith.constant 0 : index
    %547 = vector.load %arg4[%c256_327, %c0_328] : memref<258x32xbf16, #tpu.memory_space<vmem>>, vector<1x32xbf16>
    %548 = arith.extf %547 : vector<1x32xbf16> to vector<1x32xf32>
    %549 = vector.broadcast %546 : vector<1x1xf32> to vector<1x32xf32>
    %550 = arith.mulf %549, %548 : vector<1x32xf32>
    %551 = arith.addf %528, %550 : vector<1x32xf32>
    %552 = vector.extract_strided_slice %545 {offsets = [0, 1], sizes = [1, 1], strides = [1, 1]} : vector<1x2xf32> to vector<1x1xf32>
    %c257_329 = arith.constant 257 : index
    %c0_330 = arith.constant 0 : index
    %553 = vector.load %arg4[%c257_329, %c0_330] : memref<258x32xbf16, #tpu.memory_space<vmem>>, vector<1x32xbf16>
    %554 = arith.extf %553 : vector<1x32xbf16> to vector<1x32xf32>
    %555 = vector.broadcast %552 : vector<1x1xf32> to vector<1x32xf32>
    %556 = arith.mulf %555, %554 : vector<1x32xf32>
    %557 = arith.addf %551, %556 : vector<1x32xf32>
    %558 = arith.negf %557 : vector<1x32xf32>
    %559 = math.exp %558 : vector<1x32xf32>
    %cst_331 = arith.constant 1.000000e+00 : f32
    %560 = vector.broadcast %cst_331 : f32 to vector<1x32xf32>
    %561 = arith.addf %560, %559 : vector<1x32xf32>
    %562 = arith.divf %560, %561 : vector<1x32xf32>
    %c5_332 = arith.constant 5 : index
    %c0_333 = arith.constant 0 : index
    %563 = vector.load %arg5[%c5_332, %c0_333] : memref<8x32xf32, #tpu.memory_space<vmem>>, vector<1x32xf32>
    %564 = arith.mulf %562, %563 : vector<1x32xf32>
    %cst_334 = arith.constant dense<0.000000e+00> : vector<1xf32>
    %565 = vector.multi_reduction <add>, %564, %cst_334 [1] : vector<1x32xf32> to vector<1xf32>
    %566 = vector.shape_cast %565 : vector<1xf32> to vector<1x1xf32>
    %c4_335 = arith.constant 4 : index
    %c0_336 = arith.constant 0 : index
    %567 = vector.load %arg5[%c4_335, %c0_336] : memref<8x32xf32, #tpu.memory_space<vmem>>, vector<1x1xf32>
    %568 = arith.addf %566, %567 : vector<1x1xf32>
    %c1_337 = arith.constant 1 : index
    %c0_338 = arith.constant 0 : index
    %569 = vector.load %arg6[%c1_337, %c0_338] : memref<2x2xf32, #tpu.memory_space<vmem>>, vector<1x1xf32>
    tpu.vector_store %arg6[%c1_337, %c0_338], %568 {strides = array<i32>} : memref<2x2xf32, #tpu.memory_space<vmem>>, vector<1x1xf32>,
    %c6_339 = arith.constant 6 : index
    %c0_340 = arith.constant 0 : index
    %570 = vector.load %arg5[%c6_339, %c0_340] : memref<8x32xf32, #tpu.memory_space<vmem>>, vector<1x32xf32>
    %571 = arith.mulf %562, %570 : vector<1x32xf32>
    %cst_341 = arith.constant dense<0.000000e+00> : vector<1xf32>
    %572 = vector.multi_reduction <add>, %571, %cst_341 [1] : vector<1x32xf32> to vector<1xf32>
    %573 = vector.shape_cast %572 : vector<1xf32> to vector<1x1xf32>
    %c4_342 = arith.constant 4 : index
    %c1_343 = arith.constant 1 : index
    %574 = vector.load %arg5[%c4_342, %c1_343] : memref<8x32xf32, #tpu.memory_space<vmem>>, vector<1x1xf32>
    %575 = arith.addf %573, %574 : vector<1x1xf32>
    %c1_344 = arith.constant 1 : index
    %c1_345 = arith.constant 1 : index
    %576 = vector.load %arg6[%c1_344, %c1_345] : memref<2x2xf32, #tpu.memory_space<vmem>>, vector<1x1xf32>
    tpu.vector_store %arg6[%c1_344, %c1_345], %575 {strides = array<i32>} : memref<2x2xf32, #tpu.memory_space<vmem>>, vector<1x1xf32>,
    return
  }
}

</mosaic_0001>

<bundles_post_ra>
// kernel: cnn_forward.1
= control target key start
LH: loop header
LB: loop body
LE: loop exit
PB: predicated region body
PF: predicated region fallthrough
CT: control target
= control target key end

     0   :  { %vm25_vm0 = vcmask 523264   ;;  %v70_v3 = vlaneseq  ;;  %v6608_v5 = vmov 0.0   ;;  %vm192_vm1 = vcmask 433152   ;;  %s8351_s0 = inlined_call_operand.vmem [shape: f32[64,53], index: 0, kind: input, shape index: {}]   ;;  %s8352_s1 = inlined_call_operand.vmem [shape: f32[2,2], index: 1, kind: input, shape index: {}]   ;;  %s8353_s2 = inlined_call_operand.vmem [shape: bf16[19,64,64], index: 2, kind: input, shape index: {}]   ;;  %s8354_s3 = inlined_call_operand.vmem [shape: bf16[19,64,32], index: 3, kind: input, shape index: {}]   ;;  %s8355_s4 = inlined_call_operand.vmem [shape: bf16[258,32], index: 4, kind: input, shape index: {}]   ;;  %s8356_s5 = inlined_call_operand.vmem [shape: f32[8,32], index: 5, kind: input, shape index: {}]   ;;  %s8357_s6 = inlined_call_operand.hbm [shape: f32[2,2], index: 6, kind: output, shape index: {}]  }
   0x1   :  { %v6379_v0 = vld [vmem:[%s8353_s2 + $0x38] sm:$0xff]  ;;  %26 = vst.msk [vmem:[#allocation2] sm:$0xff] %vm25_vm0, %v6608_v5  ;;  %v6378_v6 = vld [vmem:[%s8353_s2 + $0x30] sm:$0xff]  ;;  %v188_v13 = vld [vmem:[%s8351_s0] sm:$0xff] }
   0x2   :  { %v6375_v1 = vld [vmem:[%s8353_s2 + $0x18] sm:$0xff]  ;;  %302 = vmatpush.bf16.msra.mxu0 %v6379_v0  ;;  %v6374_v7 = vld [vmem:[%s8353_s2 + $0x10] sm:$0xff]  ;;  %27 = vst.msk [vmem:[#allocation2 + $0x8] sm:$0xff] %vm25_vm0, %v6608_v5  ;;  %v6669_v8 = vshrl.u32 %v70_v3, 7  ;;  %v189_v14 = vld [vmem:[%s8351_s0 + $0x8] sm:$0xff] }
   0x3   :  { %v6383_v2 = vld [vmem:[%s8353_s2 + $0x58] sm:$0xff]  ;;  %374 = vmatpush.bf16.msra.mxu1 %v6375_v1  ;;  %v6382_v9 = vld [vmem:[%s8353_s2 + $0x50] sm:$0xff]  ;;  %28 = vst.msk [vmem:[#allocation2 + $0x10] sm:$0xff] %vm25_vm0, %v6608_v5  ;;  %v6377_v15 = vld [vmem:[%s8353_s2 + $0x28] sm:$0xff] }
   0x4   :  { %v6387_v4 = vld [vmem:[%s8353_s2 + $0x78] sm:$0xff]  ;;  %478 = vmatpush.bf16.msra.mxu2 %v6383_v2  ;;  %v6386_v10 = vld [vmem:[%s8353_s2 + $0x70] sm:$0xff]  ;;  %29 = vst.msk [vmem:[#allocation2 + $0x18] sm:$0xff] %vm25_vm0, %v6608_v5  ;;  %v72_v11 = vadd.s32 8, %v6669_v8  ;;  %v152_v12 = vand.u32 1, %v6669_v8  ;;  %v6373_v16 = vld [vmem:[%s8353_s2 + $0x8] sm:$0xff] }
   0x5   :  { %582 = vmatpush.bf16.msra.mxu3 %v6387_v4  ;;  %30 = vst.msk [vmem:[#allocation2 + $0x20] sm:$0xff] %vm25_vm0, %v6608_v5  ;;  %v6381_v18 = vld [vmem:[%s8353_s2 + $0x48] sm:$0xff] }
   0x6   :  { %303 = vmatpush.bf16.msra.mxu0 %v6378_v6  ;;  %193 = vst.msk [vmem:[#allocation2 + $0x8] sm:$0xff] %vm192_vm1, %v188_v13  ;;  %v153_v17 = vand.u32 1, %v72_v11  ;;  %vm161_vm2 = vcmp.eq.s32.totalorder %v152_v12, 0  ;;  %v6385_v19 = vld [vmem:[%s8353_s2 + $0x68] sm:$0xff] }
   0x7   :  { %375 = vmatpush.bf16.msra.mxu1 %v6374_v7  ;;  %194 = vst.msk [vmem:[#allocation2 + $0x10] sm:$0xff] %vm192_vm1, %v189_v14  ;;  %v6706_v20 = vsel %vm161_vm2, 1.0, %v6608_v5 }
   0x8   :  { %479 = vmatpush.bf16.msra.mxu2 %v6382_v9 }
   0x9   :  { %583 = vmatpush.bf16.msra.mxu3 %v6386_v10 }
   0xa   :  { %11 = vsyncpa [#allocation7], 0  ;;  %31 = vst.msk [vmem:[#allocation2 + $0x28] sm:$0xff] %vm25_vm0, %v6608_v5  ;;  %vm162_vm3 = vcmp.eq.s32.totalorder %v153_v17, 0  ;;  %304 = vmatpush.bf16.msra.mxu0 %v6377_v15  ;;  %v6376_v22 = vld [vmem:[%s8353_s2 + $0x20] sm:$0xff]  ;;  %v6724_v24 = vsub.f32 1.0, %v6706_v20 }
   0xb   :  { %32 = vst.msk [vmem:[#allocation2 + $0x30] sm:$0xff] %vm25_vm0, %v6608_v5  ;;  %v6713_v21 = vsel %vm162_vm3, 1.0, %v6608_v5  ;;  %376 = vmatpush.bf16.msra.mxu1 %v6373_v16  ;;  %v6372_v23 = vld [vmem:[%s8353_s2] sm:$0xff]  ;;  %v6391_v40 = vld [vmem:[%s8353_s2 + $0x98] sm:$0xff]  ;;  %v6390_v45 = vld [vmem:[%s8353_s2 + $0x90] sm:$0xff]  ;;  %v73_v46 = vadd.s32 16, %v6669_v8 }
   0xc   :  { %33 = vst.msk [vmem:[#allocation2 + $0x38] sm:$0xff] %vm25_vm0, %v6608_v5  ;;  %480 = vmatpush.bf16.msra.mxu2 %v6381_v18  ;;  %v6380_v25 = vld [vmem:[%s8353_s2 + $0x40] sm:$0xff]  ;;  %v6735_v27 = vsub.f32 1.0, %v6713_v21  ;;  %v74_v47 = vadd.s32 24, %v6669_v8  ;;  %v190_v50 = vld [vmem:[%s8351_s0 + $0x10] sm:$0xff]  ;;  %v191_v51 = vld [vmem:[%s8351_s0 + $0x18] sm:$0xff] }
   0xd   :  { %584 = vmatpush.bf16.msra.mxu3 %v6385_v19  ;;  %v6384_v26 = vld [vmem:[%s8353_s2 + $0x60] sm:$0xff]  ;;  %34 = vst.msk [vmem:[#allocation2 + $0x40] sm:$0xff] %vm25_vm0, %v6608_v5  ;;  %v154_v48 = vand.u32 1, %v73_v46  ;;  %v6389_v52 = vld [vmem:[%s8353_s2 + $0x88] sm:$0xff]  ;;  %v199_v56 = vld [vmem:[%s8351_s0 + $0x30] sm:$0xff]  ;;  %v75_v58 = vadd.s32 32, %v6669_v8 }
   0xe   :  { %35 = vst.msk [vmem:[#allocation2 + $0x48] sm:$0xff] %vm25_vm0, %v6608_v5  ;;  %v236_v28 = vld [vmem:[#allocation2 + $0x6] sm:$0xff]  ;;  %305 = vmatpush.bf16.msra.mxu0 %v6376_v22  ;;  %v237_v31 = vld [vmem:[#allocation2 + $0xe] sm:$0xff]  ;;  %v155_v49 = vand.u32 1, %v74_v47  ;;  %v76_v59 = vadd.s32 40, %v6669_v8  ;;  %vm3241_vm11 = vcmask 261120  }
   0xf   :  { %36 = vst.msk [vmem:[#allocation2 + $0x50] sm:$0xff] %vm25_vm0, %v6608_v5  ;;  %v205_v29 = vld [vmem:[#allocation2 + $0x5] sm:$0xff]  ;;  %377 = vmatpush.bf16.msra.mxu1 %v6372_v23  ;;  %v206_v32 = vld [vmem:[#allocation2 + $0xd] sm:$0xff]  ;;  %v245_v37 = vpack.c.bf16 %v237_v31, %v236_v28  ;;  %vm163_vm4 = vcmp.eq.s32.totalorder %v154_v48, 0  ;;  %v156_v62 = vand.u32 1, %v75_v58  ;;  %v200_v23 = vld [vmem:[%s8351_s0 + $0x38] sm:$0xff] }
  0x10   :  { %v403_v30 = vld [vmem:[#allocation2 + $0x7] sm:$0xff]  ;;  %37 = vst.msk [vmem:[#allocation3] sm:$0xff] %vm25_vm0, %v6608_v5  ;;  %v214_v33 = vmul.f32 %v205_v29, %v6724_v24  ;;  %v404_v34 = vld [vmem:[#allocation2 + $0xf] sm:$0xff]  ;;  %481 = vmatpush.bf16.msra.mxu2 %v6380_v25  ;;  %v215_v38 = vmul.f32 %v206_v32, %v6735_v27  ;;  %vm164_vm5 = vcmp.eq.s32.totalorder %v155_v49, 0  ;;  %v6843_v55 = vsel %vm163_vm4, 1.0, %v6608_v5  ;;  %v6399_v48 = vld [vmem:[%s8353_s2 + $0xd8] sm:$0xff] }
  0x11   :  { %v412_v35 = vmul.f32 %v403_v30, %v6706_v20  ;;  %v516_v36 = vmul.f32 %v403_v30, %v6724_v24  ;;  %585 = vmatpush.bf16.msra.mxu3 %v6384_v26  ;;  %38 = vst.msk [vmem:[#allocation3 + $0x8] sm:$0xff] %vm25_vm0, %v6608_v5  ;;  %v413_v39 = vmul.f32 %v404_v34, %v6713_v21  ;;  %v197_v53 = vld [vmem:[%s8351_s0 + $0x20] sm:$0xff]  ;;  %v198_v54 = vld [vmem:[%s8351_s0 + $0x28] sm:$0xff]  ;;  %v6849_v57 = vsel %vm164_vm5, 1.0, %v6608_v5  ;;  %s6611_s28 = smov [#allocation6]   ;;  %s5129_s7 = sshll.u32 %s8357_s6, 4  ;;  %s5130_s7 = int_to_ptr.hbm [resolvable:$true] %s5129_s7 }
  0x12   :  { %39 = vst.msk [vmem:[#allocation3 + $0x10] sm:$0xff] %vm25_vm0, %v6608_v5  ;;  %v517_v41 = vmul.f32 %v404_v34, %v6735_v27  ;;  %5162 = vmatmul.msk.bf16.vlgmr.msra.gmra.mxu0 %vm25_vm0, %v245_v37  ;;  %v223_v42 = vpack.c.bf16 %v215_v38, %v214_v33  ;;  %v6856_v60 = vsub.f32 1.0, %v6843_v55  ;;  %v6860_v61 = vsub.f32 1.0, %v6849_v57  ;;  %v6388_v22 = vld [vmem:[%s8353_s2 + $0x80] sm:$0xff]  ;;  %s5127_s0 = sshll.u32 %s6611_s28, 4  ;;  %s5128_s0 = int_to_ptr.vmem [resolvable:$true] %s5127_s0 }
  0x13   :  { %40 = vst.msk [vmem:[#allocation3 + $0x18] sm:$0xff] %vm25_vm0, %v6608_v5  ;;  %v421_v43 = vpack.c.bf16 %v413_v39, %v412_v35  ;;  %686 = vmatpush.bf16.msrb.mxu0 %v6391_v40  ;;  %v157_v2 = vand.u32 1, %v76_v59  ;;  %vm165_vm6 = vcmp.eq.s32.totalorder %v156_v62, 0  ;;  %v77_v32 = vadd.s32 48, %v6669_v8 }
  0x14   :  { %41 = vst.msk [vmem:[#allocation3 + $0x20] sm:$0xff] %vm25_vm0, %v6608_v5  ;;  %v525_v44 = vpack.c.bf16 %v517_v41, %v516_v36  ;;  %5183 = vmatmul.msk.bf16.vlgmr.msra.gmra.mxu1 %vm25_vm0, %v223_v42  ;;  %v6873_v18 = vsel %vm165_vm6, 1.0, %v6608_v5  ;;  %v78_v33 = vadd.s32 56, %v6669_v8  ;;  %903 = vmatpush.bf16.msrb.mxu2 %v6399_v48 }
  0x15   :  { %42 = vst.msk [vmem:[#allocation3 + $0x28] sm:$0xff] %vm25_vm0, %v6608_v5  ;;  %5212 = vmatmul.msk.bf16.vlgmr.msra.gmra.mxu2 %vm25_vm0, %v421_v43  ;;  %vm166_vm7 = vcmp.eq.s32.totalorder %v157_v2, 0  ;;  %v6886_v25 = vsub.f32 1.0, %v6873_v18  ;;  %v158_v43 = vand.u32 1, %v77_v32  ;;  %v6397_v2 = vld [vmem:[%s8353_s2 + $0xc8] sm:$0xff] }
  0x16   :  { %43 = vst.msk [vmem:[#allocation3 + $0x30] sm:$0xff] %vm25_vm0, %v6608_v5  ;;  %5241 = vmatmul.msk.bf16.vlgmr.msra.gmra.mxu3 %vm25_vm0, %v525_v44  ;;  %v6876_v19 = vsel %vm166_vm7, 1.0, %v6608_v5  ;;  %v159_v44 = vand.u32 1, %v78_v33 }
  0x17   :  { %44 = vst.msk [vmem:[#allocation3 + $0x38] sm:$0xff] %vm25_vm0, %v6608_v5  ;;  %687 = vmatpush.bf16.msrb.mxu0 %v6390_v45  ;;  %v6889_v26 = vsub.f32 1.0, %v6876_v19  ;;  %vm167_vm8 = vcmp.eq.s32.totalorder %v158_v43, 0 }
  0x18   :  { %45 = vst.msk [vmem:[#allocation3 + $0x40] sm:$0xff] %vm25_vm0, %v6608_v5  ;;  %vm168_vm9 = vcmp.eq.s32.totalorder %v159_v44, 0  ;;  %v6907_v49 = vsel %vm167_vm8, 1.0, %v6608_v5  ;;  %v724_v44 = vld [vmem:[#allocation2 + $0x9] sm:$0xff]  ;;  %vm4699_vm8 = vcmask 253952  }
  0x19   :  { %46 = vst.msk [vmem:[#allocation3 + $0x48] sm:$0xff] %vm25_vm0, %v6608_v5  ;;  %v6928_v58 = vsub.f32 1.0, %v6907_v49  ;;  %v837_v48 = vmul.f32 %v724_v44, %v6724_v24 }
  0x1a   :  { %47 = vst.msk [vmem:[#allocation3 + $0x50] sm:$0xff] %vm25_vm0, %v6608_v5 }
  0x1b   :  { %48 = vst.msk [vmem:[#allocation4] sm:$0xff] %vm25_vm0, %v6608_v5  ;;  %688 = vmatpush.bf16.msrb.mxu0 %v6389_v52  ;;  %v6403_v52 = vld [vmem:[%s8353_s2 + $0xf8] sm:$0xff] }
  0x1c   :  { %49 = vst.msk [vmem:[#allocation4 + $0x8] sm:$0xff] %vm25_vm0, %v6608_v5  ;;  %1007 = vmatpush.bf16.msrb.mxu3 %v6403_v52  ;;  %v733_v52 = vmul.f32 %v724_v44, %v6706_v20 }
  0x1d   :  { %50 = vst.msk [vmem:[#allocation4 + $0x10] sm:$0xff] %vm25_vm0, %v6608_v5 }
  0x1e   :  { %51 = vst.msk [vmem:[#allocation4 + $0x18] sm:$0xff] %vm25_vm0, %v6608_v5 }
  0x1f   :  { %52 = vst.msk [vmem:[#allocation4 + $0x20] sm:$0xff] %vm25_vm0, %v6608_v5  ;;  %689 = vmatpush.bf16.msrb.mxu0 %v6388_v22  ;;  %v6392_v22 = vld [vmem:[%s8353_s2 + $0xa0] sm:$0xff] }
  0x20   :  { %53 = vst.msk [vmem:[#allocation4 + $0x28] sm:$0xff] %vm25_vm0, %v6608_v5 }
  0x21   :  { %54 = vst.msk [vmem:[#allocation4 + $0x30] sm:$0xff] %vm25_vm0, %v6608_v5 }
  0x22   :  { %55 = vst.msk [vmem:[#allocation4 + $0x38] sm:$0xff] %vm25_vm0, %v6608_v5 }
  0x23   :  { %56 = vst.msk [vmem:[#allocation4 + $0x40] sm:$0xff] %vm25_vm0, %v6608_v5 }
  0x24   :  { %57 = vst.msk [vmem:[#allocation4 + $0x48] sm:$0xff] %vm25_vm0, %v6608_v5 }
  0x25   :  { %58 = vst.msk [vmem:[#allocation4 + $0x50] sm:$0xff] %vm25_vm0, %v6608_v5 }
  0x26   :  { %59 = vst.msk [vmem:[#allocation5] sm:$0xff] %vm25_vm0, %v6608_v5 }
  0x27   :  { %60 = vst.msk [vmem:[#allocation5 + $0x8] sm:$0xff] %vm25_vm0, %v6608_v5 }
  0x28   :  { %61 = vst.msk [vmem:[#allocation5 + $0x10] sm:$0xff] %vm25_vm0, %v6608_v5 }
  0x29   :  { %62 = vst.msk [vmem:[#allocation5 + $0x18] sm:$0xff] %vm25_vm0, %v6608_v5 }
  0x2a   :  { %63 = vst.msk [vmem:[#allocation5 + $0x20] sm:$0xff] %vm25_vm0, %v6608_v5 }
  0x2b   :  { %64 = vst.msk [vmem:[#allocation5 + $0x28] sm:$0xff] %vm25_vm0, %v6608_v5 }
  0x2c   :  { %65 = vst.msk [vmem:[#allocation5 + $0x30] sm:$0xff] %vm25_vm0, %v6608_v5 }
  0x2d   :  { %66 = vst.msk [vmem:[#allocation5 + $0x38] sm:$0xff] %vm25_vm0, %v6608_v5 }
  0x2e   :  { %67 = vst.msk [vmem:[#allocation5 + $0x40] sm:$0xff] %vm25_vm0, %v6608_v5 }
  0x2f   :  { %68 = vst.msk [vmem:[#allocation5 + $0x48] sm:$0xff] %vm25_vm0, %v6608_v5 }
  0x30   :  { %69 = vst.msk [vmem:[#allocation5 + $0x50] sm:$0xff] %vm25_vm0, %v6608_v5 }
  0x31   :  { %195 = vst.msk [vmem:[#allocation2 + $0x18] sm:$0xff] %vm192_vm1, %v190_v50  ;;  %v6910_v50 = vsel %vm168_vm9, 1.0, %v6608_v5 }
  0x32   :  { %196 = vst.msk [vmem:[#allocation2 + $0x20] sm:$0xff] %vm192_vm1, %v191_v51  ;;  %v6395_v51 = vld [vmem:[%s8353_s2 + $0xb8] sm:$0xff]  ;;  %v6931_v59 = vsub.f32 1.0, %v6910_v50 }
  0x33   :  { %201 = vst.msk [vmem:[#allocation2 + $0x30] sm:$0xff] %vm192_vm1, %v197_v53  ;;  %v6398_v53 = vld [vmem:[%s8353_s2 + $0xd0] sm:$0xff]  ;;  %799 = vmatpush.bf16.msrb.mxu1 %v6395_v51 }
  0x34   :  { %202 = vst.msk [vmem:[#allocation2 + $0x38] sm:$0xff] %vm192_vm1, %v198_v54  ;;  %v6394_v54 = vld [vmem:[%s8353_s2 + $0xb0] sm:$0xff]  ;;  %904 = vmatpush.bf16.msrb.mxu2 %v6398_v53 }
  0x35   :  { %203 = vst.msk [vmem:[#allocation2 + $0x40] sm:$0xff] %vm192_vm1, %v199_v56  ;;  %v6402_v56 = vld [vmem:[%s8353_s2 + $0xf0] sm:$0xff] }
  0x36   :  { %204 = vst.msk [vmem:[#allocation2 + $0x48] sm:$0xff] %vm192_vm1, %v200_v23  ;;  %1008 = vmatpush.bf16.msrb.mxu3 %v6402_v56  ;;  %v6400_v23 = vld [vmem:[%s8353_s2 + $0xe0] sm:$0xff]  ;;  %v941_v56 = vld [vmem:[#allocation2 + $0xa] sm:$0xff] }
  0x37   :  { %8374 = vst [vmem:[#allocation9_spill] sm:$0xff] %v6907_v49  ;;  %800 = vmatpush.bf16.msrb.mxu1 %v6394_v54 }
  0x38   :  { %v238_v63 = vld [vmem:[#allocation2 + $0x16] sm:$0xff]  ;;  %8375 = vst [vmem:[#allocation10_spill] sm:$0xff] %v6910_v50  ;;  %905 = vmatpush.bf16.msrb.mxu2 %v6397_v2  ;;  %v6405_v2 = vld [vmem:[%s8353_s2 + $0x108] sm:$0xff] }
  0x39   :  { %v207_v0 = vld [vmem:[#allocation2 + $0x15] sm:$0xff]  ;;  %v239_v3 = vld [vmem:[#allocation2 + $0x1e] sm:$0xff]  ;;  %v407_v30 = vld [vmem:[#allocation2 + $0x27] sm:$0xff]  ;;  %8376 = vst [vmem:[#allocation11_spill] sm:$0xff] %v6928_v58 }
  0x3a   :  { %v405_v1 = vld [vmem:[#allocation2 + $0x17] sm:$0xff]  ;;  %v216_v6 = vmul.f32 %v207_v0, %v6856_v60  ;;  %v406_v7 = vld [vmem:[#allocation2 + $0x1f] sm:$0xff]  ;;  %v246_v11 = vpack.c.bf16 %v239_v3, %v238_v63  ;;  %v210_v29 = vld [vmem:[#allocation2 + $0x2d] sm:$0xff]  ;;  %v416_v38 = vmul.f32 %v407_v30, %v6873_v18  ;;  %v520_v40 = vmul.f32 %v407_v30, %v6886_v25  ;;  %8377 = vst [vmem:[#allocation12_spill] sm:$0xff] %v6931_v59 }
  0x3b   :  { %v208_v4 = vld [vmem:[#allocation2 + $0x1d] sm:$0xff]  ;;  %v414_v9 = vmul.f32 %v405_v1, %v6843_v55  ;;  %v518_v10 = vmul.f32 %v405_v1, %v6856_v60  ;;  %v415_v13 = vmul.f32 %v406_v7, %v6849_v57  ;;  %v519_v14 = vmul.f32 %v406_v7, %v6860_v61  ;;  %v209_v28 = vld [vmem:[#allocation2 + $0x25] sm:$0xff]  ;;  %v408_v31 = vld [vmem:[#allocation2 + $0x2f] sm:$0xff] }
  0x3c   :  { %v217_v12 = vmul.f32 %v208_v4, %v6860_v61  ;;  %5163 = vmatmul.msk.bf16.gmra.mxu0 %vm25_vm0, %v246_v11  ;;  %v240_v34 = vld [vmem:[#allocation2 + $0x26] sm:$0xff]  ;;  %v241_v35 = vld [vmem:[#allocation2 + $0x2e] sm:$0xff]  ;;  %v218_v36 = vmul.f32 %v209_v28, %v6886_v25  ;;  %v219_v37 = vmul.f32 %v210_v29, %v6889_v26  ;;  %v417_v39 = vmul.f32 %v408_v31, %v6876_v19  ;;  %v212_v63 = vld [vmem:[#allocation2 + $0x3d] sm:$0xff] }
  0x3d   :  { %v422_v16 = vpack.c.bf16 %v415_v13, %v414_v9  ;;  %v526_v17 = vpack.c.bf16 %v519_v14, %v518_v10  ;;  %v521_v41 = vmul.f32 %v408_v31, %v6889_v26  ;;  %v247_v42 = vpack.c.bf16 %v241_v35, %v240_v34  ;;  %v211_v62 = vld [vmem:[#allocation2 + $0x35] sm:$0xff]  ;;  %v410_v1 = vld [vmem:[#allocation2 + $0x3f] sm:$0xff]  ;;  %v6393_v7 = vld [vmem:[%s8353_s2 + $0xa8] sm:$0xff] }
  0x3e   :  { %v224_v15 = vpack.c.bf16 %v217_v12, %v216_v6  ;;  %v225_v45 = vpack.c.bf16 %v219_v37, %v218_v36  ;;  %v423_v46 = vpack.c.bf16 %v417_v39, %v416_v38  ;;  %v409_v0 = vld [vmem:[#allocation2 + $0x37] sm:$0xff]  ;;  %v79_v4 = vadd.s32 64, %v6669_v8  ;;  %v6401_v9 = vld [vmem:[%s8353_s2 + $0xe8] sm:$0xff]  ;;  %801 = vmatpush.bf16.msrb.mxu1 %v6393_v7  ;;  %v623_v7 = vld [vmem:[#allocation2 + $0x20] sm:$0xff] }
  0x3f   :  { %5213 = vmatmul.msk.bf16.gmra.mxu2 %vm25_vm0, %v422_v16  ;;  %5242 = vmatmul.msk.bf16.gmra.mxu3 %vm25_vm0, %v526_v17  ;;  %v527_v47 = vpack.c.bf16 %v521_v41, %v520_v40  ;;  %v242_v3 = vld [vmem:[#allocation2 + $0x36] sm:$0xff]  ;;  %v243_v6 = vld [vmem:[#allocation2 + $0x3e] sm:$0xff]  ;;  %v220_v10 = vmul.f32 %v211_v62, %v6928_v58  ;;  %v221_v11 = vmul.f32 %v212_v63, %v6931_v59  ;;  %v411_v35 = vld [vmem:[#allocation2 + $0x47] sm:$0xff] }
  0x40   :  { %5184 = vmatmul.msk.bf16.gmra.mxu1 %vm25_vm0, %v224_v15  ;;  %v418_v12 = vmul.f32 %v409_v0, %v6907_v49  ;;  %v419_v13 = vmul.f32 %v410_v1, %v6910_v50  ;;  %v522_v8 = vmul.f32 %v409_v0, %v6928_v58  ;;  %v523_v14 = vmul.f32 %v410_v1, %v6931_v59  ;;  %v6396_v15 = vld [vmem:[%s8353_s2 + $0xc0] sm:$0xff]  ;;  %v6407_v31 = vld [vmem:[%s8353_s2 + $0x118] sm:$0xff] }
  0x41   :  { %v248_v16 = vpack.c.bf16 %v243_v6, %v242_v3  ;;  %v160_v17 = vand.u32 1, %v79_v4  ;;  %1009 = vmatpush.bf16.msrb.mxu3 %v6401_v9  ;;  %v226_v28 = vpack.c.bf16 %v221_v11, %v220_v10  ;;  %906 = vmatpush.bf16.msrb.mxu2 %v6396_v15  ;;  %v213_v34 = vld [vmem:[#allocation2 + $0x45] sm:$0xff]  ;;  %v942_v62 = vld [vmem:[#allocation2 + $0x12] sm:$0xff] }
  0x42   :  { %v424_v29 = vpack.c.bf16 %v419_v13, %v418_v12  ;;  %v528_v30 = vpack.c.bf16 %v523_v14, %v522_v8  ;;  %802 = vmatpush.bf16.msrb.mxu1 %v6392_v22  ;;  %1120 = vmatpush.bf16.msra.mxu0 %v6407_v31  ;;  %v244_v36 = vld [vmem:[#allocation2 + $0x46] sm:$0xff]  ;;  %v950_v1 = vpack.c.bf16 %v942_v62, %v941_v56  ;;  %v726_v3 = vld [vmem:[#allocation2 + $0x19] sm:$0xff] }
  0x43   :  { %vm169_vm10 = vcmp.eq.s32.totalorder %v160_v17, 0  ;;  %v249_v40 = vpack.c.bf16 %v244_v36, %v244_v36  ;;  %v727_v4 = vld [vmem:[#allocation2 + $0x21] sm:$0xff]  ;;  %v622_v6 = vld [vmem:[#allocation2 + $0x18] sm:$0xff]  ;;  %v839_v9 = vmul.f32 %v726_v3, %v6856_v60  ;;  %v735_v11 = vmul.f32 %v726_v3, %v6843_v55 }
  0x44   :  { %v6966_v32 = vsel %vm169_vm10, 1.0, %v6608_v5  ;;  %v6406_v5 = vld [vmem:[%s8353_s2 + $0x110] sm:$0xff]  ;;  %v840_v10 = vmul.f32 %v727_v4, %v6860_v61  ;;  %v736_v12 = vmul.f32 %v727_v4, %v6849_v57  ;;  %v630_v13 = vpack.c.bf16 %v623_v7, %v622_v6  ;;  %v943_v8 = vld [vmem:[#allocation2 + $0x1a] sm:$0xff]  ;;  %v944_v14 = vld [vmem:[#allocation2 + $0x22] sm:$0xff] }
  0x45   :  { %1010 = vmatpush.bf16.msrb.mxu3 %v6400_v23  ;;  %8378 = vst [vmem:[#allocation13_spill] sm:$0xff] %v6966_v32  ;;  %v6969_v33 = vsub.f32 1.0, %v6966_v32  ;;  %v420_v38 = vmul.f32 %v411_v35, %v6966_v32  ;;  %v951_v17 = vpack.c.bf16 %v944_v14, %v943_v8  ;;  %v6404_v22 = vld [vmem:[%s8353_s2 + $0x100] sm:$0xff] }
  0x46   :  { %1121 = vmatpush.bf16.msra.mxu0 %v6406_v5  ;;  %v847_v15 = vpack.c.bf16 %v840_v10, %v839_v9  ;;  %v948_v3 = vld [vmem:[#allocation2 + $0x42] sm:$0xff] }
  0x47   :  { %8379 = vst [vmem:[#allocation14_spill] sm:$0xff] %v6969_v33  ;;  %v222_v37 = vmul.f32 %v213_v34, %v6969_v33  ;;  %v524_v39 = vmul.f32 %v411_v35, %v6969_v33  ;;  %v624_v34 = vld [vmem:[#allocation2 + $0x28] sm:$0xff]  ;;  %v625_v35 = vld [vmem:[#allocation2 + $0x30] sm:$0xff] }
  0x49   :  { %v227_v41 = vpack.c.bf16 %v222_v37, %v222_v37  ;;  %v529_v43 = vpack.c.bf16 %v524_v39, %v524_v39 }
  0x4a   :  { %1122 = vmatpush.bf16.msra.mxu0 %v6405_v2  ;;  %v947_v2 = vld [vmem:[#allocation2 + $0x3a] sm:$0xff] }
  0x4b   :  { %v953_v7 = vpack.c.bf16 %v948_v3, %v947_v2 }
  0x4c   :  { %5164 = vmatmul.msk.bf16.gmra.mxu0 %vm25_vm0, %v247_v42  ;;  %v425_v42 = vpack.c.bf16 %v420_v38, %v420_v38 }
  0x4e   :  { %1123 = vmatpush.bf16.msra.mxu0 %v6404_v22 }
  0x4f   :  { %5214 = vmatmul.msk.bf16.gmra.mxu2 %vm25_vm0, %v423_v46  ;;  %5243 = vmatmul.msk.bf16.gmra.mxu3 %vm25_vm0, %v527_v47  ;;  %v620_v46 = vld [vmem:[#allocation2 + $0x8] sm:$0xff]  ;;  %v621_v47 = vld [vmem:[#allocation2 + $0x10] sm:$0xff] }
  0x50   :  { %5185 = vmatmul.msk.bf16.gmra.mxu1 %vm25_vm0, %v225_v45  ;;  %v725_v45 = vld [vmem:[#allocation2 + $0x11] sm:$0xff]  ;;  %v629_v54 = vpack.c.bf16 %v621_v47, %v620_v46 }
  0x51   :  { %v838_v51 = vmul.f32 %v725_v45, %v6735_v27  ;;  %v734_v53 = vmul.f32 %v725_v45, %v6713_v21 }
  0x53   :  { %v846_v63 = vpack.c.bf16 %v838_v51, %v837_v48  ;;  %v742_v0 = vpack.c.bf16 %v734_v53, %v733_v52  ;;  %v730_v51 = vld [vmem:[#allocation2 + $0x39] sm:$0xff]  ;;  %v731_v52 = vld [vmem:[#allocation2 + $0x41] sm:$0xff] }
  0x54   :  { %v626_v53 = vld [vmem:[#allocation2 + $0x38] sm:$0xff]  ;;  %v843_v56 = vmul.f32 %v730_v51, %v6928_v58  ;;  %v844_v62 = vmul.f32 %v731_v52, %v6931_v59 }
  0x56   :  { %v849_v4 = vpack.c.bf16 %v844_v62, %v843_v56  ;;  %v1048_v56 = vld [vmem:[#allocation2 + $0x23] sm:$0xff] }
  0x57   :  { %v1057_v3 = vmul.f32 %v1048_v56, %v6849_v57 }
  0x5c   :  { %5165 = vmatmul.msk.bf16.gmra.mxu0 %vm25_vm0, %v248_v16  ;;  %v743_v16 = vpack.c.bf16 %v736_v12, %v735_v11  ;;  %v732_v11 = vld [vmem:[#allocation2 + $0x49] sm:$0xff] }
  0x5d   :  { %v628_v12 = vld [vmem:[#allocation2 + $0x48] sm:$0xff]  ;;  %v741_v8 = vmul.f32 %v732_v11, %v6966_v32 }
  0x5f   :  { %5215 = vmatmul.msk.bf16.gmra.mxu2 %vm25_vm0, %v424_v29  ;;  %5244 = vmatmul.msk.bf16.gmra.mxu3 %vm25_vm0, %v528_v30  ;;  %v728_v29 = vld [vmem:[#allocation2 + $0x29] sm:$0xff]  ;;  %v729_v30 = vld [vmem:[#allocation2 + $0x31] sm:$0xff] }
  0x60   :  { %5186 = vmatmul.msk.bf16.gmra.mxu1 %vm25_vm0, %v226_v28  ;;  %v841_v36 = vmul.f32 %v728_v29, %v6886_v25  ;;  %v842_v37 = vmul.f32 %v729_v30, %v6889_v26  ;;  %v737_v38 = vmul.f32 %v728_v29, %v6873_v18  ;;  %v738_v39 = vmul.f32 %v729_v30, %v6876_v19 }
  0x62   :  { %v848_v45 = vpack.c.bf16 %v842_v37, %v841_v36  ;;  %v744_v46 = vpack.c.bf16 %v738_v39, %v737_v38  ;;  %v1045_v36 = vld [vmem:[#allocation2 + $0xb] sm:$0xff]  ;;  %v1046_v37 = vld [vmem:[#allocation2 + $0x13] sm:$0xff] }
  0x6c   :  { %5166 = vmatmul.msk.bf16.gmra.mxu0 %vm25_vm0, %v249_v40  ;;  %v631_v40 = vpack.c.bf16 %v625_v35, %v624_v34 }
  0x6f   :  { %5216 = vmatmul.msk.bf16.gmra.mxu2 %vm25_vm0, %v425_v42  ;;  %5245 = vmatmul.msk.bf16.gmra.mxu3 %vm25_vm0, %v529_v43  ;;  %v946_v42 = vld [vmem:[#allocation2 + $0x32] sm:$0xff] }
  0x70   :  { %5187 = vmatmul.msk.bf16.gmra.mxu1 %vm25_vm0, %v227_v41  ;;  %v945_v41 = vld [vmem:[#allocation2 + $0x2a] sm:$0xff] }
  0x71   :  { %v952_v47 = vpack.c.bf16 %v946_v42, %v945_v41  ;;  %v1054_v42 = vmul.f32 %v1045_v36, %v6706_v20 }
  0x7c   :  { %5270 = vmatmul.msk.bf16.vlgmr.msrb.gmra.mxu0 %vm25_vm0, %v629_v54  ;;  %v627_v54 = vld [vmem:[#allocation2 + $0x40] sm:$0xff] }
  0x7f   :  { %5328 = vmatmul.msk.bf16.vlgmr.msrb.gmra.mxu2 %vm25_vm0, %v846_v63  ;;  %5357 = vmatmul.msk.bf16.vlgmr.msrb.gmra.mxu3 %vm25_vm0, %v950_v1  ;;  %v739_v63 = vmul.f32 %v730_v51, %v6907_v49  ;;  %v632_v1 = vpack.c.bf16 %v627_v54, %v626_v53  ;;  %v1047_v54 = vld [vmem:[#allocation2 + $0x1b] sm:$0xff] }
  0x80   :  { %5299 = vmatmul.msk.bf16.vlgmr.msrb.gmra.mxu1 %vm25_vm0, %v742_v0  ;;  %v740_v0 = vmul.f32 %v731_v52, %v6910_v50  ;;  %v1056_v2 = vmul.f32 %v1047_v54, %v6843_v55 }
  0x82   :  { %v745_v6 = vpack.c.bf16 %v740_v0, %v739_v63 }
  0x8c   :  { %5271 = vmatmul.msk.bf16.gmra.mxu0 %vm25_vm0, %v630_v13  ;;  %v845_v13 = vmul.f32 %v732_v11, %v6969_v33  ;;  %v6431_v33 = vld [vmem:[%s8353_s2 + $0x1d8] sm:$0xff] }
  0x8f   :  { %5329 = vmatmul.msk.bf16.gmra.mxu2 %vm25_vm0, %v847_v15  ;;  %5358 = vmatmul.msk.bf16.gmra.mxu3 %vm25_vm0, %v951_v17  ;;  %v307_v23 = vpop.f32.mrf.mxu0  ;;  %v949_v17 = vld [vmem:[#allocation2 + $0x4a] sm:$0xff] }
  0x90   :  { %5300 = vmatmul.msk.bf16.gmra.mxu1 %vm25_vm0, %v743_v16  ;;  %v633_v16 = vpack.c.bf16 %v628_v12, %v628_v12  ;;  %v954_v30 = vpack.c.bf16 %v949_v17, %v949_v17  ;;  %v1049_v17 = vld [vmem:[#allocation2 + $0x2b] sm:$0xff] }
  0x91   :  { %v379_v28 = vpop.f32.mrf.mxu1 }
  0x92   :  { %v380_v31 = vadd.f32 %v379_v28, %v307_v23  ;;  %v850_v23 = vpack.c.bf16 %v845_v13, %v845_v13  ;;  %v746_v28 = vpack.c.bf16 %v741_v8, %v741_v8 }
  0x97   :  { %v7021_v9 = vpop.f32.mrf.mxu0 }
  0x98   :  { %v483_v43 = vpop.f32.mrf.mxu2 }
  0x99   :  { %v507_v5 = vadd.f32 %v483_v43, %v380_v31  ;;  %v587_v44 = vpop.f32.mrf.mxu3  ;;  %v7023_v10 = vpop.f32.mrf.mxu1  ;;  %v1055_v43 = vmul.f32 %v1046_v37, %v6713_v21 }
  0x9b   :  { %v7007_v48 = vadd.f32 %v587_v44, %v507_v5  ;;  %v1063_v5 = vpack.c.bf16 %v1055_v43, %v1054_v42 }
  0x9c   :  { %5272 = vmatmul.msk.bf16.gmra.mxu0 %vm25_vm0, %v631_v40 }
  0x9f   :  { %5330 = vmatmul.msk.bf16.gmra.mxu2 %vm25_vm0, %v848_v45  ;;  %5359 = vmatmul.msk.bf16.gmra.mxu3 %vm25_vm0, %v952_v47 }
  0xa0   :  { %5301 = vmatmul.msk.bf16.gmra.mxu1 %vm25_vm0, %v744_v46  ;;  %v7027_v14 = vpop.f32.mrf.mxu2 }
  0xa1   :  { %v7029_v15 = vpop.f32.mrf.mxu3 }
  0xac   :  { %5273 = vmatmul.msk.bf16.gmra.mxu0 %vm25_vm0, %v632_v1 }
  0xaf   :  { %5331 = vmatmul.msk.bf16.gmra.mxu2 %vm25_vm0, %v849_v4  ;;  %5360 = vmatmul.msk.bf16.gmra.mxu3 %vm25_vm0, %v953_v7  ;;  %v1064_v4 = vpack.c.bf16 %v1057_v3, %v1056_v2  ;;  %v6411_v3 = vld [vmem:[%s8353_s2 + $0x138] sm:$0xff] }
  0xb0   :  { %5302 = vmatmul.msk.bf16.gmra.mxu1 %vm25_vm0, %v745_v6  ;;  %1355 = vmatpush.bf16.msra.mxu2 %v6411_v3 }
  0xb9   :  { %v312_v22 = vpop.f32.mrf.mxu0 }
  0xbc   :  { %5274 = vmatmul.msk.bf16.gmra.mxu0 %vm25_vm0, %v633_v16 }
  0xbd   :  { %v384_v29 = vpop.f32.mrf.mxu1 }
  0xbe   :  { %v385_v31 = vadd.f32 %v384_v29, %v312_v22  ;;  %v1050_v22 = vld [vmem:[#allocation2 + $0x33] sm:$0xff] }
  0xbf   :  { %5332 = vmatmul.msk.bf16.gmra.mxu2 %vm25_vm0, %v850_v23  ;;  %5361 = vmatmul.msk.bf16.gmra.mxu3 %vm25_vm0, %v954_v30 }
  0xc0   :  { %5303 = vmatmul.msk.bf16.gmra.mxu1 %vm25_vm0, %v746_v28 }
  0xc1   :  { %v7035_v35 = vpop.f32.mrf.mxu0 }
  0xc2   :  { %v488_v34 = vpop.f32.mrf.mxu2  ;;  %v592_v39 = vpop.f32.mrf.mxu3 }
  0xc3   :  { %v509_v38 = vadd.f32 %v488_v34, %v385_v31  ;;  %v1058_v31 = vmul.f32 %v1049_v17, %v6873_v18  ;;  %v1059_v34 = vmul.f32 %v1050_v22, %v6876_v19 }
  0xc5   :  { %v7037_v40 = vpop.f32.mrf.mxu1  ;;  %v7039_v41 = vadd.f32 %v592_v39, %v509_v38  ;;  %v1065_v36 = vpack.c.bf16 %v1059_v34, %v1058_v31  ;;  %v1053_v34 = vld [vmem:[#allocation2 + $0x4b] sm:$0xff] }
  0xc9   :  { %v317_v45 = vpop.f32.mrf.mxu0 }
  0xca   :  { %v7043_v44 = vpop.f32.mrf.mxu2  ;;  %v7045_v46 = vpop.f32.mrf.mxu3 }
  0xcc   :  { %5386 = vmatmul.msk.bf16.vlgmr.msra.gmra.mxu0 %vm25_vm0, %v1063_v5 }
  0xcd   :  { %v389_v47 = vpop.f32.mrf.mxu1 }
  0xce   :  { %v390_v51 = vadd.f32 %v389_v47, %v317_v45  ;;  %v1051_v47 = vld [vmem:[#allocation2 + $0x3b] sm:$0xff] }
  0xd1   :  { %v7048_v53 = vpop.f32.mrf.mxu0 }
  0xd2   :  { %v493_v52 = vpop.f32.mrf.mxu2  ;;  %v597_v63 = vpop.f32.mrf.mxu3 }
  0xd3   :  { %v511_v62 = vadd.f32 %v493_v52, %v390_v51  ;;  %v1052_v51 = vld [vmem:[#allocation2 + $0x43] sm:$0xff] }
  0xd4   :  { %v1061_v2 = vmul.f32 %v1052_v51, %v6910_v50 }
  0xd5   :  { %v7050_v0 = vpop.f32.mrf.mxu1  ;;  %v7052_v1 = vadd.f32 %v597_v63, %v511_v62  ;;  %v1060_v63 = vmul.f32 %v1051_v47, %v6907_v49 }
  0xd9   :  { %v322_v7 = vpop.f32.mrf.mxu0 }
  0xda   :  { %v7056_v6 = vpop.f32.mrf.mxu2  ;;  %v7058_v11 = vpop.f32.mrf.mxu3 }
  0xdc   :  { %5387 = vmatmul.msk.bf16.gmra.mxu0 %vm25_vm0, %v1064_v4  ;;  %v6415_v4 = vld [vmem:[%s8353_s2 + $0x158] sm:$0xff] }
  0xdd   :  { %v394_v12 = vpop.f32.mrf.mxu1  ;;  %1283 = vmatpush.bf16.msra.mxu1 %v6415_v4 }
  0xde   :  { %v395_v13 = vadd.f32 %v394_v12, %v322_v7  ;;  %v1066_v7 = vpack.c.bf16 %v1061_v2, %v1060_v63  ;;  %v6414_v2 = vld [vmem:[%s8353_s2 + $0x150] sm:$0xff] }
  0xe1   :  { %v7061_v16 = vpop.f32.mrf.mxu0  ;;  %1284 = vmatpush.bf16.msra.mxu1 %v6414_v2 }
  0xe2   :  { %v498_v8 = vpop.f32.mrf.mxu2  ;;  %v602_v28 = vpop.f32.mrf.mxu3 }
  0xe3   :  { %v513_v23 = vadd.f32 %v498_v8, %v395_v13 }
  0xe5   :  { %v7063_v29 = vpop.f32.mrf.mxu1  ;;  %v7065_v30 = vadd.f32 %v602_v28, %v513_v23 }
  0xe9   :  { %v327_v38 = vpop.f32.mrf.mxu0 }
  0xea   :  { %v7069_v37 = vpop.f32.mrf.mxu2  ;;  %v7071_v39 = vpop.f32.mrf.mxu3 }
  0xec   :  { %5388 = vmatmul.msk.bf16.gmra.mxu0 %vm25_vm0, %v1065_v36 }
  0xed   :  { %v399_v42 = vpop.f32.mrf.mxu1 }
  0xee   :  { %v400_v43 = vadd.f32 %v399_v42, %v327_v38 }
  0xf1   :  { %v329_v45 = vpop.f32.mrf.mxu0 }
  0xf2   :  { %v503_v5 = vpop.f32.mrf.mxu2  ;;  %v607_v54 = vpop.f32.mrf.mxu3 }
  0xf3   :  { %v515_v52 = vadd.f32 %v503_v5, %v400_v43  ;;  %v1062_v5 = vmul.f32 %v1053_v34, %v6966_v32 }
  0xf5   :  { %v401_v56 = vpop.f32.mrf.mxu1  ;;  %v7074_v62 = vadd.f32 %v607_v54, %v515_v52  ;;  %v1067_v45 = vpack.c.bf16 %v1062_v5, %v1062_v5 }
  0xf9   :  { %v691_v13 = vpop.f32.mrf.mxu0 }
  0xfa   :  { %v505_v12 = vpop.f32.mrf.mxu2  ;;  %v609_v8 = vpop.f32.mrf.mxu3  ;;  %v715_v17 = vadd.f32 %v691_v13, %v7007_v48  ;;  %v6410_v48 = vld [vmem:[%s8353_s2 + $0x130] sm:$0xff] }
  0xfb   :  { %1356 = vmatpush.bf16.msra.mxu2 %v6410_v48 }
  0xfc   :  { %5389 = vmatmul.msk.bf16.gmra.mxu0 %vm25_vm0, %v1066_v7 }
  0xfd   :  { %v804_v22 = vpop.f32.mrf.mxu1 }
  0xfe   :  { %v828_v23 = vadd.f32 %v804_v22, %v715_v17 }
 0x101   :  { %v7086_v31 = vpop.f32.mrf.mxu0 }
 0x102   :  { %v908_v28 = vpop.f32.mrf.mxu2  ;;  %v1012_v38 = vpop.f32.mrf.mxu3 }
 0x103   :  { %v932_v36 = vadd.f32 %v908_v28, %v828_v23 }
 0x105   :  { %v7088_v42 = vpop.f32.mrf.mxu1  ;;  %v7090_v43 = vadd.f32 %v1012_v38, %v932_v36  ;;  %v6409_v36 = vld [vmem:[%s8353_s2 + $0x128] sm:$0xff] }
 0x106   :  { %v6413_v38 = vld [vmem:[%s8353_s2 + $0x148] sm:$0xff]  ;;  %1357 = vmatpush.bf16.msra.mxu2 %v6409_v36 }
 0x107   :  { %1285 = vmatpush.bf16.msra.mxu1 %v6413_v38 }
 0x109   :  { %v696_v51 = vpop.f32.mrf.mxu0 }
 0x10a   :  { %v7096_v47 = vpop.f32.mrf.mxu2  ;;  %v717_v52 = vadd.f32 %v696_v51, %v7039_v41  ;;  %v7099_v54 = vpop.f32.mrf.mxu3 }
 0x10c   :  { %5390 = vmatmul.msk.bf16.gmra.mxu0 %vm25_vm0, %v1067_v45 }
 0x10d   :  { %v809_v56 = vpop.f32.mrf.mxu1 }
 0x10e   :  { %v830_v63 = vadd.f32 %v809_v56, %v717_v52 }
 0x111   :  { %v7105_v4 = vpop.f32.mrf.mxu0 }
 0x112   :  { %v913_v3 = vpop.f32.mrf.mxu2  ;;  %v1017_v12 = vpop.f32.mrf.mxu3 }
 0x113   :  { %v934_v7 = vadd.f32 %v913_v3, %v830_v63 }
 0x115   :  { %v7107_v13 = vpop.f32.mrf.mxu1  ;;  %v7109_v8 = vadd.f32 %v1017_v12, %v934_v7 }
 0x119   :  { %v701_v17 = vpop.f32.mrf.mxu0 }
 0x11a   :  { %v7111_v41 = vpop.f32.mrf.mxu2  ;;  %v719_v22 = vadd.f32 %v701_v17, %v7052_v1  ;;  %v7114_v23 = vpop.f32.mrf.mxu3  ;;  %v6408_v17 = vld [vmem:[%s8353_s2 + $0x120] sm:$0xff] }
 0x11b   :  { %1358 = vmatpush.bf16.msra.mxu2 %v6408_v17 }
 0x11d   :  { %v814_v28 = vpop.f32.mrf.mxu1 }
 0x11e   :  { %v832_v34 = vadd.f32 %v814_v28, %v719_v22 }
 0x11f   :  { %1780 = vmatpush.bf16.msrb.mxu2 %v6431_v33 }
 0x121   :  { %v7122_v48 = vpop.f32.mrf.mxu0 }
 0x122   :  { %v918_v5 = vpop.f32.mrf.mxu2  ;;  %v1022_v51 = vpop.f32.mrf.mxu3 }
 0x123   :  { %v936_v45 = vadd.f32 %v918_v5, %v832_v34  ;;  %v6423_v5 = vld [vmem:[%s8353_s2 + $0x198] sm:$0xff] }
 0x124   :  { %1563 = vmatpush.bf16.msrb.mxu0 %v6423_v5 }
 0x125   :  { %v7124_v1 = vpop.f32.mrf.mxu1  ;;  %v7126_v52 = vadd.f32 %v1022_v51, %v936_v45  ;;  %v6412_v51 = vld [vmem:[%s8353_s2 + $0x140] sm:$0xff] }
 0x126   :  { %1286 = vmatpush.bf16.msra.mxu1 %v6412_v51  ;;  %v382_v51 = vadd.f32 %v7023_v10, %v7021_v9 }
 0x129   :  { %v706_v63 = vpop.f32.mrf.mxu0 }
 0x12a   :  { %v7128_v56 = vpop.f32.mrf.mxu2  ;;  %v721_v2 = vadd.f32 %v706_v63, %v7065_v30  ;;  %v7131_v3 = vpop.f32.mrf.mxu3  ;;  %v6419_v30 = vld [vmem:[%s8353_s2 + $0x178] sm:$0xff]  ;;  %v6418_v63 = vld [vmem:[%s8353_s2 + $0x170] sm:$0xff] }
 0x12b   :  { %1459 = vmatpush.bf16.msra.mxu3 %v6419_v30  ;;  %v6421_v30 = vld [vmem:[%s8353_s2 + $0x188] sm:$0xff] }
 0x12d   :  { %v819_v7 = vpop.f32.mrf.mxu1 }
 0x12e   :  { %v834_v12 = vadd.f32 %v819_v7, %v721_v2  ;;  %v6422_v2 = vld [vmem:[%s8353_s2 + $0x190] sm:$0xff] }
 0x12f   :  { %1460 = vmatpush.bf16.msra.mxu3 %v6418_v63  ;;  %1564 = vmatpush.bf16.msrb.mxu0 %v6422_v2  ;;  %v6420_v63 = vld [vmem:[%s8353_s2 + $0x180] sm:$0xff]  ;;  %v508_v2 = vadd.f32 %v7027_v14, %v382_v51  ;;  %v6427_v14 = vld [vmem:[%s8353_s2 + $0x1b8] sm:$0xff] }
 0x130   :  { %1667 = vmatpush.bf16.msrb.mxu1 %v6427_v14 }
 0x131   :  { %v7136_v28 = vpop.f32.mrf.mxu0 }
 0x132   :  { %v923_v22 = vpop.f32.mrf.mxu2  ;;  %v1027_v36 = vpop.f32.mrf.mxu3 }
 0x133   :  { %v938_v34 = vadd.f32 %v923_v22, %v834_v12  ;;  %1565 = vmatpush.bf16.msrb.mxu0 %v6421_v30  ;;  %v612_v30 = vadd.f32 %v7029_v15, %v508_v2  ;;  %v387_v2 = vadd.f32 %v7037_v40, %v7035_v35 }
 0x135   :  { %v7138_v38 = vpop.f32.mrf.mxu1  ;;  %v7146_v45 = vadd.f32 %v1027_v36, %v938_v34  ;;  %v6417_v36 = vld [vmem:[%s8353_s2 + $0x168] sm:$0xff]  ;;  %v716_v10 = vadd.f32 %v7086_v31, %v612_v30 }
 0x136   :  { %1461 = vmatpush.bf16.msra.mxu3 %v6417_v36 }
 0x137   :  { %1566 = vmatpush.bf16.msrb.mxu0 %v6420_v63  ;;  %v829_v51 = vadd.f32 %v7088_v42, %v716_v10 }
 0x139   :  { %v711_v12 = vpop.f32.mrf.mxu0  ;;  %v933_v63 = vadd.f32 %v7096_v47, %v829_v51  ;;  %v6430_v47 = vld [vmem:[%s8353_s2 + $0x1d0] sm:$0xff] }
 0x13a   :  { %v7157_v7 = vpop.f32.mrf.mxu2  ;;  %v723_v17 = vadd.f32 %v711_v12, %v7074_v62  ;;  %v7160_v22 = vpop.f32.mrf.mxu3  ;;  %v6416_v62 = vld [vmem:[%s8353_s2 + $0x160] sm:$0xff]  ;;  %1781 = vmatpush.bf16.msrb.mxu2 %v6430_v47 }
 0x13b   :  { %1462 = vmatpush.bf16.msra.mxu3 %v6416_v62  ;;  %v1037_v33 = vadd.f32 %v7099_v54, %v933_v63 }
 0x13d   :  { %v824_v34 = vpop.f32.mrf.mxu1 }
 0x13e   :  { %v836_v5 = vadd.f32 %v824_v34, %v723_v17 }
 0x141   :  { %v713_v32 = vpop.f32.mrf.mxu0 }
 0x142   :  { %v928_v12 = vpop.f32.mrf.mxu2  ;;  %v1032_v34 = vpop.f32.mrf.mxu3 }
 0x143   :  { %v940_v17 = vadd.f32 %v928_v12, %v836_v5  ;;  %v510_v12 = vadd.f32 %v7043_v44, %v387_v2 }
 0x145   :  { %v826_v36 = vpop.f32.mrf.mxu1  ;;  %v7178_v9 = vadd.f32 %v1032_v34, %v940_v17 }
 0x146   :  { %v614_v36 = vadd.f32 %v7045_v46, %v510_v12 }
 0x149   :  { %v1125_v32 = vpop.f32.mrf.mxu0 }
 0x14a   :  { %v930_v5 = vpop.f32.mrf.mxu2  ;;  %v1149_v15 = vadd.f32 %v1125_v32, %v7090_v43  ;;  %v1034_v62 = vpop.f32.mrf.mxu3  ;;  %v718_v43 = vadd.f32 %v7105_v4, %v614_v36  ;;  %v392_v4 = vadd.f32 %v7050_v0, %v7048_v53  ;;  %v6426_v53 = vld [vmem:[%s8353_s2 + $0x1b0] sm:$0xff] }
 0x14b   :  { %1668 = vmatpush.bf16.msrb.mxu1 %v6426_v53 }
 0x14c   :  { %v1158_v31 = vmax.f32 %v1149_v15, 0.0  ;;  %v831_v40 = vadd.f32 %v7107_v13, %v718_v43  ;;  %v512_v0 = vadd.f32 %v7056_v6, %v392_v4 }
 0x14e   :  { %1176 = vst.msk [vmem:[#allocation3 + $0x8] sm:$0xff] %vm25_vm0, %v1158_v31  ;;  %v935_v10 = vadd.f32 %v7111_v41, %v831_v40 }
 0x150   :  { %v1039_v2 = vadd.f32 %v7114_v23, %v935_v10 }
 0x151   :  { %v1127_v17 = vpop.f32.mrf.mxu0 }
 0x152   :  { %v1150_v34 = vadd.f32 %v1127_v17, %v1037_v33 }
 0x154   :  { %v1159_v42 = vmax.f32 %v1150_v34, 0.0 }
 0x155   :  { %v1185_v54 = vld [vmem:[#allocation3 + $0x5] sm:$0xff] }
 0x156   :  { %1177 = vst.msk [vmem:[#allocation3 + $0x10] sm:$0xff] %vm25_vm0, %v1159_v42  ;;  %v1384_v30 = vld [vmem:[#allocation3 + $0x7] sm:$0xff]  ;;  %v1194_v51 = vmul.f32 %v1185_v54, %v6724_v24  ;;  %v616_v42 = vadd.f32 %v7058_v11, %v512_v0 }
 0x157   :  { %v1217_v14 = vld [vmem:[#allocation3 + $0x6] sm:$0xff]  ;;  %v1393_v62 = vmul.f32 %v1384_v30, %v6706_v20  ;;  %v1497_v13 = vmul.f32 %v1384_v30, %v6724_v24 }
 0x158   :  { %v720_v6 = vadd.f32 %v7122_v48, %v616_v42 }
 0x159   :  { %v1130_v35 = vpop.f32.mrf.mxu0 }
 0x15a   :  { %v1151_v44 = vadd.f32 %v1130_v35, %v7109_v8  ;;  %v833_v47 = vadd.f32 %v7124_v1, %v720_v6 }
 0x15c   :  { %v1160_v46 = vmax.f32 %v1151_v44, 0.0  ;;  %v937_v54 = vadd.f32 %v7128_v56, %v833_v47  ;;  %v6429_v56 = vld [vmem:[%s8353_s2 + $0x1c8] sm:$0xff] }
 0x15d   :  { %v1218_v32 = vld [vmem:[#allocation3 + $0xe] sm:$0xff]  ;;  %1782 = vmatpush.bf16.msrb.mxu2 %v6429_v56 }
 0x15e   :  { %v1186_v5 = vld [vmem:[#allocation3 + $0xd] sm:$0xff]  ;;  %1178 = vst.msk [vmem:[#allocation3 + $0x18] sm:$0xff] %vm25_vm0, %v1160_v46  ;;  %v1226_v8 = vpack.c.bf16 %v1218_v32, %v1217_v14  ;;  %v397_v46 = vadd.f32 %v7063_v29, %v7061_v16 }
 0x15f   :  { %v1385_v15 = vld [vmem:[#allocation3 + $0xf] sm:$0xff]  ;;  %v1195_v63 = vmul.f32 %v1186_v5, %v6735_v27 }
 0x160   :  { %v1394_v41 = vmul.f32 %v1385_v15, %v6713_v21  ;;  %v1498_v31 = vmul.f32 %v1385_v15, %v6735_v27  ;;  %5423 = vmatmul.msk.bf16.vlgmr.msra.gmra.mxu1 %vm25_vm0, %v1226_v8  ;;  %v6425_v16 = vld [vmem:[%s8353_s2 + $0x1a8] sm:$0xff]  ;;  %v514_v29 = vadd.f32 %v7069_v37, %v397_v46  ;;  %v6428_v37 = vld [vmem:[%s8353_s2 + $0x1c0] sm:$0xff] }
 0x161   :  { %v1203_v12 = vpack.c.bf16 %v1195_v63, %v1194_v51  ;;  %v1132_v34 = vpop.f32.mrf.mxu0  ;;  %1669 = vmatpush.bf16.msrb.mxu1 %v6425_v16  ;;  %1783 = vmatpush.bf16.msrb.mxu2 %v6428_v37 }
 0x162   :  { %v1402_v33 = vpack.c.bf16 %v1394_v41, %v1393_v62  ;;  %v1506_v17 = vpack.c.bf16 %v1498_v31, %v1497_v13  ;;  %v1152_v36 = vadd.f32 %v1132_v34, %v1039_v2  ;;  %v1041_v13 = vadd.f32 %v7131_v3, %v937_v54 }
 0x163   :  { %5444 = vmatmul.msk.bf16.vlgmr.msra.gmra.mxu2 %vm25_vm0, %v1203_v12  ;;  %v618_v3 = vadd.f32 %v7071_v39, %v514_v29 }
 0x164   :  { %5473 = vmatmul.msk.bf16.vlgmr.msra.gmra.mxu3 %vm25_vm0, %v1402_v33  ;;  %5502 = vmatmul.msk.bf16.vlgmr.msrb.gmra.mxu0 %vm25_vm0, %v1506_v17  ;;  %v1161_v43 = vmax.f32 %v1152_v36, 0.0 }
 0x165   :  { %v1187_v40 = vld [vmem:[#allocation3 + $0x15] sm:$0xff]  ;;  %v722_v2 = vadd.f32 %v7136_v28, %v618_v3 }
 0x166   :  { %1179 = vst.msk [vmem:[#allocation3 + $0x20] sm:$0xff] %vm25_vm0, %v1161_v43  ;;  %v1386_v44 = vld [vmem:[#allocation3 + $0x17] sm:$0xff]  ;;  %v1196_v48 = vmul.f32 %v1187_v40, %v6856_v60 }
 0x167   :  { %v1219_v10 = vld [vmem:[#allocation3 + $0x16] sm:$0xff]  ;;  %v1395_v32 = vmul.f32 %v1386_v44, %v6843_v55  ;;  %v1499_v15 = vmul.f32 %v1386_v44, %v6856_v60  ;;  %v835_v33 = vadd.f32 %v7138_v38, %v722_v2 }
 0x169   :  { %v1135_v23 = vpop.f32.mrf.mxu0  ;;  %v939_v42 = vadd.f32 %v7157_v7, %v835_v33 }
 0x16a   :  { %v1153_v35 = vadd.f32 %v1135_v23, %v7126_v52 }
 0x16b   :  { %v1043_v54 = vadd.f32 %v7160_v22, %v939_v42  ;;  %v6435_v22 = vld [vmem:[%s8353_s2 + $0x1f8] sm:$0xff] }
 0x16c   :  { %v1162_v30 = vmax.f32 %v1153_v35, 0.0  ;;  %1884 = vmatpush.bf16.msrb.mxu3 %v6435_v22 }
 0x16d   :  { %v1220_v11 = vld [vmem:[#allocation3 + $0x1e] sm:$0xff] }
 0x16e   :  { %v1188_v14 = vld [vmem:[#allocation3 + $0x1d] sm:$0xff]  ;;  %v1171_v5 = vmul.f32 0.0, %v1162_v30  ;;  %v1227_v1 = vpack.c.bf16 %v1220_v11, %v1219_v10 }
 0x16f   :  { %v1387_v4 = vld [vmem:[#allocation3 + $0x1f] sm:$0xff]  ;;  %v1197_v52 = vmul.f32 %v1188_v14, %v6860_v61 }
 0x170   :  { %v1396_v51 = vmul.f32 %v1387_v4, %v6849_v57  ;;  %v1500_v62 = vmul.f32 %v1387_v4, %v6860_v61  ;;  %1180 = vst.msk [vmem:[#allocation3 + $0x28] sm:$0xff] %vm25_vm0, %v1171_v5  ;;  %5424 = vmatmul.msk.bf16.gmra.mxu1 %vm25_vm0, %v1227_v1  ;;  %v6439_v4 = vld [vmem:[%s8353_s2 + $0x218] sm:$0xff]  ;;  %v6434_v5 = vld [vmem:[%s8353_s2 + $0x1f0] sm:$0xff] }
 0x171   :  { %v1204_v8 = vpack.c.bf16 %v1197_v52, %v1196_v48  ;;  %v1137_v41 = vpop.f32.mrf.mxu0  ;;  %v6424_v48 = vld [vmem:[%s8353_s2 + $0x1a0] sm:$0xff]  ;;  %1988 = vmatpush.bf16.msra.mxu0 %v6439_v4  ;;  %v6438_v1 = vld [vmem:[%s8353_s2 + $0x210] sm:$0xff]  ;;  %1885 = vmatpush.bf16.msrb.mxu3 %v6434_v5 }
 0x172   :  { %v1403_v63 = vpack.c.bf16 %v1396_v51, %v1395_v32  ;;  %v1507_v31 = vpack.c.bf16 %v1500_v62, %v1499_v15  ;;  %v1154_v53 = vadd.f32 %v1137_v41, %v1041_v13  ;;  %1670 = vmatpush.bf16.msrb.mxu1 %v6424_v48  ;;  %v6433_v51 = vld [vmem:[%s8353_s2 + $0x1e8] sm:$0xff] }
 0x173   :  { %5445 = vmatmul.msk.bf16.gmra.mxu2 %vm25_vm0, %v1204_v8  ;;  %v6437_v15 = vld [vmem:[%s8353_s2 + $0x208] sm:$0xff]  ;;  %v6432_v8 = vld [vmem:[%s8353_s2 + $0x1e0] sm:$0xff] }
 0x174   :  { %5474 = vmatmul.msk.bf16.gmra.mxu3 %vm25_vm0, %v1403_v63  ;;  %5503 = vmatmul.msk.bf16.gmra.mxu0 %vm25_vm0, %v1507_v31  ;;  %v1163_v0 = vmax.f32 %v1154_v53, 0.0  ;;  %v1705_v48 = vld [vmem:[#allocation3 + $0x9] sm:$0xff] }
 0x175   :  { %1989 = vmatpush.bf16.msra.mxu0 %v6438_v1  ;;  %1886 = vmatpush.bf16.msrb.mxu3 %v6433_v51  ;;  %v1714_v1 = vmul.f32 %v1705_v48, %v6706_v20  ;;  %v1923_v51 = vld [vmem:[#allocation3 + $0x12] sm:$0xff] }
 0x176   :  { %1181 = vst.msk [vmem:[#allocation3 + $0x30] sm:$0xff] %vm25_vm0, %v1163_v0 }
 0x177   :  { %v1189_v34 = vld [vmem:[#allocation3 + $0x25] sm:$0xff] }
 0x178   :  { %v1388_v36 = vld [vmem:[#allocation3 + $0x27] sm:$0xff]  ;;  %v1198_v39 = vmul.f32 %v1189_v34, %v6886_v25 }
 0x179   :  { %v1140_v12 = vpop.f32.mrf.mxu0  ;;  %v1221_v6 = vld [vmem:[#allocation3 + $0x26] sm:$0xff]  ;;  %v1397_v28 = vmul.f32 %v1388_v36, %v6873_v18  ;;  %v1501_v40 = vmul.f32 %v1388_v36, %v6886_v25  ;;  %1990 = vmatpush.bf16.msra.mxu0 %v6437_v15  ;;  %1887 = vmatpush.bf16.msrb.mxu3 %v6432_v8 }
 0x17a   :  { %v1155_v17 = vadd.f32 %v1140_v12, %v7146_v45  ;;  %v6436_v36 = vld [vmem:[%s8353_s2 + $0x200] sm:$0xff]  ;;  %v1604_v8 = vld [vmem:[#allocation3 + $0x20] sm:$0xff] }
 0x17c   :  { %v1164_v43 = vmax.f32 %v1155_v17, 0.0 }
 0x17d   :  { %v1222_v23 = vld [vmem:[#allocation3 + $0x2e] sm:$0xff]  ;;  %1991 = vmatpush.bf16.msra.mxu0 %v6436_v36 }
 0x17e   :  { %v1190_v47 = vld [vmem:[#allocation3 + $0x2d] sm:$0xff]  ;;  %1182 = vst.msk [vmem:[#allocation3 + $0x38] sm:$0xff] %vm25_vm0, %v1164_v43  ;;  %v1228_v38 = vpack.c.bf16 %v1222_v23, %v1221_v6  ;;  %v6447_v43 = vld [vmem:[%s8353_s2 + $0x258] sm:$0xff] }
 0x17f   :  { %v1389_v35 = vld [vmem:[#allocation3 + $0x2f] sm:$0xff]  ;;  %v1199_v45 = vmul.f32 %v1190_v47, %v6889_v26  ;;  %v6443_v6 = vld [vmem:[%s8353_s2 + $0x238] sm:$0xff]  ;;  %2205 = vmatpush.bf16.msra.mxu2 %v6447_v43 }
 0x180   :  { %v1398_v44 = vmul.f32 %v1389_v35, %v6876_v19  ;;  %v1502_v7 = vmul.f32 %v1389_v35, %v6889_v26  ;;  %5425 = vmatmul.msk.bf16.gmra.mxu1 %vm25_vm0, %v1228_v38  ;;  %v8380_v35 = vld [vmem:[#allocation14_spill] sm:$0xff]  ;;  %v1709_v43 = vld [vmem:[#allocation3 + $0x29] sm:$0xff] }
 0x181   :  { %v1205_v30 = vpack.c.bf16 %v1199_v45, %v1198_v39  ;;  %v1142_v11 = vpop.f32.mrf.mxu0  ;;  %2101 = vmatpush.bf16.msra.mxu1 %v6443_v6 }
 0x182   :  { %v1404_v10 = vpack.c.bf16 %v1398_v44, %v1397_v28  ;;  %v1508_v46 = vpack.c.bf16 %v1502_v7, %v1501_v40  ;;  %v1156_v14 = vadd.f32 %v1142_v11, %v1043_v54  ;;  %v8381_v40 = vld [vmem:[#allocation13_spill] sm:$0xff] }
 0x183   :  { %5446 = vmatmul.msk.bf16.gmra.mxu2 %vm25_vm0, %v1205_v30  ;;  %v1706_v11 = vld [vmem:[#allocation3 + $0x11] sm:$0xff] }
 0x184   :  { %5475 = vmatmul.msk.bf16.gmra.mxu3 %vm25_vm0, %v1404_v10  ;;  %5504 = vmatmul.msk.bf16.gmra.mxu0 %vm25_vm0, %v1508_v46  ;;  %v1165_v32 = vmax.f32 %v1156_v14, 0.0  ;;  %v6446_v10 = vld [vmem:[%s8353_s2 + $0x250] sm:$0xff]  ;;  %v1602_v14 = vld [vmem:[#allocation3 + $0x10] sm:$0xff]  ;;  %v1715_v22 = vmul.f32 %v1706_v11, %v6713_v21  ;;  %v1819_v4 = vmul.f32 %v1706_v11, %v6735_v27 }
 0x185   :  { %v1191_v16 = vld [vmem:[#allocation3 + $0x35] sm:$0xff]  ;;  %2206 = vmatpush.bf16.msra.mxu2 %v6446_v10 }
 0x186   :  { %1183 = vst.msk [vmem:[#allocation3 + $0x40] sm:$0xff] %vm25_vm0, %v1165_v32  ;;  %v1390_v29 = vld [vmem:[#allocation3 + $0x37] sm:$0xff]  ;;  %v1200_v31 = vmul.f32 %v1191_v16, %v6928_v58  ;;  %v1601_v32 = vld [vmem:[#allocation3 + $0x8] sm:$0xff] }
 0x187   :  { %v1223_v13 = vld [vmem:[#allocation3 + $0x36] sm:$0xff]  ;;  %v1503_v37 = vmul.f32 %v1390_v29, %v6928_v58  ;;  %v1610_v5 = vpack.c.bf16 %v1602_v14, %v1601_v32 }
 0x188   :  { %v6442_v46 = vld [vmem:[%s8353_s2 + $0x230] sm:$0xff] }
 0x189   :  { %v1145_v52 = vpop.f32.mrf.mxu0  ;;  %2102 = vmatpush.bf16.msra.mxu1 %v6442_v46  ;;  %v1710_v36 = vld [vmem:[#allocation3 + $0x31] sm:$0xff]  ;;  %v6440_v46 = vld [vmem:[%s8353_s2 + $0x220] sm:$0xff] }
 0x18a   :  { %v1157_v56 = vadd.f32 %v1145_v52, %v7178_v9  ;;  %v1399_v9 = vmul.f32 %v1390_v29, %v6907_v49  ;;  %v1818_v52 = vmul.f32 %v1705_v48, %v6724_v24  ;;  %v1922_v29 = vld [vmem:[#allocation3 + $0xa] sm:$0xff]  ;;  %v1719_v6 = vmul.f32 %v1710_v36, %v6876_v19 }
 0x18b   :  { %v1931_v15 = vpack.c.bf16 %v1923_v51, %v1922_v29 }
 0x18c   :  { %v1166_v62 = vmax.f32 %v1157_v56, 0.0  ;;  %v1723_v56 = vpack.c.bf16 %v1715_v22, %v1714_v1  ;;  %v1827_v16 = vpack.c.bf16 %v1819_v4, %v1818_v52 }
 0x18d   :  { %v1224_v63 = vld [vmem:[#allocation3 + $0x3e] sm:$0xff] }
 0x18e   :  { %v1192_v41 = vld [vmem:[#allocation3 + $0x3d] sm:$0xff]  ;;  %1184 = vst.msk [vmem:[#allocation3 + $0x48] sm:$0xff] %vm25_vm0, %v1166_v62  ;;  %v1229_v3 = vpack.c.bf16 %v1224_v63, %v1223_v13  ;;  %v6445_v62 = vld [vmem:[%s8353_s2 + $0x248] sm:$0xff] }
 0x18f   :  { %v1391_v53 = vld [vmem:[#allocation3 + $0x3f] sm:$0xff]  ;;  %v1201_v0 = vmul.f32 %v1192_v41, %v6931_v59  ;;  %2207 = vmatpush.bf16.msra.mxu2 %v6445_v62 }
 0x190   :  { %v1400_v2 = vmul.f32 %v1391_v53, %v6910_v50  ;;  %v1504_v12 = vmul.f32 %v1391_v53, %v6931_v59  ;;  %5426 = vmatmul.msk.bf16.gmra.mxu1 %vm25_vm0, %v1229_v3  ;;  %v1708_v13 = vld [vmem:[#allocation3 + $0x21] sm:$0xff]  ;;  %v1707_v63 = vld [vmem:[#allocation3 + $0x19] sm:$0xff] }
 0x191   :  { %v1206_v33 = vpack.c.bf16 %v1201_v0, %v1200_v31  ;;  %v1147_v42 = vpop.f32.mrf.mxu0  ;;  %v1717_v41 = vmul.f32 %v1708_v13, %v6849_v57  ;;  %v1821_v31 = vmul.f32 %v1708_v13, %v6860_v61  ;;  %v1603_v53 = vld [vmem:[#allocation3 + $0x18] sm:$0xff]  ;;  %v1716_v3 = vmul.f32 %v1707_v63, %v6843_v55  ;;  %v1608_v14 = vld [vmem:[#allocation3 + $0x40] sm:$0xff] }
 0x192   :  { %v1405_v17 = vpack.c.bf16 %v1400_v2, %v1399_v9  ;;  %v1509_v34 = vpack.c.bf16 %v1504_v12, %v1503_v37  ;;  %v6441_v9 = vld [vmem:[%s8353_s2 + $0x228] sm:$0xff]  ;;  %v1611_v37 = vpack.c.bf16 %v1604_v8, %v1603_v53  ;;  %v1820_v0 = vmul.f32 %v1707_v63, %v6856_v60  ;;  %v1925_v2 = vld [vmem:[#allocation3 + $0x22] sm:$0xff]  ;;  %v1711_v48 = vld [vmem:[#allocation3 + $0x39] sm:$0xff] }
 0x193   :  { %5447 = vmatmul.msk.bf16.gmra.mxu2 %vm25_vm0, %v1206_v33  ;;  %2103 = vmatpush.bf16.msra.mxu1 %v6441_v9  ;;  %v1724_v12 = vpack.c.bf16 %v1717_v41, %v1716_v3  ;;  %v1606_v42 = vld [vmem:[#allocation3 + $0x30] sm:$0xff]  ;;  %v1720_v52 = vmul.f32 %v1711_v48, %v6907_v49  ;;  %v1824_v51 = vmul.f32 %v1711_v48, %v6928_v58  ;;  %v1928_v62 = vld [vmem:[#allocation3 + $0x3a] sm:$0xff] }
 0x194   :  { %5476 = vmatmul.msk.bf16.gmra.mxu3 %vm25_vm0, %v1405_v17  ;;  %5505 = vmatmul.msk.bf16.gmra.mxu0 %vm25_vm0, %v1509_v34  ;;  %v1828_v33 = vpack.c.bf16 %v1821_v31, %v1820_v0  ;;  %v1924_v17 = vld [vmem:[#allocation3 + $0x1a] sm:$0xff] }
 0x195   :  { %v1193_v23 = vld [vmem:[#allocation3 + $0x45] sm:$0xff]  ;;  %v1932_v34 = vpack.c.bf16 %v1925_v2, %v1924_v17  ;;  %v2140_v48 = vld [vmem:[#allocation2 + $0x10] sm:$0xff] }
 0x196   :  { %v1392_v47 = vld [vmem:[#allocation3 + $0x47] sm:$0xff]  ;;  %v1202_v28 = vmul.f32 %v1193_v23, %v8380_v35  ;;  %v1823_v23 = vmul.f32 %v1710_v36, %v6889_v26 }
 0x197   :  { %v1225_v39 = vld [vmem:[#allocation3 + $0x46] sm:$0xff]  ;;  %v1401_v38 = vmul.f32 %v1392_v47, %v8381_v40  ;;  %v1505_v45 = vmul.f32 %v1392_v47, %v8380_v35  ;;  %2104 = vmatpush.bf16.msra.mxu1 %v6440_v46 }
 0x198   :  { %v1230_v44 = vpack.c.bf16 %v1225_v39, %v1225_v39  ;;  %v1207_v7 = vpack.c.bf16 %v1202_v28, %v1202_v28  ;;  %v1605_v47 = vld [vmem:[#allocation3 + $0x28] sm:$0xff]  ;;  %v1718_v28 = vmul.f32 %v1709_v43, %v6873_v18 }
 0x199   :  { %v1406_v54 = vpack.c.bf16 %v1401_v38, %v1401_v38  ;;  %v1510_v30 = vpack.c.bf16 %v1505_v45, %v1505_v45  ;;  %v1612_v39 = vpack.c.bf16 %v1606_v42, %v1605_v47  ;;  %v1822_v38 = vmul.f32 %v1709_v43, %v6886_v25  ;;  %v1927_v45 = vld [vmem:[#allocation3 + $0x32] sm:$0xff]  ;;  %v1712_v11 = vld [vmem:[#allocation3 + $0x41] sm:$0xff]  ;;  %v1930_v43 = vld [vmem:[#allocation3 + $0x4a] sm:$0xff] }
 0x19a   :  { %v1721_v22 = vmul.f32 %v1712_v11, %v6910_v50  ;;  %v1825_v4 = vmul.f32 %v1712_v11, %v6931_v59  ;;  %v1609_v0 = vld [vmem:[#allocation3 + $0x48] sm:$0xff] }
 0x19b   :  { %v1614_v42 = vpack.c.bf16 %v1609_v0, %v1609_v0  ;;  %v2142_v0 = vld [vmem:[#allocation2 + $0x20] sm:$0xff] }
 0x19c   :  { %v1726_v29 = vpack.c.bf16 %v1721_v22, %v1720_v52 }
 0x1a0   :  { %5427 = vmatmul.msk.bf16.gmra.mxu1 %vm25_vm0, %v1230_v44  ;;  %v1725_v44 = vpack.c.bf16 %v1719_v6, %v1718_v28 }
 0x1a3   :  { %5448 = vmatmul.msk.bf16.gmra.mxu2 %vm25_vm0, %v1207_v7  ;;  %v1829_v7 = vpack.c.bf16 %v1823_v23, %v1822_v38 }
 0x1a4   :  { %5477 = vmatmul.msk.bf16.gmra.mxu3 %vm25_vm0, %v1406_v54  ;;  %5506 = vmatmul.msk.bf16.gmra.mxu0 %vm25_vm0, %v1510_v30  ;;  %v1926_v54 = vld [vmem:[#allocation3 + $0x2a] sm:$0xff] }
 0x1a5   :  { %v6444_v30 = vld [vmem:[%s8353_s2 + $0x240] sm:$0xff]  ;;  %v1933_v10 = vpack.c.bf16 %v1927_v45, %v1926_v54 }
 0x1a6   :  { %2208 = vmatpush.bf16.msra.mxu2 %v6444_v30 }
 0x1b0   :  { %5531 = vmatmul.msk.bf16.vlgmr.msrb.gmra.mxu1 %vm25_vm0, %v1610_v5  ;;  %v1607_v5 = vld [vmem:[#allocation3 + $0x38] sm:$0xff] }
 0x1b1   :  { %v1613_v1 = vpack.c.bf16 %v1608_v14, %v1607_v5  ;;  %v2139_v14 = vld [vmem:[#allocation2 + $0x8] sm:$0xff] }
 0x1b3   :  { %5560 = vmatmul.msk.bf16.vlgmr.msrb.gmra.mxu2 %vm25_vm0, %v1723_v56  ;;  %v1929_v56 = vld [vmem:[#allocation3 + $0x42] sm:$0xff] }
 0x1b4   :  { %5589 = vmatmul.msk.bf16.vlgmr.msrb.gmra.mxu3 %vm25_vm0, %v1827_v16  ;;  %5618 = vmatmul.msk.bf16.vlgmr.msra.gmra.mxu0 %vm25_vm0, %v1931_v15  ;;  %v1830_v15 = vpack.c.bf16 %v1825_v4, %v1824_v51  ;;  %v1934_v13 = vpack.c.bf16 %v1929_v56, %v1928_v62  ;;  %v2148_v51 = vpack.c.bf16 %v2140_v48, %v2139_v14  ;;  %v2143_v14 = vld [vmem:[#allocation2 + $0x28] sm:$0xff]  ;;  %v2144_v48 = vld [vmem:[#allocation2 + $0x30] sm:$0xff] }
 0x1c0   :  { %5532 = vmatmul.msk.bf16.gmra.mxu1 %vm25_vm0, %v1611_v37  ;;  %v1713_v37 = vld [vmem:[#allocation3 + $0x49] sm:$0xff] }
 0x1c1   :  { %v1722_v2 = vmul.f32 %v1713_v37, %v8381_v40 }
 0x1c3   :  { %5561 = vmatmul.msk.bf16.gmra.mxu2 %vm25_vm0, %v1724_v12  ;;  %v1826_v12 = vmul.f32 %v1713_v37, %v8380_v35  ;;  %v1727_v23 = vpack.c.bf16 %v1722_v2, %v1722_v2  ;;  %v2141_v37 = vld [vmem:[#allocation2 + $0x18] sm:$0xff] }
 0x1c4   :  { %5590 = vmatmul.msk.bf16.gmra.mxu3 %vm25_vm0, %v1828_v33  ;;  %5619 = vmatmul.msk.bf16.gmra.mxu0 %vm25_vm0, %v1932_v34 }
 0x1c5   :  { %v1831_v47 = vpack.c.bf16 %v1826_v12, %v1826_v12 }
 0x1d0   :  { %5533 = vmatmul.msk.bf16.gmra.mxu1 %vm25_vm0, %v1612_v39  ;;  %v1935_v39 = vpack.c.bf16 %v1930_v43, %v1930_v43 }
 0x1d3   :  { %5562 = vmatmul.msk.bf16.gmra.mxu2 %vm25_vm0, %v1725_v44 }
 0x1d4   :  { %5591 = vmatmul.msk.bf16.gmra.mxu3 %vm25_vm0, %v1829_v7  ;;  %5620 = vmatmul.msk.bf16.gmra.mxu0 %vm25_vm0, %v1933_v10  ;;  %v2027_v7 = vld [vmem:[#allocation3 + $0x13] sm:$0xff]  ;;  %v2026_v10 = vld [vmem:[#allocation3 + $0xb] sm:$0xff] }
 0x1d5   :  { %v2036_v46 = vmul.f32 %v2027_v7, %v6713_v21  ;;  %v2035_v22 = vmul.f32 %v2026_v10, %v6706_v20 }
 0x1d7   :  { %v2044_v52 = vpack.c.bf16 %v2036_v46, %v2035_v22 }
 0x1dd   :  { %v1288_v32 = vpop.f32.mrf.mxu1 }
 0x1e0   :  { %5534 = vmatmul.msk.bf16.gmra.mxu1 %vm25_vm0, %v1613_v1 }
 0x1e1   :  { %v1568_v16 = vpop.f32.mrf.mxu0 }
 0x1e3   :  { %5563 = vmatmul.msk.bf16.gmra.mxu2 %vm25_vm0, %v1726_v29 }
 0x1e4   :  { %5592 = vmatmul.msk.bf16.gmra.mxu3 %vm25_vm0, %v1830_v15  ;;  %5621 = vmatmul.msk.bf16.gmra.mxu0 %vm25_vm0, %v1934_v13  ;;  %v2029_v13 = vld [vmem:[#allocation3 + $0x23] sm:$0xff] }
 0x1e5   :  { %v1290_v8 = vpop.f32.mrf.mxu1 }
 0x1e6   :  { %v1360_v63 = vpop.f32.mrf.mxu2 }
 0x1e7   :  { %v1361_v41 = vadd.f32 %v1360_v63, %v1288_v32  ;;  %v1464_v31 = vpop.f32.mrf.mxu3 }
 0x1e9   :  { %v1488_v53 = vadd.f32 %v1464_v31, %v1361_v41  ;;  %v7373_v9 = vpop.f32.mrf.mxu0  ;;  %v2028_v41 = vld [vmem:[#allocation3 + $0x1b] sm:$0xff]  ;;  %v2038_v31 = vmul.f32 %v2029_v13, %v6849_v57 }
 0x1ea   :  { %v2037_v2 = vmul.f32 %v2028_v41, %v6843_v55 }
 0x1eb   :  { %v7375_v3 = vadd.f32 %v1568_v16, %v1488_v53 }
 0x1ec   :  { %v2045_v43 = vpack.c.bf16 %v2038_v31, %v2037_v2 }
 0x1ed   :  { %v1293_v33 = vpop.f32.mrf.mxu1 }
 0x1ee   :  { %v1362_v17 = vpop.f32.mrf.mxu2 }
 0x1ef   :  { %v7379_v34 = vadd.f32 %v1362_v17, %v1290_v8  ;;  %v7381_v36 = vpop.f32.mrf.mxu3 }
 0x1f0   :  { %5535 = vmatmul.msk.bf16.gmra.mxu1 %vm25_vm0, %v1614_v42 }
 0x1f1   :  { %v1573_v6 = vpop.f32.mrf.mxu0 }
 0x1f3   :  { %5564 = vmatmul.msk.bf16.gmra.mxu2 %vm25_vm0, %v1727_v23 }
 0x1f4   :  { %5593 = vmatmul.msk.bf16.gmra.mxu3 %vm25_vm0, %v1831_v47  ;;  %5622 = vmatmul.msk.bf16.gmra.mxu0 %vm25_vm0, %v1935_v39 }
 0x1f5   :  { %v1295_v28 = vpop.f32.mrf.mxu1 }
 0x1f6   :  { %v1365_v38 = vpop.f32.mrf.mxu2 }
 0x1f7   :  { %v1366_v45 = vadd.f32 %v1365_v38, %v1293_v33  ;;  %v1469_v44 = vpop.f32.mrf.mxu3 }
 0x1f9   :  { %v1490_v54 = vadd.f32 %v1469_v44, %v1366_v45  ;;  %v7387_v30 = vpop.f32.mrf.mxu0  ;;  %v2031_v45 = vld [vmem:[#allocation3 + $0x33] sm:$0xff] }
 0x1fa   :  { %v2040_v10 = vmul.f32 %v2031_v45, %v6876_v19 }
 0x1fb   :  { %v7390_v11 = vadd.f32 %v1573_v6, %v1490_v54  ;;  %v2149_v6 = vpack.c.bf16 %v2142_v0, %v2141_v37  ;;  %v2030_v54 = vld [vmem:[#allocation3 + $0x2b] sm:$0xff]  ;;  %v6455_v37 = vld [vmem:[%s8354_s3 + $0x38] sm:$0xff] }
 0x1fc   :  { %v2039_v22 = vmul.f32 %v2030_v54, %v6873_v18  ;;  %v2032_v0 = vld [vmem:[#allocation3 + $0x3b] sm:$0xff]  ;;  %2367 = vmatpush.bf16.msra.mxu3 %v6455_v37 }
 0x1fd   :  { %v1298_v4 = vpop.f32.mrf.mxu1 }
 0x1fe   :  { %v1367_v32 = vpop.f32.mrf.mxu2 }
 0x1ff   :  { %v7393_v5 = vadd.f32 %v1367_v32, %v1295_v28  ;;  %v7395_v1 = vpop.f32.mrf.mxu3 }
 0x200   :  { %5647 = vmatmul.msk.bf16.vlgmr.msra.gmra.mxu1 %vm25_vm0, %v2044_v52 }
 0x201   :  { %v1578_v56 = vpop.f32.mrf.mxu0 }
 0x203   :  { %5676 = vmatmul.msk.bf16.vlgmr.msra.gmra.mxu2 %vm25_vm0, %v2148_v51  ;;  %v2046_v51 = vpack.c.bf16 %v2040_v10, %v2039_v22 }
 0x205   :  { %v1300_v16 = vpop.f32.mrf.mxu1 }
 0x206   :  { %v1370_v29 = vpop.f32.mrf.mxu2 }
 0x207   :  { %v1371_v15 = vadd.f32 %v1370_v29, %v1298_v4  ;;  %v1474_v62 = vpop.f32.mrf.mxu3 }
 0x209   :  { %v1492_v8 = vadd.f32 %v1474_v62, %v1371_v15  ;;  %v7399_v63 = vpop.f32.mrf.mxu0 }
 0x20b   :  { %v7402_v53 = vadd.f32 %v1578_v56, %v1492_v8  ;;  %v2150_v56 = vpack.c.bf16 %v2144_v48, %v2143_v14  ;;  %v2033_v8 = vld [vmem:[#allocation3 + $0x43] sm:$0xff] }
 0x20c   :  { %v2042_v2 = vmul.f32 %v2033_v8, %v6910_v50 }
 0x20d   :  { %v1303_v12 = vpop.f32.mrf.mxu1 }
 0x20e   :  { %v1372_v33 = vpop.f32.mrf.mxu2 }
 0x20f   :  { %v7405_v17 = vadd.f32 %v1372_v33, %v1300_v16  ;;  %v7407_v42 = vpop.f32.mrf.mxu3  ;;  %v2145_v33 = vld [vmem:[#allocation2 + $0x38] sm:$0xff] }
 0x210   :  { %5648 = vmatmul.msk.bf16.gmra.mxu1 %vm25_vm0, %v2045_v43  ;;  %v2146_v43 = vld [vmem:[#allocation2 + $0x40] sm:$0xff] }
 0x211   :  { %v1583_v23 = vpop.f32.mrf.mxu0 }
 0x213   :  { %5677 = vmatmul.msk.bf16.gmra.mxu2 %vm25_vm0, %v2149_v6  ;;  %v2041_v6 = vmul.f32 %v2032_v0, %v6907_v49  ;;  %v6454_v0 = vld [vmem:[%s8354_s3 + $0x30] sm:$0xff] }
 0x214   :  { %2368 = vmatpush.bf16.msra.mxu3 %v6454_v0 }
 0x215   :  { %v7411_v47 = vpop.f32.mrf.mxu1  ;;  %v2047_v45 = vpack.c.bf16 %v2042_v2, %v2041_v6 }
 0x216   :  { %v1375_v39 = vpop.f32.mrf.mxu2 }
 0x217   :  { %v1376_v28 = vadd.f32 %v1375_v39, %v1303_v12  ;;  %v1479_v38 = vpop.f32.mrf.mxu3 }
 0x219   :  { %v1494_v44 = vadd.f32 %v1479_v38, %v1376_v28  ;;  %v7413_v7 = vpop.f32.mrf.mxu0 }
 0x21b   :  { %v7416_v46 = vadd.f32 %v1583_v23, %v1494_v44  ;;  %v2151_v44 = vpack.c.bf16 %v2146_v43, %v2145_v33 }
 0x21d   :  { %v1308_v4 = vpop.f32.mrf.mxu1 }
 0x21e   :  { %v7419_v32 = vpop.f32.mrf.mxu2 }
 0x21f   :  { %v7421_v52 = vpop.f32.mrf.mxu3 }
 0x220   :  { %5649 = vmatmul.msk.bf16.gmra.mxu1 %vm25_vm0, %v2046_v51 }
 0x221   :  { %v1588_v16 = vpop.f32.mrf.mxu0 }
 0x223   :  { %5678 = vmatmul.msk.bf16.gmra.mxu2 %vm25_vm0, %v2150_v56 }
 0x225   :  { %v1310_v29 = vpop.f32.mrf.mxu1 }
 0x226   :  { %v1380_v15 = vpop.f32.mrf.mxu2 }
 0x227   :  { %v1381_v62 = vadd.f32 %v1380_v15, %v1308_v4  ;;  %v1484_v13 = vpop.f32.mrf.mxu3  ;;  %v2034_v4 = vld [vmem:[#allocation3 + $0x4b] sm:$0xff] }
 0x229   :  { %v1496_v41 = vadd.f32 %v1484_v13, %v1381_v62  ;;  %v1590_v31 = vpop.f32.mrf.mxu0 }
 0x22b   :  { %v7429_v12 = vadd.f32 %v1588_v16, %v1496_v41  ;;  %v2043_v16 = vmul.f32 %v2034_v4, %v8381_v40 }
 0x22d   :  { %v1672_v39 = vpop.f32.mrf.mxu1  ;;  %v2048_v41 = vpack.c.bf16 %v2043_v16, %v2043_v16 }
 0x22e   :  { %v1382_v23 = vpop.f32.mrf.mxu2  ;;  %v1696_v38 = vadd.f32 %v1672_v39, %v7375_v3  ;;  %v2147_v3 = vld [vmem:[#allocation2 + $0x48] sm:$0xff] }
 0x22f   :  { %v1486_v28 = vpop.f32.mrf.mxu3  ;;  %v2152_v31 = vpack.c.bf16 %v2147_v3, %v2147_v3 }
 0x230   :  { %5650 = vmatmul.msk.bf16.gmra.mxu1 %vm25_vm0, %v2047_v45 }
 0x231   :  { %v1993_v54 = vpop.f32.mrf.mxu0 }
 0x233   :  { %5679 = vmatmul.msk.bf16.gmra.mxu2 %vm25_vm0, %v2151_v44 }
 0x235   :  { %v7435_v10 = vpop.f32.mrf.mxu1 }
 0x236   :  { %v1785_v14 = vpop.f32.mrf.mxu2 }
 0x237   :  { %v1809_v48 = vadd.f32 %v1785_v14, %v1696_v38  ;;  %v1889_v22 = vpop.f32.mrf.mxu3  ;;  %v6453_v14 = vld [vmem:[%s8354_s3 + $0x28] sm:$0xff] }
 0x238   :  { %2369 = vmatpush.bf16.msra.mxu3 %v6453_v14 }
 0x239   :  { %v1913_v51 = vadd.f32 %v1889_v22, %v1809_v48  ;;  %v7437_v56 = vpop.f32.mrf.mxu0 }
 0x23b   :  { %v7440_v29 = vadd.f32 %v1993_v54, %v1913_v51 }
 0x23d   :  { %v1677_v15 = vpop.f32.mrf.mxu1 }
 0x23e   :  { %v7442_v62 = vpop.f32.mrf.mxu2  ;;  %v1698_v13 = vadd.f32 %v1677_v15, %v7390_v11 }
 0x23f   :  { %v7445_v8 = vpop.f32.mrf.mxu3 }
 0x240   :  { %5651 = vmatmul.msk.bf16.gmra.mxu1 %vm25_vm0, %v2048_v41 }
 0x241   :  { %v1998_v37 = vpop.f32.mrf.mxu0 }
 0x243   :  { %5680 = vmatmul.msk.bf16.gmra.mxu2 %vm25_vm0, %v2152_v31 }
 0x245   :  { %v7452_v2 = vpop.f32.mrf.mxu1 }
 0x246   :  { %v1790_v33 = vpop.f32.mrf.mxu2 }
 0x247   :  { %v1811_v43 = vadd.f32 %v1790_v33, %v1698_v13  ;;  %v1894_v6 = vpop.f32.mrf.mxu3 }
 0x249   :  { %v1915_v11 = vadd.f32 %v1894_v6, %v1811_v43  ;;  %v7454_v23 = vpop.f32.mrf.mxu0 }
 0x24b   :  { %v7456_v39 = vadd.f32 %v1998_v37, %v1915_v11 }
 0x24d   :  { %v1682_v28 = vpop.f32.mrf.mxu1 }
 0x24e   :  { %v7458_v38 = vpop.f32.mrf.mxu2  ;;  %v1700_v45 = vadd.f32 %v1682_v28, %v7402_v53 }
 0x24f   :  { %v7461_v44 = vpop.f32.mrf.mxu3 }
 0x251   :  { %v2003_v54 = vpop.f32.mrf.mxu0 }
 0x255   :  { %v7466_v48 = vpop.f32.mrf.mxu1 }
 0x256   :  { %v1795_v22 = vpop.f32.mrf.mxu2 }
 0x257   :  { %v1813_v4 = vadd.f32 %v1795_v22, %v1700_v45  ;;  %v1899_v51 = vpop.f32.mrf.mxu3  ;;  %v6452_v45 = vld [vmem:[%s8354_s3 + $0x20] sm:$0xff] }
 0x258   :  { %2370 = vmatpush.bf16.msra.mxu3 %v6452_v45 }
 0x259   :  { %v1917_v16 = vadd.f32 %v1899_v51, %v1813_v4  ;;  %v7468_v3 = vpop.f32.mrf.mxu0 }
 0x25b   :  { %v7470_v15 = vadd.f32 %v2003_v54, %v1917_v16  ;;  %v6451_v16 = vld [vmem:[%s8354_s3 + $0x18] sm:$0xff] }
 0x25c   :  { %2439 = vmatpush.bf16.msrb.mxu0 %v6451_v16 }
 0x25d   :  { %v1687_v13 = vpop.f32.mrf.mxu1 }
 0x25e   :  { %v7472_v53 = vpop.f32.mrf.mxu2  ;;  %v1702_v41 = vadd.f32 %v1687_v13, %v7416_v46  ;;  %v6459_v13 = vld [vmem:[%s8354_s3 + $0x58] sm:$0xff] }
 0x25f   :  { %v7475_v31 = vpop.f32.mrf.mxu3  ;;  %2543 = vmatpush.bf16.msrb.mxu1 %v6459_v13  ;;  %v6449_v13 = vld [vmem:[%s8354_s3 + $0x8] sm:$0xff] }
 0x261   :  { %v2008_v37 = vpop.f32.mrf.mxu0 }
 0x265   :  { %v7477_v0 = vpop.f32.mrf.mxu1 }
 0x266   :  { %v1800_v33 = vpop.f32.mrf.mxu2 }
 0x267   :  { %v1815_v43 = vadd.f32 %v1800_v33, %v1702_v41  ;;  %v1904_v6 = vpop.f32.mrf.mxu3  ;;  %v6463_v41 = vld [vmem:[%s8354_s3 + $0x78] sm:$0xff]  ;;  %v6462_v33 = vld [vmem:[%s8354_s3 + $0x70] sm:$0xff] }
 0x268   :  { %2647 = vmatpush.bf16.msrb.mxu2 %v6463_v41  ;;  %v6457_v41 = vld [vmem:[%s8354_s3 + $0x48] sm:$0xff] }
 0x269   :  { %v1919_v11 = vadd.f32 %v1904_v6, %v1815_v43  ;;  %v7479_v28 = vpop.f32.mrf.mxu0 }
 0x26b   :  { %v7484_v54 = vadd.f32 %v2008_v37, %v1919_v11  ;;  %v6458_v37 = vld [vmem:[%s8354_s3 + $0x50] sm:$0xff] }
 0x26c   :  { %2544 = vmatpush.bf16.msrb.mxu1 %v6458_v37  ;;  %2648 = vmatpush.bf16.msrb.mxu2 %v6462_v33  ;;  %v6448_v37 = vld [vmem:[%s8354_s3] sm:$0xff] }
 0x26d   :  { %v1692_v14 = vpop.f32.mrf.mxu1  ;;  %v6456_v33 = vld [vmem:[%s8354_s3 + $0x40] sm:$0xff] }
 0x26e   :  { %v7486_v46 = vpop.f32.mrf.mxu2  ;;  %v1704_v22 = vadd.f32 %v1692_v14, %v7429_v12  ;;  %v6450_v12 = vld [vmem:[%s8354_s3 + $0x10] sm:$0xff] }
 0x26f   :  { %v7489_v4 = vpop.f32.mrf.mxu3  ;;  %2440 = vmatpush.bf16.msrb.mxu0 %v6450_v12 }
 0x270   :  { %2545 = vmatpush.bf16.msrb.mxu1 %v6457_v41 }
 0x271   :  { %v2013_v51 = vpop.f32.mrf.mxu0 }
 0x273   :  { %2441 = vmatpush.bf16.msrb.mxu0 %v6449_v13 }
 0x274   :  { %2546 = vmatpush.bf16.msrb.mxu1 %v6456_v33 }
 0x275   :  { %v1694_v43 = vpop.f32.mrf.mxu1 }
 0x276   :  { %v1805_v6 = vpop.f32.mrf.mxu2  ;;  %v6461_v43 = vld [vmem:[%s8354_s3 + $0x68] sm:$0xff] }
 0x277   :  { %v1817_v11 = vadd.f32 %v1805_v6, %v1704_v22  ;;  %v1909_v45 = vpop.f32.mrf.mxu3  ;;  %v1489_v22 = vadd.f32 %v7381_v36, %v7379_v34  ;;  %2649 = vmatpush.bf16.msrb.mxu2 %v6461_v43  ;;  %v6460_v6 = vld [vmem:[%s8354_s3 + $0x60] sm:$0xff]  ;;  %v6467_v34 = vld [vmem:[%s8354_s3 + $0x98] sm:$0xff]  ;;  %2442 = vmatpush.bf16.msrb.mxu0 %v6448_v37 }
 0x278   :  { %2751 = vmatpush.bf16.msrb.mxu3 %v6467_v34 }
 0x279   :  { %v1921_v14 = vadd.f32 %v1909_v45, %v1817_v11  ;;  %v2015_v16 = vpop.f32.mrf.mxu0  ;;  %v1593_v11 = vadd.f32 %v7373_v9, %v1489_v22  ;;  %v1491_v9 = vadd.f32 %v7395_v1, %v7393_v5 }
 0x27b   :  { %v7520_v12 = vadd.f32 %v2013_v51, %v1921_v14  ;;  %v1697_v14 = vadd.f32 %v7435_v10, %v1593_v11  ;;  %2650 = vmatpush.bf16.msrb.mxu2 %v6460_v6  ;;  %v1595_v10 = vadd.f32 %v7387_v30, %v1491_v9 }
 0x27d   :  { %v2106_v51 = vpop.f32.mrf.mxu1  ;;  %v1810_v16 = vadd.f32 %v7442_v62, %v1697_v14 }
 0x27e   :  { %v1807_v36 = vpop.f32.mrf.mxu2  ;;  %v2130_v13 = vadd.f32 %v2106_v51, %v7440_v29  ;;  %v1699_v29 = vadd.f32 %v7452_v2, %v1595_v10  ;;  %v1493_v2 = vadd.f32 %v7407_v42, %v7405_v17 }
 0x27f   :  { %v1911_v45 = vpop.f32.mrf.mxu3  ;;  %v1914_v40 = vadd.f32 %v7445_v8, %v1810_v16 }
 0x280   :  { %v1812_v8 = vadd.f32 %v7458_v38, %v1699_v29 }
 0x281   :  { %v2018_v22 = vadd.f32 %v7437_v56, %v1914_v40 }
 0x282   :  { %v1916_v5 = vadd.f32 %v7461_v44, %v1812_v8 }
 0x284   :  { %v2020_v14 = vadd.f32 %v7454_v23, %v1916_v5  ;;  %v1378_v5 = vadd.f32 %v7419_v32, %v7411_v47 }
 0x285   :  { %v2108_v41 = vpop.f32.mrf.mxu1 }
 0x286   :  { %v2210_v43 = vpop.f32.mrf.mxu2  ;;  %v2131_v37 = vadd.f32 %v2108_v41, %v2018_v22 }
 0x287   :  { %v2234_v35 = vadd.f32 %v2210_v43, %v2130_v13 }
 0x289   :  { %v2243_v36 = vmax.f32 %v2234_v35, 0.0  ;;  %v6466_v35 = vld [vmem:[%s8354_s3 + $0x90] sm:$0xff] }
 0x28a   :  { %2752 = vmatpush.bf16.msrb.mxu3 %v6466_v35 }
 0x28b   :  { %2261 = vst.msk [vmem:[#allocation4 + $0x8] sm:$0xff] %vm25_vm0, %v2243_v36 }
 0x28d   :  { %v2111_v33 = vpop.f32.mrf.mxu1 }
 0x28e   :  { %v2212_v62 = vpop.f32.mrf.mxu2  ;;  %v2132_v40 = vadd.f32 %v2111_v33, %v7456_v39  ;;  %v1597_v33 = vadd.f32 %v7399_v63, %v1493_v2  ;;  %v6465_v63 = vld [vmem:[%s8354_s3 + $0x88] sm:$0xff] }
 0x28f   :  { %v2235_v6 = vadd.f32 %v2212_v62, %v2131_v37  ;;  %2753 = vmatpush.bf16.msrb.mxu3 %v6465_v63 }
 0x291   :  { %v2244_v34 = vmax.f32 %v2235_v6, 0.0 }
 0x292   :  { %v2270_v51 = vld [vmem:[#allocation4 + $0x5] sm:$0xff] }
 0x293   :  { %2262 = vst.msk [vmem:[#allocation4 + $0x10] sm:$0xff] %vm25_vm0, %v2244_v34  ;;  %v2468_v11 = vld [vmem:[#allocation4 + $0x7] sm:$0xff]  ;;  %v2279_v41 = vmul.f32 %v2270_v51, %v6724_v24  ;;  %v1701_v34 = vadd.f32 %v7466_v48, %v1597_v33 }
 0x294   :  { %v2301_v45 = vld [vmem:[#allocation4 + $0x6] sm:$0xff]  ;;  %v2477_v43 = vmul.f32 %v2468_v11, %v6706_v20  ;;  %v2581_v44 = vmul.f32 %v2468_v11, %v6724_v24 }
 0x295   :  { %v2113_v30 = vpop.f32.mrf.mxu1  ;;  %v1814_v35 = vadd.f32 %v7472_v53, %v1701_v34 }
 0x296   :  { %v2215_v1 = vpop.f32.mrf.mxu2  ;;  %v2133_v22 = vadd.f32 %v2113_v30, %v2020_v14 }
 0x297   :  { %v2236_v56 = vadd.f32 %v2215_v1, %v2132_v40  ;;  %v1918_v30 = vadd.f32 %v7475_v31, %v1814_v35 }
 0x299   :  { %v2245_v38 = vmax.f32 %v2236_v56, 0.0 }
 0x29a   :  { %v2302_v16 = vld [vmem:[#allocation4 + $0xe] sm:$0xff] }
 0x29b   :  { %v2271_v13 = vld [vmem:[#allocation4 + $0xd] sm:$0xff]  ;;  %2263 = vst.msk [vmem:[#allocation4 + $0x18] sm:$0xff] %vm25_vm0, %v2245_v38  ;;  %v2310_v36 = vpack.c.bf16 %v2302_v16, %v2301_v45  ;;  %v1495_v38 = vadd.f32 %v7421_v52, %v1378_v5  ;;  %v2022_v45 = vadd.f32 %v7468_v3, %v1918_v30 }
 0x29c   :  { %v2469_v39 = vld [vmem:[#allocation4 + $0xf] sm:$0xff]  ;;  %v2280_v9 = vmul.f32 %v2271_v13, %v6735_v27 }
 0x29d   :  { %v2478_v17 = vmul.f32 %v2469_v39, %v6713_v21  ;;  %v2582_v42 = vmul.f32 %v2469_v39, %v6735_v27  ;;  %5705 = vmatmul.msk.bf16.vlgmr.msra.gmra.mxu3 %vm25_vm0, %v2310_v36  ;;  %v2116_v62 = vpop.f32.mrf.mxu1 }
 0x29e   :  { %v2288_v23 = vpack.c.bf16 %v2280_v9, %v2279_v41  ;;  %v2217_v6 = vpop.f32.mrf.mxu2  ;;  %v2134_v40 = vadd.f32 %v2116_v62, %v7470_v15  ;;  %v1599_v9 = vadd.f32 %v7413_v7, %v1495_v38 }
 0x29f   :  { %v2486_v37 = vpack.c.bf16 %v2478_v17, %v2477_v43  ;;  %v2590_v10 = vpack.c.bf16 %v2582_v42, %v2581_v44  ;;  %v2237_v29 = vadd.f32 %v2217_v6, %v2133_v22 }
 0x2a0   :  { %5726 = vmatmul.msk.bf16.vlgmr.msrb.gmra.mxu0 %vm25_vm0, %v2288_v23 }
 0x2a1   :  { %5755 = vmatmul.msk.bf16.vlgmr.msrb.gmra.mxu1 %vm25_vm0, %v2486_v37  ;;  %5784 = vmatmul.msk.bf16.vlgmr.msrb.gmra.mxu2 %vm25_vm0, %v2590_v10  ;;  %v2246_v8 = vmax.f32 %v2237_v29, 0.0  ;;  %v1703_v37 = vadd.f32 %v7477_v0, %v1599_v9  ;;  %v6464_v10 = vld [vmem:[%s8354_s3 + $0x80] sm:$0xff]  ;;  %v6473_v9 = vld [vmem:[%s8354_s3 + $0xc8] sm:$0xff] }
 0x2a2   :  { %v2272_v51 = vld [vmem:[#allocation4 + $0x15] sm:$0xff]  ;;  %2754 = vmatpush.bf16.msrb.mxu3 %v6464_v10 }
 0x2a3   :  { %2264 = vst.msk [vmem:[#allocation4 + $0x20] sm:$0xff] %vm25_vm0, %v2246_v8  ;;  %v2470_v11 = vld [vmem:[#allocation4 + $0x17] sm:$0xff]  ;;  %v2281_v15 = vmul.f32 %v2272_v51, %v6856_v60  ;;  %v1816_v62 = vadd.f32 %v7486_v46, %v1703_v37 }
 0x2a4   :  { %v2303_v2 = vld [vmem:[#allocation4 + $0x16] sm:$0xff]  ;;  %v2479_v47 = vmul.f32 %v2470_v11, %v6843_v55  ;;  %v2583_v43 = vmul.f32 %v2470_v11, %v6856_v60 }
 0x2a5   :  { %v2118_v48 = vpop.f32.mrf.mxu1  ;;  %v1920_v6 = vadd.f32 %v7489_v4, %v1816_v62  ;;  %v6468_v10 = vld [vmem:[%s8354_s3 + $0xa0] sm:$0xff] }
 0x2a6   :  { %v2220_v1 = vpop.f32.mrf.mxu2  ;;  %v2135_v52 = vadd.f32 %v2118_v48, %v2022_v45 }
 0x2a7   :  { %v2238_v56 = vadd.f32 %v2220_v1, %v2134_v40  ;;  %v2024_v5 = vadd.f32 %v7479_v28, %v1920_v6 }
 0x2a9   :  { %v2247_v53 = vmax.f32 %v2238_v56, 0.0 }
 0x2aa   :  { %v2304_v14 = vld [vmem:[#allocation4 + $0x1e] sm:$0xff] }
 0x2ab   :  { %v2273_v16 = vld [vmem:[#allocation4 + $0x1d] sm:$0xff]  ;;  %v2256_v32 = vmul.f32 0.0, %v2247_v53  ;;  %v2311_v31 = vpack.c.bf16 %v2304_v14, %v2303_v2 }
 0x2ac   :  { %v2471_v13 = vld [vmem:[#allocation4 + $0x1f] sm:$0xff]  ;;  %v2282_v41 = vmul.f32 %v2273_v16, %v6860_v61 }
 0x2ad   :  { %v2480_v39 = vmul.f32 %v2471_v13, %v6849_v57  ;;  %v2584_v44 = vmul.f32 %v2471_v13, %v6860_v61  ;;  %2265 = vst.msk [vmem:[#allocation4 + $0x28] sm:$0xff] %vm25_vm0, %v2256_v32  ;;  %5706 = vmatmul.msk.bf16.gmra.mxu3 %vm25_vm0, %v2311_v31  ;;  %v2121_v17 = vpop.f32.mrf.mxu1  ;;  %v6471_v13 = vld [vmem:[%s8354_s3 + $0xb8] sm:$0xff] }
 0x2ae   :  { %v2289_v3 = vpack.c.bf16 %v2282_v41, %v2281_v15  ;;  %v2222_v42 = vpop.f32.mrf.mxu2  ;;  %v2136_v7 = vadd.f32 %v2121_v17, %v7484_v54  ;;  %v6479_v32 = vld [vmem:[%s8354_s3 + $0xf8] sm:$0xff]  ;;  %2864 = vmatpush.bf16.msra.mxu0 %v6471_v13  ;;  %v6470_v41 = vld [vmem:[%s8354_s3 + $0xb0] sm:$0xff] }
 0x2af   :  { %v2487_v36 = vpack.c.bf16 %v2480_v39, %v2479_v47  ;;  %v2591_v22 = vpack.c.bf16 %v2584_v44, %v2583_v43  ;;  %v2239_v23 = vadd.f32 %v2222_v42, %v2135_v52  ;;  %v6475_v47 = vld [vmem:[%s8354_s3 + $0xd8] sm:$0xff]  ;;  %v6474_v39 = vld [vmem:[%s8354_s3 + $0xd0] sm:$0xff]  ;;  %3072 = vmatpush.bf16.msra.mxu2 %v6479_v32  ;;  %v2686_v32 = vld [vmem:[#allocation4 + $0x10] sm:$0xff] }
 0x2b0   :  { %5727 = vmatmul.msk.bf16.gmra.mxu0 %vm25_vm0, %v2289_v3  ;;  %2968 = vmatpush.bf16.msra.mxu1 %v6475_v47  ;;  %v6478_v43 = vld [vmem:[%s8354_s3 + $0xf0] sm:$0xff]  ;;  %v2790_v47 = vld [vmem:[#allocation4 + $0x11] sm:$0xff] }
 0x2b1   :  { %5756 = vmatmul.msk.bf16.gmra.mxu1 %vm25_vm0, %v2487_v36  ;;  %5785 = vmatmul.msk.bf16.gmra.mxu2 %vm25_vm0, %v2591_v22  ;;  %v2248_v33 = vmax.f32 %v2239_v23, 0.0  ;;  %v6469_v36 = vld [vmem:[%s8354_s3 + $0xa8] sm:$0xff]  ;;  %v6482_v13 = vld [vmem:[%s8354_s3 + $0x110] sm:$0xff] }
 0x2b2   :  { %2865 = vmatpush.bf16.msra.mxu0 %v6470_v41  ;;  %v2799_v41 = vmul.f32 %v2790_v47, %v6713_v21 }
 0x2b3   :  { %2266 = vst.msk [vmem:[#allocation4 + $0x30] sm:$0xff] %vm25_vm0, %v2248_v33  ;;  %3073 = vmatpush.bf16.msra.mxu2 %v6478_v43  ;;  %v6472_v33 = vld [vmem:[%s8354_s3 + $0xc0] sm:$0xff]  ;;  %v2685_v43 = vld [vmem:[#allocation4 + $0x8] sm:$0xff] }
 0x2b4   :  { %v2274_v0 = vld [vmem:[#allocation4 + $0x25] sm:$0xff]  ;;  %2969 = vmatpush.bf16.msra.mxu1 %v6474_v39  ;;  %v2903_v39 = vmul.f32 %v2790_v47, %v6735_v27 }
 0x2b5   :  { %v2123_v29 = vpop.f32.mrf.mxu1  ;;  %v2472_v35 = vld [vmem:[#allocation4 + $0x27] sm:$0xff]  ;;  %v2283_v46 = vmul.f32 %v2274_v0, %v6886_v25 }
 0x2b6   :  { %v2225_v34 = vpop.f32.mrf.mxu2  ;;  %v2305_v40 = vld [vmem:[#allocation4 + $0x26] sm:$0xff]  ;;  %v2481_v56 = vmul.f32 %v2472_v35, %v6873_v18  ;;  %v2585_v54 = vmul.f32 %v2472_v35, %v6886_v25  ;;  %v2137_v2 = vadd.f32 %v2123_v29, %v2024_v5  ;;  %2866 = vmatpush.bf16.msra.mxu0 %v6469_v36  ;;  %v3007_v36 = vld [vmem:[#allocation4 + $0x12] sm:$0xff] }
 0x2b7   :  { %v2240_v8 = vadd.f32 %v2225_v34, %v2136_v7 }
 0x2b8   :  { %2970 = vmatpush.bf16.msra.mxu1 %v6473_v9 }
 0x2b9   :  { %v2249_v63 = vmax.f32 %v2240_v8, 0.0 }
 0x2ba   :  { %v2306_v30 = vld [vmem:[#allocation4 + $0x2e] sm:$0xff]  ;;  %2867 = vmatpush.bf16.msra.mxu0 %v6468_v10  ;;  %v2791_v10 = vld [vmem:[#allocation4 + $0x19] sm:$0xff] }
 0x2bb   :  { %v2275_v48 = vld [vmem:[#allocation4 + $0x2d] sm:$0xff]  ;;  %2267 = vst.msk [vmem:[#allocation4 + $0x38] sm:$0xff] %vm25_vm0, %v2249_v63  ;;  %v2312_v4 = vpack.c.bf16 %v2306_v30, %v2305_v40 }
 0x2bc   :  { %v2473_v1 = vld [vmem:[#allocation4 + $0x2f] sm:$0xff]  ;;  %v2284_v51 = vmul.f32 %v2275_v48, %v6889_v26  ;;  %2971 = vmatpush.bf16.msra.mxu1 %v6472_v33 }
 0x2bd   :  { %v2482_v11 = vmul.f32 %v2473_v1, %v6876_v19  ;;  %v2586_v53 = vmul.f32 %v2473_v1, %v6889_v26  ;;  %5707 = vmatmul.msk.bf16.gmra.mxu3 %vm25_vm0, %v2312_v4  ;;  %v2126_v14 = vpop.f32.mrf.mxu1  ;;  %v6483_v1 = vld [vmem:[%s8354_s3 + $0x118] sm:$0xff] }
 0x2be   :  { %v2290_v28 = vpack.c.bf16 %v2284_v51, %v2283_v46  ;;  %v2227_v16 = vpop.f32.mrf.mxu2  ;;  %v2138_v44 = vadd.f32 %v2126_v14, %v7520_v12  ;;  %v6477_v12 = vld [vmem:[%s8354_s3 + $0xe8] sm:$0xff]  ;;  %v6476_v46 = vld [vmem:[%s8354_s3 + $0xe0] sm:$0xff]  ;;  %3185 = vmatpush.bf16.msra.mxu3 %v6483_v1 }
 0x2bf   :  { %v2488_v38 = vpack.c.bf16 %v2482_v11, %v2481_v56  ;;  %v2592_v45 = vpack.c.bf16 %v2586_v53, %v2585_v54  ;;  %v2241_v15 = vadd.f32 %v2227_v16, %v2137_v2  ;;  %3074 = vmatpush.bf16.msra.mxu2 %v6477_v12  ;;  %v8382_v11 = vld [vmem:[#allocation14_spill] sm:$0xff]  ;;  %v8383_v2 = vld [vmem:[#allocation13_spill] sm:$0xff] }
 0x2c0   :  { %5728 = vmatmul.msk.bf16.gmra.mxu0 %vm25_vm0, %v2290_v28  ;;  %v6481_v12 = vld [vmem:[%s8354_s3 + $0x108] sm:$0xff] }
 0x2c1   :  { %5757 = vmatmul.msk.bf16.gmra.mxu1 %vm25_vm0, %v2488_v38  ;;  %5786 = vmatmul.msk.bf16.gmra.mxu2 %vm25_vm0, %v2592_v45  ;;  %v2250_v31 = vmax.f32 %v2241_v15, 0.0 }
 0x2c2   :  { %v2276_v42 = vld [vmem:[#allocation4 + $0x35] sm:$0xff]  ;;  %3186 = vmatpush.bf16.msra.mxu3 %v6482_v13 }
 0x2c3   :  { %2268 = vst.msk [vmem:[#allocation4 + $0x40] sm:$0xff] %vm25_vm0, %v2250_v31  ;;  %v2474_v22 = vld [vmem:[#allocation4 + $0x37] sm:$0xff]  ;;  %v2285_v6 = vmul.f32 %v2276_v42, %v6928_v58  ;;  %3075 = vmatpush.bf16.msra.mxu2 %v6476_v46  ;;  %v2789_v31 = vld [vmem:[#allocation4 + $0x9] sm:$0xff] }
 0x2c4   :  { %v2307_v37 = vld [vmem:[#allocation4 + $0x36] sm:$0xff]  ;;  %v2483_v34 = vmul.f32 %v2474_v22, %v6907_v49  ;;  %v2587_v8 = vmul.f32 %v2474_v22, %v6928_v58  ;;  %v3006_v42 = vld [vmem:[#allocation4 + $0xa] sm:$0xff] }
 0x2c5   :  { %v2128_v52 = vpop.f32.mrf.mxu1  ;;  %v3015_v22 = vpack.c.bf16 %v3007_v36, %v3006_v42 }
 0x2c6   :  { %v2230_v3 = vpop.f32.mrf.mxu2  ;;  %v2798_v52 = vmul.f32 %v2789_v31, %v6706_v20  ;;  %3187 = vmatpush.bf16.msra.mxu3 %v6481_v12 }
 0x2c7   :  { %v2242_v17 = vadd.f32 %v2230_v3, %v2138_v44  ;;  %v2694_v44 = vpack.c.bf16 %v2686_v32, %v2685_v43  ;;  %v2902_v3 = vmul.f32 %v2789_v31, %v6724_v24 }
 0x2c8   :  { %v2807_v9 = vpack.c.bf16 %v2799_v41, %v2798_v52  ;;  %v2691_v41 = vld [vmem:[#allocation4 + $0x38] sm:$0xff] }
 0x2c9   :  { %v2251_v23 = vmax.f32 %v2242_v17, 0.0  ;;  %v2911_v17 = vpack.c.bf16 %v2903_v39, %v2902_v3 }
 0x2ca   :  { %v2308_v62 = vld [vmem:[#allocation4 + $0x3e] sm:$0xff] }
 0x2cb   :  { %v2277_v7 = vld [vmem:[#allocation4 + $0x3d] sm:$0xff]  ;;  %2269 = vst.msk [vmem:[#allocation4 + $0x48] sm:$0xff] %vm25_vm0, %v2251_v23  ;;  %v2313_v0 = vpack.c.bf16 %v2308_v62, %v2307_v37 }
 0x2cc   :  { %v2475_v29 = vld [vmem:[#allocation4 + $0x3f] sm:$0xff]  ;;  %v2286_v35 = vmul.f32 %v2277_v7, %v6931_v59 }
 0x2cd   :  { %v2484_v63 = vmul.f32 %v2475_v29, %v6910_v50  ;;  %v2588_v40 = vmul.f32 %v2475_v29, %v6931_v59  ;;  %5708 = vmatmul.msk.bf16.gmra.mxu3 %vm25_vm0, %v2313_v0  ;;  %v2792_v23 = vld [vmem:[#allocation4 + $0x21] sm:$0xff]  ;;  %v2687_v7 = vld [vmem:[#allocation4 + $0x18] sm:$0xff]  ;;  %v2800_v29 = vmul.f32 %v2791_v10, %v6843_v55 }
 0x2ce   :  { %v2291_v5 = vpack.c.bf16 %v2286_v35, %v2285_v6  ;;  %v2232_v56 = vpop.f32.mrf.mxu2  ;;  %v2688_v37 = vld [vmem:[#allocation4 + $0x20] sm:$0xff]  ;;  %v2801_v33 = vmul.f32 %v2792_v23, %v6849_v57  ;;  %v2905_v62 = vmul.f32 %v2792_v23, %v6860_v61 }
 0x2cf   :  { %v2489_v30 = vpack.c.bf16 %v2484_v63, %v2483_v34  ;;  %v2593_v48 = vpack.c.bf16 %v2588_v40, %v2587_v8  ;;  %v2695_v6 = vpack.c.bf16 %v2688_v37, %v2687_v7  ;;  %v2904_v34 = vmul.f32 %v2791_v10, %v6856_v60  ;;  %v3009_v8 = vld [vmem:[#allocation4 + $0x22] sm:$0xff]  ;;  %v3008_v63 = vld [vmem:[#allocation4 + $0x1a] sm:$0xff]  ;;  %v6480_v56 = vld [vmem:[%s8354_s3 + $0x100] sm:$0xff] }
 0x2d0   :  { %5729 = vmatmul.msk.bf16.gmra.mxu0 %vm25_vm0, %v2291_v5  ;;  %v2808_v0 = vpack.c.bf16 %v2801_v33, %v2800_v29  ;;  %v3016_v40 = vpack.c.bf16 %v3009_v8, %v3008_v63  ;;  %v2794_v5 = vld [vmem:[#allocation4 + $0x31] sm:$0xff]  ;;  %3188 = vmatpush.bf16.msra.mxu3 %v6480_v56  ;;  %v2692_v13 = vld [vmem:[#allocation4 + $0x40] sm:$0xff] }
 0x2d1   :  { %5758 = vmatmul.msk.bf16.gmra.mxu1 %vm25_vm0, %v2489_v30  ;;  %5787 = vmatmul.msk.bf16.gmra.mxu2 %vm25_vm0, %v2593_v48  ;;  %v2912_v35 = vpack.c.bf16 %v2905_v62, %v2904_v34  ;;  %v2690_v30 = vld [vmem:[#allocation4 + $0x30] sm:$0xff]  ;;  %v2803_v46 = vmul.f32 %v2794_v5, %v6876_v19  ;;  %v2907_v1 = vmul.f32 %v2794_v5, %v6889_v26  ;;  %v2795_v47 = vld [vmem:[#allocation4 + $0x39] sm:$0xff] }
 0x2d2   :  { %v2278_v54 = vld [vmem:[#allocation4 + $0x45] sm:$0xff]  ;;  %v2697_v39 = vpack.c.bf16 %v2692_v13, %v2691_v41  ;;  %v2804_v43 = vmul.f32 %v2795_v47, %v6907_v49  ;;  %v3012_v42 = vld [vmem:[#allocation4 + $0x3a] sm:$0xff] }
 0x2d3   :  { %v2476_v4 = vld [vmem:[#allocation4 + $0x47] sm:$0xff]  ;;  %v2287_v53 = vmul.f32 %v2278_v54, %v8382_v11 }
 0x2d4   :  { %v2309_v51 = vld [vmem:[#allocation4 + $0x46] sm:$0xff]  ;;  %v2485_v28 = vmul.f32 %v2476_v4, %v8383_v2  ;;  %v2589_v38 = vmul.f32 %v2476_v4, %v8382_v11 }
 0x2d5   :  { %v2314_v45 = vpack.c.bf16 %v2309_v51, %v2309_v51  ;;  %v2292_v14 = vpack.c.bf16 %v2287_v53, %v2287_v53  ;;  %v2793_v48 = vld [vmem:[#allocation4 + $0x29] sm:$0xff] }
 0x2d6   :  { %v2490_v16 = vpack.c.bf16 %v2485_v28, %v2485_v28  ;;  %v2594_v15 = vpack.c.bf16 %v2589_v38, %v2589_v38  ;;  %v2689_v54 = vld [vmem:[#allocation4 + $0x28] sm:$0xff]  ;;  %v2802_v51 = vmul.f32 %v2793_v48, %v6873_v18  ;;  %v2906_v53 = vmul.f32 %v2793_v48, %v6886_v25  ;;  %v3011_v28 = vld [vmem:[#allocation4 + $0x32] sm:$0xff] }
 0x2d7   :  { %v2696_v4 = vpack.c.bf16 %v2690_v30, %v2689_v54  ;;  %v3013_v52 = vld [vmem:[#allocation4 + $0x42] sm:$0xff] }
 0x2d8   :  { %v2809_v38 = vpack.c.bf16 %v2803_v46, %v2802_v51  ;;  %v2693_v34 = vld [vmem:[#allocation4 + $0x48] sm:$0xff] }
 0x2d9   :  { %v2698_v63 = vpack.c.bf16 %v2693_v34, %v2693_v34 }
 0x2dd   :  { %5709 = vmatmul.msk.bf16.gmra.mxu3 %vm25_vm0, %v2314_v45  ;;  %v2913_v45 = vpack.c.bf16 %v2907_v1, %v2906_v53 }
 0x2e0   :  { %5730 = vmatmul.msk.bf16.gmra.mxu0 %vm25_vm0, %v2292_v14  ;;  %v3010_v14 = vld [vmem:[#allocation4 + $0x2a] sm:$0xff] }
 0x2e1   :  { %5759 = vmatmul.msk.bf16.gmra.mxu1 %vm25_vm0, %v2490_v16  ;;  %5788 = vmatmul.msk.bf16.gmra.mxu2 %vm25_vm0, %v2594_v15  ;;  %v3017_v16 = vpack.c.bf16 %v3011_v28, %v3010_v14  ;;  %v2796_v15 = vld [vmem:[#allocation4 + $0x41] sm:$0xff]  ;;  %v3110_v14 = vld [vmem:[#allocation4 + $0xb] sm:$0xff] }
 0x2e2   :  { %v2805_v32 = vmul.f32 %v2796_v15, %v6910_v50  ;;  %v2909_v31 = vmul.f32 %v2796_v15, %v6931_v59  ;;  %v3119_v13 = vmul.f32 %v3110_v14, %v6706_v20  ;;  %v6497_v59 = vld [vmem:[%s8354_s3 + $0x188] sm:$0xff] }
 0x2ed   :  { %5813 = vmatmul.msk.bf16.vlgmr.msrb.gmra.mxu3 %vm25_vm0, %v2694_v44  ;;  %v2908_v44 = vmul.f32 %v2795_v47, %v6928_v58 }
 0x2f0   :  { %5842 = vmatmul.msk.bf16.vlgmr.msra.gmra.mxu0 %vm25_vm0, %v2807_v9  ;;  %v2810_v9 = vpack.c.bf16 %v2805_v32, %v2804_v43 }
 0x2f1   :  { %5871 = vmatmul.msk.bf16.vlgmr.msra.gmra.mxu1 %vm25_vm0, %v2911_v17  ;;  %5900 = vmatmul.msk.bf16.vlgmr.msra.gmra.mxu2 %vm25_vm0, %v3015_v22  ;;  %v2914_v17 = vpack.c.bf16 %v2909_v31, %v2908_v44  ;;  %v3018_v22 = vpack.c.bf16 %v3013_v52, %v3012_v42  ;;  %v3112_v42 = vld [vmem:[#allocation4 + $0x1b] sm:$0xff] }
 0x2fd   :  { %5814 = vmatmul.msk.bf16.gmra.mxu3 %vm25_vm0, %v2695_v6  ;;  %v2797_v6 = vld [vmem:[#allocation4 + $0x49] sm:$0xff] }
 0x2fe   :  { %v2806_v8 = vmul.f32 %v2797_v6, %v8383_v2 }
 0x300   :  { %5843 = vmatmul.msk.bf16.gmra.mxu0 %vm25_vm0, %v2808_v0  ;;  %v2910_v0 = vmul.f32 %v2797_v6, %v8382_v11  ;;  %v2811_v48 = vpack.c.bf16 %v2806_v8, %v2806_v8 }
 0x301   :  { %5872 = vmatmul.msk.bf16.gmra.mxu1 %vm25_vm0, %v2912_v35  ;;  %5901 = vmatmul.msk.bf16.gmra.mxu2 %vm25_vm0, %v3016_v40  ;;  %v3014_v40 = vld [vmem:[#allocation4 + $0x4a] sm:$0xff] }
 0x302   :  { %v2915_v46 = vpack.c.bf16 %v2910_v0, %v2910_v0  ;;  %v3019_v1 = vpack.c.bf16 %v3014_v40, %v3014_v40 }
 0x30d   :  { %5815 = vmatmul.msk.bf16.gmra.mxu3 %vm25_vm0, %v2696_v4 }
 0x310   :  { %5844 = vmatmul.msk.bf16.gmra.mxu0 %vm25_vm0, %v2809_v38  ;;  %v3111_v38 = vld [vmem:[#allocation4 + $0x13] sm:$0xff] }
 0x311   :  { %5873 = vmatmul.msk.bf16.gmra.mxu1 %vm25_vm0, %v2913_v45  ;;  %5902 = vmatmul.msk.bf16.gmra.mxu2 %vm25_vm0, %v3017_v16  ;;  %v3120_v16 = vmul.f32 %v3111_v38, %v6713_v21 }
 0x313   :  { %v3128_v32 = vpack.c.bf16 %v3120_v16, %v3119_v13 }
 0x31d   :  { %v2444_v3 = vpop.f32.mrf.mxu0  ;;  %5816 = vmatmul.msk.bf16.gmra.mxu3 %vm25_vm0, %v2697_v39 }
 0x31e   :  { %v2548_v36 = vpop.f32.mrf.mxu1 }
 0x320   :  { %5845 = vmatmul.msk.bf16.gmra.mxu0 %vm25_vm0, %v2810_v9  ;;  %v2372_v12 = vpop.f32.mrf.mxu3  ;;  %v3113_v9 = vld [vmem:[#allocation4 + $0x23] sm:$0xff] }
 0x321   :  { %5874 = vmatmul.msk.bf16.gmra.mxu1 %vm25_vm0, %v2914_v17  ;;  %5903 = vmatmul.msk.bf16.gmra.mxu2 %vm25_vm0, %v3018_v22  ;;  %v2445_v23 = vadd.f32 %v2444_v3, %v2372_v12  ;;  %v3122_v22 = vmul.f32 %v3113_v9, %v6849_v57  ;;  %v3116_v9 = vld [vmem:[#allocation4 + $0x3b] sm:$0xff] }
 0x323   :  { %v2572_v37 = vadd.f32 %v2548_v36, %v2445_v23  ;;  %v3121_v23 = vmul.f32 %v3112_v42, %v6843_v55 }
 0x324   :  { %v2652_v10 = vpop.f32.mrf.mxu2 }
 0x325   :  { %v7711_v33 = vpop.f32.mrf.mxu0  ;;  %v7715_v7 = vadd.f32 %v2652_v10, %v2572_v37  ;;  %v3129_v10 = vpack.c.bf16 %v3122_v22, %v3121_v23  ;;  %v6491_v22 = vld [vmem:[%s8354_s3 + $0x158] sm:$0xff] }
 0x326   :  { %v7713_v62 = vpop.f32.mrf.mxu1  ;;  %3349 = vmatpush.bf16.msrb.mxu0 %v6491_v22 }
 0x328   :  { %v7717_v29 = vpop.f32.mrf.mxu3 }
 0x32c   :  { %v7721_v35 = vpop.f32.mrf.mxu2 }
 0x32d   :  { %v2449_v5 = vpop.f32.mrf.mxu0  ;;  %5817 = vmatmul.msk.bf16.gmra.mxu3 %vm25_vm0, %v2698_v63 }
 0x32e   :  { %v2553_v30 = vpop.f32.mrf.mxu1 }
 0x330   :  { %5846 = vmatmul.msk.bf16.gmra.mxu0 %vm25_vm0, %v2811_v48  ;;  %v2377_v56 = vpop.f32.mrf.mxu3  ;;  %v3115_v48 = vld [vmem:[#allocation4 + $0x33] sm:$0xff] }
 0x331   :  { %5875 = vmatmul.msk.bf16.gmra.mxu1 %vm25_vm0, %v2915_v46  ;;  %5904 = vmatmul.msk.bf16.gmra.mxu2 %vm25_vm0, %v3019_v1  ;;  %v2450_v54 = vadd.f32 %v2449_v5, %v2377_v56  ;;  %v3114_v1 = vld [vmem:[#allocation4 + $0x2b] sm:$0xff]  ;;  %v3124_v56 = vmul.f32 %v3115_v48, %v6876_v19 }
 0x333   :  { %v2574_v4 = vadd.f32 %v2553_v30, %v2450_v54 }
 0x334   :  { %v2657_v51 = vpop.f32.mrf.mxu2 }
 0x335   :  { %v7727_v53 = vpop.f32.mrf.mxu0  ;;  %v7731_v45 = vadd.f32 %v2657_v51, %v2574_v4  ;;  %v3123_v4 = vmul.f32 %v3114_v1, %v6873_v18 }
 0x336   :  { %v7729_v28 = vpop.f32.mrf.mxu1 }
 0x337   :  { %v3130_v38 = vpack.c.bf16 %v3124_v56, %v3123_v4 }
 0x338   :  { %v7734_v15 = vpop.f32.mrf.mxu3 }
 0x33c   :  { %v7737_v47 = vpop.f32.mrf.mxu2 }
 0x33d   :  { %v2454_v31 = vpop.f32.mrf.mxu0  ;;  %5929 = vmatmul.msk.bf16.vlgmr.msra.gmra.mxu3 %vm25_vm0, %v3128_v32 }
 0x33e   :  { %v2558_v41 = vpop.f32.mrf.mxu1 }
 0x340   :  { %v2382_v39 = vpop.f32.mrf.mxu3 }
 0x341   :  { %v2455_v43 = vadd.f32 %v2454_v31, %v2382_v39 }
 0x343   :  { %v2576_v44 = vadd.f32 %v2558_v41, %v2455_v43 }
 0x344   :  { %v2662_v52 = vpop.f32.mrf.mxu2 }
 0x345   :  { %v7740_v3 = vpop.f32.mrf.mxu0  ;;  %v7744_v17 = vadd.f32 %v2662_v52, %v2576_v44  ;;  %v3117_v44 = vld [vmem:[#allocation4 + $0x43] sm:$0xff] }
 0x346   :  { %v7742_v36 = vpop.f32.mrf.mxu1  ;;  %v3126_v42 = vmul.f32 %v3117_v44, %v6910_v50  ;;  %v6493_v50 = vld [vmem:[%s8354_s3 + $0x168] sm:$0xff] }
 0x348   :  { %v7747_v12 = vpop.f32.mrf.mxu3 }
 0x34c   :  { %v7750_v37 = vpop.f32.mrf.mxu2 }
 0x34d   :  { %v2459_v6 = vpop.f32.mrf.mxu0  ;;  %5930 = vmatmul.msk.bf16.gmra.mxu3 %vm25_vm0, %v3129_v10  ;;  %v3125_v10 = vmul.f32 %v3116_v9, %v6907_v49  ;;  %v6486_v9 = vld [vmem:[%s8354_s3 + $0x130] sm:$0xff] }
 0x34e   :  { %v2563_v34 = vpop.f32.mrf.mxu1 }
 0x350   :  { %v2387_v8 = vpop.f32.mrf.mxu3 }
 0x351   :  { %v2460_v0 = vadd.f32 %v2459_v6, %v2387_v8  ;;  %v6487_v8 = vld [vmem:[%s8354_s3 + $0x138] sm:$0xff] }
 0x352   :  { %3420 = vmatpush.bf16.msrb.mxu1 %v6487_v8 }
 0x353   :  { %v2578_v63 = vadd.f32 %v2563_v34, %v2460_v0  ;;  %v3131_v34 = vpack.c.bf16 %v3126_v42, %v3125_v10 }
 0x354   :  { %v2667_v40 = vpop.f32.mrf.mxu2 }
 0x355   :  { %v7753_v5 = vpop.f32.mrf.mxu0  ;;  %v7757_v46 = vadd.f32 %v2667_v40, %v2578_v63 }
 0x356   :  { %v7755_v30 = vpop.f32.mrf.mxu1  ;;  %3421 = vmatpush.bf16.msrb.mxu1 %v6486_v9 }
 0x358   :  { %v7760_v54 = vpop.f32.mrf.mxu3 }
 0x35c   :  { %v7763_v51 = vpop.f32.mrf.mxu2 }
 0x35d   :  { %v2464_v14 = vpop.f32.mrf.mxu0  ;;  %5931 = vmatmul.msk.bf16.gmra.mxu3 %vm25_vm0, %v3130_v38 }
 0x35e   :  { %v2568_v16 = vpop.f32.mrf.mxu1 }
 0x360   :  { %v2392_v13 = vpop.f32.mrf.mxu3 }
 0x361   :  { %v2465_v32 = vadd.f32 %v2464_v14, %v2392_v13  ;;  %v3118_v14 = vld [vmem:[#allocation4 + $0x4b] sm:$0xff] }
 0x363   :  { %v2580_v31 = vadd.f32 %v2568_v16, %v2465_v32  ;;  %v3127_v32 = vmul.f32 %v3118_v14, %v8383_v2 }
 0x364   :  { %v2672_v41 = vpop.f32.mrf.mxu2 }
 0x365   :  { %v2466_v39 = vpop.f32.mrf.mxu0  ;;  %v7766_v52 = vadd.f32 %v2672_v41, %v2580_v31 }
 0x366   :  { %v2570_v43 = vpop.f32.mrf.mxu1  ;;  %v3132_v39 = vpack.c.bf16 %v3127_v32, %v3127_v32 }
 0x368   :  { %v2394_v23 = vpop.f32.mrf.mxu3 }
 0x36c   :  { %v2674_v6 = vpop.f32.mrf.mxu2 }
 0x36d   :  { %v2869_v0 = vpop.f32.mrf.mxu0  ;;  %5932 = vmatmul.msk.bf16.gmra.mxu3 %vm25_vm0, %v3131_v34 }
 0x36e   :  { %v2973_v63 = vpop.f32.mrf.mxu1 }
 0x370   :  { %v2756_v40 = vpop.f32.mrf.mxu3 }
 0x371   :  { %v2780_v48 = vadd.f32 %v2756_v40, %v7715_v7  ;;  %v6490_v7 = vld [vmem:[%s8354_s3 + $0x150] sm:$0xff] }
 0x372   :  { %3350 = vmatpush.bf16.msrb.mxu0 %v6490_v7 }
 0x373   :  { %v2893_v1 = vadd.f32 %v2869_v0, %v2780_v48 }
 0x374   :  { %v3077_v56 = vpop.f32.mrf.mxu2 }
 0x375   :  { %v7778_v4 = vpop.f32.mrf.mxu0  ;;  %v2997_v16 = vadd.f32 %v2973_v63, %v2893_v1 }
 0x376   :  { %v7780_v38 = vpop.f32.mrf.mxu1 }
 0x377   :  { %v7782_v13 = vadd.f32 %v3077_v56, %v2997_v16 }
 0x378   :  { %v7785_v31 = vpop.f32.mrf.mxu3 }
 0x37c   :  { %v7787_v41 = vpop.f32.mrf.mxu2 }
 0x37d   :  { %v2874_v43 = vpop.f32.mrf.mxu0  ;;  %5933 = vmatmul.msk.bf16.gmra.mxu3 %vm25_vm0, %v3132_v39  ;;  %v6485_v39 = vld [vmem:[%s8354_s3 + $0x128] sm:$0xff] }
 0x37e   :  { %v2978_v44 = vpop.f32.mrf.mxu1  ;;  %3422 = vmatpush.bf16.msrb.mxu1 %v6485_v39 }
 0x380   :  { %v2761_v42 = vpop.f32.mrf.mxu3 }
 0x381   :  { %v2782_v22 = vadd.f32 %v2761_v42, %v7731_v45  ;;  %v6489_v45 = vld [vmem:[%s8354_s3 + $0x148] sm:$0xff] }
 0x382   :  { %3351 = vmatpush.bf16.msrb.mxu0 %v6489_v45 }
 0x383   :  { %v2895_v23 = vadd.f32 %v2874_v43, %v2782_v22 }
 0x384   :  { %v3082_v10 = vpop.f32.mrf.mxu2 }
 0x385   :  { %v7797_v6 = vpop.f32.mrf.mxu0  ;;  %v2999_v8 = vadd.f32 %v2978_v44, %v2895_v23 }
 0x386   :  { %v7799_v34 = vpop.f32.mrf.mxu1 }
 0x387   :  { %v7801_v0 = vadd.f32 %v3082_v10, %v2999_v8 }
 0x388   :  { %v7803_v63 = vpop.f32.mrf.mxu3 }
 0x38c   :  { %v7805_v40 = vpop.f32.mrf.mxu2 }
 0x38d   :  { %v2879_v48 = vpop.f32.mrf.mxu0 }
 0x38e   :  { %v2983_v1 = vpop.f32.mrf.mxu1 }
 0x390   :  { %v2766_v56 = vpop.f32.mrf.mxu3 }
 0x391   :  { %v2784_v14 = vadd.f32 %v2766_v56, %v7744_v17 }
 0x393   :  { %v2897_v16 = vadd.f32 %v2879_v48, %v2784_v14 }
 0x394   :  { %v3087_v32 = vpop.f32.mrf.mxu2 }
 0x395   :  { %v7814_v43 = vpop.f32.mrf.mxu0  ;;  %v3001_v7 = vadd.f32 %v2983_v1, %v2897_v16  ;;  %v6488_v1 = vld [vmem:[%s8354_s3 + $0x140] sm:$0xff] }
 0x396   :  { %v7816_v44 = vpop.f32.mrf.mxu1  ;;  %v6484_v16 = vld [vmem:[%s8354_s3 + $0x120] sm:$0xff]  ;;  %3352 = vmatpush.bf16.msrb.mxu0 %v6488_v1 }
 0x397   :  { %v7818_v9 = vadd.f32 %v3087_v32, %v3001_v7  ;;  %3423 = vmatpush.bf16.msrb.mxu1 %v6484_v16 }
 0x398   :  { %v7820_v42 = vpop.f32.mrf.mxu3 }
 0x39c   :  { %v7822_v22 = vpop.f32.mrf.mxu2 }
 0x39d   :  { %v2884_v17 = vpop.f32.mrf.mxu0 }
 0x39e   :  { %v2988_v23 = vpop.f32.mrf.mxu1 }
 0x3a0   :  { %v2771_v10 = vpop.f32.mrf.mxu3 }
 0x3a1   :  { %v2786_v8 = vadd.f32 %v2771_v10, %v7757_v46  ;;  %v6499_v10 = vld [vmem:[%s8354_s3 + $0x198] sm:$0xff] }
 0x3a2   :  { %3625 = vmatpush.bf16.msrb.mxu3 %v6499_v10 }
 0x3a3   :  { %v2899_v48 = vadd.f32 %v2884_v17, %v2786_v8  ;;  %v6498_v8 = vld [vmem:[%s8354_s3 + $0x190] sm:$0xff] }
 0x3a4   :  { %v3092_v45 = vpop.f32.mrf.mxu2 }
 0x3a5   :  { %v7825_v56 = vpop.f32.mrf.mxu0  ;;  %v3003_v2 = vadd.f32 %v2988_v23, %v2899_v48  ;;  %v6495_v23 = vld [vmem:[%s8354_s3 + $0x178] sm:$0xff] }
 0x3a6   :  { %v7827_v14 = vpop.f32.mrf.mxu1  ;;  %3523 = vmatpush.bf16.msrb.mxu2 %v6495_v23  ;;  %3626 = vmatpush.bf16.msrb.mxu3 %v6498_v8  ;;  %v2452_v8 = vadd.f32 %v7727_v53, %v7734_v15  ;;  %v6502_v53 = vld [vmem:[%s8354_s3 + $0x1b0] sm:$0xff] }
 0x3a7   :  { %v7835_v32 = vadd.f32 %v3092_v45, %v3003_v2  ;;  %v6494_v2 = vld [vmem:[%s8354_s3 + $0x170] sm:$0xff]  ;;  %v2447_v45 = vadd.f32 %v7711_v33, %v7717_v29  ;;  %v6492_v33 = vld [vmem:[%s8354_s3 + $0x160] sm:$0xff] }
 0x3a8   :  { %v7837_v46 = vpop.f32.mrf.mxu3  ;;  %v6496_v29 = vld [vmem:[%s8354_s3 + $0x180] sm:$0xff] }
 0x3a9   :  { %v2573_v49 = vadd.f32 %v7713_v62, %v2447_v45 }
 0x3aa   :  { %3524 = vmatpush.bf16.msrb.mxu2 %v6494_v2  ;;  %3627 = vmatpush.bf16.msrb.mxu3 %v6497_v59 }
 0x3ab   :  { %v2677_v62 = vadd.f32 %v7721_v35, %v2573_v49 }
 0x3ac   :  { %v7839_v39 = vpop.f32.mrf.mxu2 }
 0x3ad   :  { %v2889_v7 = vpop.f32.mrf.mxu0 }
 0x3ae   :  { %v2993_v17 = vpop.f32.mrf.mxu1  ;;  %3525 = vmatpush.bf16.msrb.mxu2 %v6493_v50  ;;  %3628 = vmatpush.bf16.msrb.mxu3 %v6496_v29  ;;  %v2781_v50 = vadd.f32 %v7785_v31, %v2677_v62  ;;  %v2575_v31 = vadd.f32 %v7729_v28, %v2452_v8  ;;  %v6506_v28 = vld [vmem:[%s8354_s3 + $0x1d0] sm:$0xff] }
 0x3b0   :  { %v2776_v48 = vpop.f32.mrf.mxu3 }
 0x3b1   :  { %v2788_v1 = vadd.f32 %v2776_v48, %v7766_v52 }
 0x3b2   :  { %3526 = vmatpush.bf16.msrb.mxu2 %v6492_v33 }
 0x3b3   :  { %v2901_v16 = vadd.f32 %v2889_v7, %v2788_v1  ;;  %v6503_v7 = vld [vmem:[%s8354_s3 + $0x1b8] sm:$0xff] }
 0x3b4   :  { %v3097_v11 = vpop.f32.mrf.mxu2  ;;  %3727 = vmatpush.bf16.msra.mxu0 %v6503_v7 }
 0x3b5   :  { %v2891_v23 = vpop.f32.mrf.mxu0  ;;  %v3005_v58 = vadd.f32 %v2993_v17, %v2901_v16  ;;  %v6507_v17 = vld [vmem:[%s8354_s3 + $0x1d8] sm:$0xff] }
 0x3b6   :  { %v2995_v10 = vpop.f32.mrf.mxu1  ;;  %3838 = vmatpush.bf16.msra.mxu1 %v6507_v17 }
 0x3b7   :  { %v7869_v52 = vadd.f32 %v3097_v11, %v3005_v58  ;;  %v2894_v58 = vadd.f32 %v7778_v4, %v2781_v50  ;;  %v2679_v4 = vadd.f32 %v7737_v47, %v2575_v31  ;;  %v2457_v47 = vadd.f32 %v7740_v3, %v7747_v12 }
 0x3b8   :  { %v2778_v2 = vpop.f32.mrf.mxu3  ;;  %3728 = vmatpush.bf16.msra.mxu0 %v6502_v53 }
 0x3b9   :  { %v2998_v49 = vadd.f32 %v7780_v38, %v2894_v58  ;;  %v2783_v23 = vadd.f32 %v7803_v63, %v2679_v4  ;;  %v2577_v2 = vadd.f32 %v7742_v36, %v2457_v47 }
 0x3ba   :  { %3839 = vmatpush.bf16.msra.mxu1 %v6506_v28 }
 0x3bb   :  { %v3102_v45 = vadd.f32 %v7787_v41, %v2998_v49  ;;  %v2896_v15 = vadd.f32 %v7797_v6, %v2783_v23 }
 0x3bc   :  { %v3099_v59 = vpop.f32.mrf.mxu2 }
 0x3bd   :  { %v3000_v33 = vadd.f32 %v7799_v34, %v2896_v15 }
 0x3bf   :  { %v3104_v36 = vadd.f32 %v7805_v40, %v3000_v33  ;;  %v6501_v40 = vld [vmem:[%s8354_s3 + $0x1a8] sm:$0xff] }
 0x3c0   :  { %v3190_v11 = vpop.f32.mrf.mxu3  ;;  %3729 = vmatpush.bf16.msra.mxu0 %v6501_v40 }
 0x3c1   :  { %v3214_v48 = vadd.f32 %v3190_v11, %v7782_v13 }
 0x3c3   :  { %v3223_v35 = vmax.f32 %v3214_v48, 0.0 }
 0x3c5   :  { %3242 = vst.msk [vmem:[#allocation5 + $0x8] sm:$0xff] %vm3241_vm11, %v3223_v35  ;;  %v2681_v35 = vadd.f32 %v7750_v37, %v2577_v2  ;;  %v2462_v37 = vadd.f32 %v7753_v5, %v7760_v54 }
 0x3c7   :  { %v2579_v47 = vadd.f32 %v7755_v30, %v2462_v37 }
 0x3c8   :  { %v3192_v1 = vpop.f32.mrf.mxu3 }
 0x3c9   :  { %v3215_v16 = vadd.f32 %v3192_v1, %v3102_v45  ;;  %v2785_v45 = vadd.f32 %v7820_v42, %v2681_v35 }
 0x3cb   :  { %v3224_v10 = vmax.f32 %v3215_v16, 0.0  ;;  %v2898_v4 = vadd.f32 %v7814_v43, %v2785_v45 }
 0x3cc   :  { %v3251_v41 = vld [vmem:[#allocation5 + $0x5] sm:$0xff] }
 0x3cd   :  { %3243 = vst.msk [vmem:[#allocation5 + $0x10] sm:$0xff] %vm3241_vm11, %v3224_v10  ;;  %v3448_v63 = vld [vmem:[#allocation5 + $0x7] sm:$0xff]  ;;  %v3260_v6 = vmul.f32 %v3251_v41, %v6724_v24  ;;  %v3002_v42 = vadd.f32 %v7816_v44, %v2898_v4 }
 0x3ce   :  { %v3283_v7 = vld [vmem:[#allocation5 + $0x6] sm:$0xff]  ;;  %v3457_v17 = vmul.f32 %v3448_v63, %v6706_v20  ;;  %v3559_v3 = vmul.f32 %v3448_v63, %v6724_v24 }
 0x3cf   :  { %v6505_v44 = vld [vmem:[%s8354_s3 + $0x1c8] sm:$0xff] }
 0x3d0   :  { %v3195_v38 = vpop.f32.mrf.mxu3  ;;  %3840 = vmatpush.bf16.msra.mxu1 %v6505_v44  ;;  %v6508_v44 = vld [vmem:[%s8354_s3 + $0x1e0] sm:$0xff] }
 0x3d1   :  { %v3216_v13 = vadd.f32 %v3195_v38, %v7801_v0 }
 0x3d3   :  { %v3225_v29 = vmax.f32 %v3216_v13, 0.0 }
 0x3d4   :  { %v3284_v62 = vld [vmem:[#allocation5 + $0xe] sm:$0xff] }
 0x3d5   :  { %v3252_v50 = vld [vmem:[#allocation5 + $0xd] sm:$0xff]  ;;  %3244 = vst.msk [vmem:[#allocation5 + $0x18] sm:$0xff] %vm3241_vm11, %v3225_v29  ;;  %v3292_v12 = vpack.c.bf16 %v3284_v62, %v3283_v7  ;;  %v3106_v7 = vadd.f32 %v7822_v22, %v3002_v42  ;;  %v6500_v22 = vld [vmem:[%s8354_s3 + $0x1a0] sm:$0xff] }
 0x3d6   :  { %v3449_v59 = vld [vmem:[#allocation5 + $0xf] sm:$0xff]  ;;  %v3261_v0 = vmul.f32 %v3252_v50, %v6735_v27  ;;  %3730 = vmatpush.bf16.msra.mxu0 %v6500_v22 }
 0x3d7   :  { %v3458_v34 = vmul.f32 %v3449_v59, %v6713_v21  ;;  %v3560_v58 = vmul.f32 %v3449_v59, %v6735_v27  ;;  %5966 = vmatmul.msk.bf16.vlgmr.msrb.gmra.mxu0 %vm25_vm0, %v3292_v12  ;;  %v2683_v59 = vadd.f32 %v7763_v51, %v2579_v47  ;;  %v6510_v47 = vld [vmem:[%s8354_s3 + $0x1f0] sm:$0xff]  ;;  %v8386_v22 = vld [vmem:[#allocation12_spill] sm:$0xff] }
 0x3d8   :  { %v3269_v11 = vpack.c.bf16 %v3261_v0, %v3260_v6  ;;  %v3197_v49 = vpop.f32.mrf.mxu3 }
 0x3d9   :  { %v3466_v8 = vpack.c.bf16 %v3458_v34, %v3457_v17  ;;  %v3568_v48 = vpack.c.bf16 %v3560_v58, %v3559_v3  ;;  %v3217_v31 = vadd.f32 %v3197_v49, %v3104_v36  ;;  %v6504_v3 = vld [vmem:[%s8354_s3 + $0x1c0] sm:$0xff]  ;;  %v2787_v12 = vadd.f32 %v7837_v46, %v2683_v59 }
 0x3da   :  { %5987 = vmatmul.msk.bf16.vlgmr.msrb.gmra.mxu1 %vm25_vm0, %v3269_v11 }
 0x3db   :  { %6016 = vmatmul.msk.bf16.vlgmr.msrb.gmra.mxu2 %vm25_vm0, %v3466_v8  ;;  %6045 = vmatmul.msk.bf16.vlgmr.msrb.gmra.mxu3 %vm25_vm0, %v3568_v48  ;;  %v3226_v1 = vmax.f32 %v3217_v31, 0.0  ;;  %v2900_v51 = vadd.f32 %v7825_v56, %v2787_v12  ;;  %v8387_v12 = vld [vmem:[#allocation10_spill] sm:$0xff] }
 0x3dc   :  { %v3253_v10 = vld [vmem:[#allocation5 + $0x15] sm:$0xff]  ;;  %3841 = vmatpush.bf16.msra.mxu1 %v6504_v3 }
 0x3dd   :  { %3245 = vst.msk [vmem:[#allocation5 + $0x20] sm:$0xff] %vm3241_vm11, %v3226_v1  ;;  %v3450_v53 = vld [vmem:[#allocation5 + $0x17] sm:$0xff]  ;;  %v3262_v41 = vmul.f32 %v3253_v10, %v6856_v60  ;;  %v3004_v8 = vadd.f32 %v7827_v14, %v2900_v51 }
 0x3de   :  { %v3285_v15 = vld [vmem:[#allocation5 + $0x16] sm:$0xff]  ;;  %v3459_v63 = vmul.f32 %v3450_v53, %v6843_v55  ;;  %v3561_v29 = vmul.f32 %v3450_v53, %v6856_v60 }
 0x3df   :  { %v3108_v37 = vadd.f32 %v7839_v39, %v3004_v8  ;;  %v6515_v39 = vld [vmem:[%s8354_s3 + $0x218] sm:$0xff] }
 0x3e0   :  { %v3200_v16 = vpop.f32.mrf.mxu3  ;;  %4042 = vmatpush.bf16.msra.mxu3 %v6515_v39 }
 0x3e1   :  { %v3218_v23 = vadd.f32 %v3200_v16, %v7818_v9 }
 0x3e3   :  { %v3227_v28 = vmax.f32 %v3218_v23, 0.0 }
 0x3e4   :  { %v3286_v38 = vld [vmem:[#allocation5 + $0x1e] sm:$0xff] }
 0x3e5   :  { %v3254_v13 = vld [vmem:[#allocation5 + $0x1d] sm:$0xff]  ;;  %v3236_v33 = vmul.f32 0.0, %v3227_v28  ;;  %v3293_v5 = vpack.c.bf16 %v3286_v38, %v3285_v15  ;;  %v6511_v28 = vld [vmem:[%s8354_s3 + $0x1f8] sm:$0xff]  ;;  %v6514_v38 = vld [vmem:[%s8354_s3 + $0x210] sm:$0xff] }
 0x3e6   :  { %v3451_v43 = vld [vmem:[#allocation5 + $0x1f] sm:$0xff]  ;;  %v3263_v54 = vmul.f32 %v3254_v13, %v6860_v61  ;;  %3940 = vmatpush.bf16.msra.mxu2 %v6511_v28  ;;  %4043 = vmatpush.bf16.msra.mxu3 %v6514_v38 }
 0x3e7   :  { %v3460_v9 = vmul.f32 %v3451_v43, %v6849_v57  ;;  %v3562_v30 = vmul.f32 %v3451_v43, %v6860_v61  ;;  %3246 = vst.msk [vmem:[#allocation5 + $0x28] sm:$0xff] %vm3241_vm11, %v3236_v33  ;;  %5967 = vmatmul.msk.bf16.gmra.mxu0 %vm25_vm0, %v3293_v5  ;;  %v6513_v43 = vld [vmem:[%s8354_s3 + $0x208] sm:$0xff] }
 0x3e8   :  { %v3270_v2 = vpack.c.bf16 %v3263_v54, %v3262_v41  ;;  %v3202_v50 = vpop.f32.mrf.mxu3  ;;  %v6509_v41 = vld [vmem:[%s8354_s3 + $0x1e8] sm:$0xff] }
 0x3e9   :  { %v3467_v62 = vpack.c.bf16 %v3460_v9, %v3459_v63  ;;  %v3569_v6 = vpack.c.bf16 %v3562_v30, %v3561_v29  ;;  %v3219_v17 = vadd.f32 %v3202_v50, %v3106_v7  ;;  %v6512_v29 = vld [vmem:[%s8354_s3 + $0x200] sm:$0xff] }
 0x3ea   :  { %5988 = vmatmul.msk.bf16.gmra.mxu1 %vm25_vm0, %v3270_v2  ;;  %3941 = vmatpush.bf16.msra.mxu2 %v6510_v47  ;;  %v8384_v2 = vld [vmem:[#allocation11_spill] sm:$0xff] }
 0x3eb   :  { %6017 = vmatmul.msk.bf16.gmra.mxu2 %vm25_vm0, %v3467_v62  ;;  %6046 = vmatmul.msk.bf16.gmra.mxu3 %vm25_vm0, %v3569_v6  ;;  %v3228_v0 = vmax.f32 %v3219_v17, 0.0  ;;  %v8385_v6 = vld [vmem:[#allocation9_spill] sm:$0xff] }
 0x3ec   :  { %4044 = vmatpush.bf16.msra.mxu3 %v6513_v43 }
 0x3ed   :  { %3247 = vst.msk [vmem:[#allocation5 + $0x30] sm:$0xff] %vm3241_vm11, %v3228_v0 }
 0x3ee   :  { %v3255_v36 = vld [vmem:[#allocation5 + $0x25] sm:$0xff]  ;;  %3942 = vmatpush.bf16.msra.mxu2 %v6509_v41  ;;  %v3977_v41 = vld [vmem:[#allocation5 + $0x12] sm:$0xff] }
 0x3ef   :  { %v3452_v11 = vld [vmem:[#allocation5 + $0x27] sm:$0xff]  ;;  %v3264_v46 = vmul.f32 %v3255_v36, %v6886_v25 }
 0x3f0   :  { %v3205_v34 = vpop.f32.mrf.mxu3  ;;  %v3287_v49 = vld [vmem:[#allocation5 + $0x26] sm:$0xff]  ;;  %v3461_v1 = vmul.f32 %v3452_v11, %v6873_v18  ;;  %v3563_v40 = vmul.f32 %v3452_v11, %v6886_v25  ;;  %v6519_v11 = vld [vmem:[%s8354_s3 + $0x238] sm:$0xff]  ;;  %4045 = vmatpush.bf16.msra.mxu3 %v6512_v29 }
 0x3f1   :  { %v3220_v58 = vadd.f32 %v3205_v34, %v7835_v32  ;;  %4153 = vmatpush.bf16.msrb.mxu0 %v6519_v11  ;;  %v3664_v29 = vld [vmem:[#allocation5 + $0x20] sm:$0xff] }
 0x3f2   :  { %3943 = vmatpush.bf16.msra.mxu2 %v6508_v44  ;;  %v3766_v44 = vld [vmem:[#allocation5 + $0x21] sm:$0xff] }
 0x3f3   :  { %v3229_v48 = vmax.f32 %v3220_v58, 0.0 }
 0x3f4   :  { %v3288_v35 = vld [vmem:[#allocation5 + $0x2e] sm:$0xff] }
 0x3f5   :  { %v3256_v31 = vld [vmem:[#allocation5 + $0x2d] sm:$0xff]  ;;  %3248 = vst.msk [vmem:[#allocation5 + $0x38] sm:$0xff] %vm3241_vm11, %v3229_v48  ;;  %v3294_v56 = vpack.c.bf16 %v3288_v35, %v3287_v49 }
 0x3f6   :  { %v3453_v45 = vld [vmem:[#allocation5 + $0x2f] sm:$0xff]  ;;  %v3265_v32 = vmul.f32 %v3256_v31, %v6889_v26 }
 0x3f7   :  { %v3462_v4 = vmul.f32 %v3453_v45, %v6876_v19  ;;  %v3564_v14 = vmul.f32 %v3453_v45, %v6889_v26  ;;  %5968 = vmatmul.msk.bf16.gmra.mxu0 %vm25_vm0, %v3294_v56  ;;  %v6523_v48 = vld [vmem:[%s8354_s3 + $0x258] sm:$0xff] }
 0x3f8   :  { %v3271_v16 = vpack.c.bf16 %v3265_v32, %v3264_v46  ;;  %v3207_v53 = vpop.f32.mrf.mxu3  ;;  %4255 = vmatpush.bf16.msrb.mxu1 %v6523_v48  ;;  %v8388_v46 = vld [vmem:[#allocation14_spill] sm:$0xff] }
 0x3f9   :  { %v3468_v23 = vpack.c.bf16 %v3462_v4, %v3461_v1  ;;  %v3570_v10 = vpack.c.bf16 %v3564_v14, %v3563_v40  ;;  %v3221_v42 = vadd.f32 %v3207_v53, %v3108_v37  ;;  %v8389_v1 = vld [vmem:[#allocation13_spill] sm:$0xff]  ;;  %v3662_v53 = vld [vmem:[#allocation5 + $0x10] sm:$0xff] }
 0x3fa   :  { %5989 = vmatmul.msk.bf16.gmra.mxu1 %vm25_vm0, %v3271_v16  ;;  %v6518_v16 = vld [vmem:[%s8354_s3 + $0x230] sm:$0xff] }
 0x3fb   :  { %6018 = vmatmul.msk.bf16.gmra.mxu2 %vm25_vm0, %v3468_v23  ;;  %6047 = vmatmul.msk.bf16.gmra.mxu3 %vm25_vm0, %v3570_v10  ;;  %v3230_v15 = vmax.f32 %v3221_v42, 0.0  ;;  %v6522_v23 = vld [vmem:[%s8354_s3 + $0x250] sm:$0xff]  ;;  %v3764_v10 = vld [vmem:[#allocation5 + $0x11] sm:$0xff] }
 0x3fc   :  { %v3257_v33 = vld [vmem:[#allocation5 + $0x35] sm:$0xff]  ;;  %4154 = vmatpush.bf16.msrb.mxu0 %v6518_v16  ;;  %4256 = vmatpush.bf16.msrb.mxu1 %v6522_v23  ;;  %v3763_v42 = vld [vmem:[#allocation5 + $0x9] sm:$0xff]  ;;  %v3773_v28 = vmul.f32 %v3764_v10, %v6713_v21  ;;  %v3875_v39 = vmul.f32 %v3764_v10, %v6735_v27  ;;  %v6517_v27 = vld [vmem:[%s8354_s3 + $0x228] sm:$0xff] }
 0x3fd   :  { %3249 = vst.msk [vmem:[#allocation5 + $0x40] sm:$0xff] %vm3241_vm11, %v3230_v15  ;;  %v3454_v5 = vld [vmem:[#allocation5 + $0x37] sm:$0xff]  ;;  %v3266_v62 = vmul.f32 %v3257_v33, %v8384_v2  ;;  %v3661_v15 = vld [vmem:[#allocation5 + $0x8] sm:$0xff]  ;;  %v3772_v38 = vmul.f32 %v3763_v42, %v6706_v20 }
 0x3fe   :  { %v3289_v9 = vld [vmem:[#allocation5 + $0x36] sm:$0xff]  ;;  %v3463_v59 = vmul.f32 %v3454_v5, %v8385_v6  ;;  %v3670_v47 = vpack.c.bf16 %v3662_v53, %v3661_v15  ;;  %v3976_v33 = vld [vmem:[#allocation5 + $0xa] sm:$0xff] }
 0x3ff   :  { %v3781_v43 = vpack.c.bf16 %v3773_v28, %v3772_v38  ;;  %v3768_v11 = vld [vmem:[#allocation5 + $0x31] sm:$0xff] }
 0x400   :  { %v3210_v13 = vpop.f32.mrf.mxu3  ;;  %4155 = vmatpush.bf16.msrb.mxu0 %v6517_v27  ;;  %v3777_v48 = vmul.f32 %v3768_v11, %v6876_v19  ;;  %v3667_v28 = vld [vmem:[#allocation5 + $0x38] sm:$0xff] }
 0x401   :  { %v3222_v63 = vadd.f32 %v3210_v13, %v7869_v52  ;;  %v3565_v52 = vmul.f32 %v3454_v5, %v8384_v2  ;;  %v3874_v13 = vmul.f32 %v3763_v42, %v6724_v24  ;;  %v3985_v5 = vpack.c.bf16 %v3977_v41, %v3976_v33  ;;  %v4624_v24 = vld [vmem:[%s8352_s1] sm:$0x1] }
 0x403   :  { %v3231_v54 = vmax.f32 %v3222_v63, 0.0  ;;  %v3883_v63 = vpack.c.bf16 %v3875_v39, %v3874_v13 }
 0x404   :  { %v3290_v30 = vld [vmem:[#allocation5 + $0x3e] sm:$0xff] }
 0x405   :  { %v3258_v7 = vld [vmem:[#allocation5 + $0x3d] sm:$0xff]  ;;  %3250 = vst.msk [vmem:[#allocation5 + $0x48] sm:$0xff] %vm3241_vm11, %v3231_v54  ;;  %v3295_v17 = vpack.c.bf16 %v3290_v30, %v3289_v9  ;;  %v6609_v54 = vmov 0  }
 0x406   :  { %v3455_v50 = vld [vmem:[#allocation5 + $0x3f] sm:$0xff]  ;;  %v3267_v3 = vmul.f32 %v3258_v7, %v8386_v22  ;;  %6560 = vset.pattern.permute.xlu0 %v6609_v54  ;;  %6562 = vset.pattern.permute.xlu1 %v6609_v54  ;;  %v3775_v7 = vmul.f32 %v3766_v44, %v6849_v57 }
 0x407   :  { %v3464_v0 = vmul.f32 %v3455_v50, %v8387_v12  ;;  %v3566_v51 = vmul.f32 %v3455_v50, %v8386_v22  ;;  %5969 = vmatmul.msk.bf16.gmra.mxu0 %vm25_vm0, %v3295_v17  ;;  %v6521_v9 = vld [vmem:[%s8354_s3 + $0x248] sm:$0xff]  ;;  %6564 = vset.pattern.permute.xlu2 %v6609_v54  ;;  %v6610_v50 = vmov 1  }
 0x408   :  { %v3272_v34 = vpack.c.bf16 %v3267_v3, %v3266_v62  ;;  %v3212_v8 = vpop.f32.mrf.mxu3  ;;  %4628 = vperm.xlu0 %6560, %v4624_v24   ;;  %4257 = vmatpush.bf16.msrb.mxu1 %v6521_v9  ;;  %v3765_v30 = vld [vmem:[#allocation5 + $0x19] sm:$0xff]  ;;  %v3877_v62 = vmul.f32 %v3766_v44, %v6860_v61 }
 0x409   :  { %v3469_v58 = vpack.c.bf16 %v3464_v0, %v3463_v59  ;;  %v3571_v36 = vpack.c.bf16 %v3566_v51, %v3565_v52  ;;  %v3663_v59 = vld [vmem:[#allocation5 + $0x18] sm:$0xff]  ;;  %v3774_v17 = vmul.f32 %v3765_v30, %v6843_v55  ;;  %v3876_v3 = vmul.f32 %v3765_v30, %v6856_v60  ;;  %v3979_v0 = vld [vmem:[#allocation5 + $0x22] sm:$0xff]  ;;  %v3666_v60 = vld [vmem:[#allocation5 + $0x30] sm:$0xff] }
 0x40a   :  { %5990 = vmatmul.msk.bf16.gmra.mxu1 %vm25_vm0, %v3272_v34  ;;  %v3671_v52 = vpack.c.bf16 %v3664_v29, %v3663_v59  ;;  %v6516_v61 = vld [vmem:[%s8354_s3 + $0x220] sm:$0xff]  ;;  %v3767_v8 = vld [vmem:[#allocation5 + $0x29] sm:$0xff] }
 0x40b   :  { %6019 = vmatmul.msk.bf16.gmra.mxu2 %vm25_vm0, %v3469_v58  ;;  %6048 = vmatmul.msk.bf16.gmra.mxu3 %vm25_vm0, %v3571_v36  ;;  %v3782_v51 = vpack.c.bf16 %v3775_v7, %v3774_v17  ;;  %v3884_v34 = vpack.c.bf16 %v3877_v62, %v3876_v3  ;;  %v3978_v58 = vld [vmem:[#allocation5 + $0x1a] sm:$0xff] }
 0x40c   :  { %v3259_v49 = vld [vmem:[#allocation5 + $0x45] sm:$0xff]  ;;  %v3986_v36 = vpack.c.bf16 %v3979_v0, %v3978_v58  ;;  %4156 = vmatpush.bf16.msrb.mxu0 %v6516_v61  ;;  %v3769_v23 = vld [vmem:[#allocation5 + $0x39] sm:$0xff] }
 0x40d   :  { %v3456_v35 = vld [vmem:[#allocation5 + $0x47] sm:$0xff]  ;;  %v3268_v45 = vmul.f32 %v3259_v49, %v8388_v46  ;;  %v3879_v49 = vmul.f32 %v3768_v11, %v6889_v26  ;;  %v3778_v15 = vmul.f32 %v3769_v23, %v8385_v6  ;;  %v3982_v33 = vld [vmem:[#allocation5 + $0x3a] sm:$0xff] }
 0x40e   :  { %v3291_v31 = vld [vmem:[#allocation5 + $0x46] sm:$0xff]  ;;  %v3465_v40 = vmul.f32 %v3456_v35, %v8389_v1  ;;  %v3567_v56 = vmul.f32 %v3456_v35, %v8388_v46 }
 0x40f   :  { %v3296_v32 = vpack.c.bf16 %v3291_v31, %v3291_v31  ;;  %v3273_v4 = vpack.c.bf16 %v3268_v45, %v3268_v45  ;;  %v3665_v35 = vld [vmem:[#allocation5 + $0x28] sm:$0xff]  ;;  %v3776_v45 = vmul.f32 %v3767_v8, %v6873_v18 }
 0x410   :  { %v3470_v14 = vpack.c.bf16 %v3465_v40, %v3465_v40  ;;  %v3572_v37 = vpack.c.bf16 %v3567_v56, %v3567_v56  ;;  %6561 = vset.pattern.permute.xlu0 %v6610_v50  ;;  %v3672_v31 = vpack.c.bf16 %v3666_v60, %v3665_v35  ;;  %v3878_v40 = vmul.f32 %v3767_v8, %v6886_v25  ;;  %v3981_v56 = vld [vmem:[#allocation5 + $0x32] sm:$0xff]  ;;  %v3770_v26 = vld [vmem:[#allocation5 + $0x41] sm:$0xff]  ;;  %v3771_v29 = vld [vmem:[#allocation5 + $0x49] sm:$0xff] }
 0x411   :  { %4634 = vperm.xlu0 %6561, %v4624_v24   ;;  %v3668_v25 = vld [vmem:[#allocation5 + $0x40] sm:$0xff]  ;;  %v3779_v10 = vmul.f32 %v3770_v26, %v8387_v12  ;;  %v3881_v53 = vmul.f32 %v3770_v26, %v8386_v22  ;;  %v3669_v30 = vld [vmem:[#allocation5 + $0x48] sm:$0xff]  ;;  %v3780_v7 = vmul.f32 %v3771_v29, %v8389_v1  ;;  %v3882_v62 = vmul.f32 %v3771_v29, %v8388_v46  ;;  %v4083_v29 = vld [vmem:[#allocation5 + $0x33] sm:$0xff] }
 0x412   :  { %v3673_v39 = vpack.c.bf16 %v3668_v25, %v3667_v28  ;;  %v3983_v38 = vld [vmem:[#allocation5 + $0x42] sm:$0xff]  ;;  %v3674_v3 = vpack.c.bf16 %v3669_v30, %v3669_v30  ;;  %v3984_v0 = vld [vmem:[#allocation5 + $0x4a] sm:$0xff] }
 0x413   :  { %v3785_v58 = vpack.c.bf16 %v3780_v7, %v3780_v7  ;;  %v3989_v61 = vpack.c.bf16 %v3984_v0, %v3984_v0  ;;  %v4189_v25 = vld [vmem:[#allocation4 + $0x8] sm:$0xff]  ;;  %v4081_v28 = vld [vmem:[#allocation5 + $0x23] sm:$0xff] }
 0x414   :  { %v4082_v7 = vld [vmem:[#allocation5 + $0x2b] sm:$0xff] }
 0x417   :  { %5970 = vmatmul.msk.bf16.gmra.mxu0 %vm25_vm0, %v3296_v32  ;;  %v3783_v32 = vpack.c.bf16 %v3777_v48, %v3776_v45  ;;  %v4078_v45 = vld [vmem:[#allocation5 + $0xb] sm:$0xff] }
 0x41a   :  { %5991 = vmatmul.msk.bf16.gmra.mxu1 %vm25_vm0, %v3273_v4  ;;  %v3885_v4 = vpack.c.bf16 %v3879_v49, %v3878_v40  ;;  %v4079_v49 = vld [vmem:[#allocation5 + $0x13] sm:$0xff] }
 0x41b   :  { %6020 = vmatmul.msk.bf16.gmra.mxu2 %vm25_vm0, %v3470_v14  ;;  %6049 = vmatmul.msk.bf16.gmra.mxu3 %vm25_vm0, %v3572_v37  ;;  %v3980_v14 = vld [vmem:[#allocation5 + $0x2a] sm:$0xff]  ;;  %v6520_v37 = vld [vmem:[%s8354_s3 + $0x240] sm:$0xff]  ;;  %v4088_v40 = vmul.f32 %v4079_v49, %v6713_v21 }
 0x41c   :  { %v3987_v16 = vpack.c.bf16 %v3981_v56, %v3980_v14  ;;  %4258 = vmatpush.bf16.msrb.mxu1 %v6520_v37  ;;  %v4087_v56 = vmul.f32 %v4078_v45, %v6706_v20  ;;  %v4190_v14 = vld [vmem:[#allocation4 + $0x10] sm:$0xff] }
 0x427   :  { %6074 = vmatmul.msk.bf16.vlgmr.msra.gmra.mxu0 %vm25_vm0, %v3670_v47  ;;  %v3880_v47 = vmul.f32 %v3769_v23, %v8384_v2  ;;  %v4198_v23 = vpack.c.bf16 %v4190_v14, %v4189_v25  ;;  %v5033_v14 = vld [vmem:[%s8352_s1 + $0x1] sm:$0x1] }
 0x428   :  { %5037 = vperm.xlu1 %6562, %v5033_v14  }
 0x42a   :  { %6103 = vmatmul.msk.bf16.vlgmr.msra.gmra.mxu1 %vm25_vm0, %v3781_v43  ;;  %v3784_v43 = vpack.c.bf16 %v3779_v10, %v3778_v15  ;;  %v4090_v15 = vmul.f32 %v4081_v28, %v6849_v57 }
 0x42b   :  { %6132 = vmatmul.msk.bf16.vlgmr.msra.gmra.mxu2 %vm25_vm0, %v3883_v63  ;;  %6161 = vmatmul.msk.bf16.vlgmr.msra.gmra.mxu3 %vm25_vm0, %v3985_v5  ;;  %v3886_v63 = vpack.c.bf16 %v3881_v53, %v3880_v47  ;;  %v3988_v5 = vpack.c.bf16 %v3983_v38, %v3982_v33 }
 0x430   :  { %6563 = vset.pattern.permute.xlu1 %v6610_v50 }
 0x431   :  { %5043 = vperm.xlu1 %6563, %v5033_v14  }
 0x437   :  { %6075 = vmatmul.msk.bf16.gmra.mxu0 %vm25_vm0, %v3671_v52 }
 0x43a   :  { %6104 = vmatmul.msk.bf16.gmra.mxu1 %vm25_vm0, %v3782_v51 }
 0x43b   :  { %6133 = vmatmul.msk.bf16.gmra.mxu2 %vm25_vm0, %v3884_v34  ;;  %6162 = vmatmul.msk.bf16.gmra.mxu3 %vm25_vm0, %v3986_v36  ;;  %v3887_v36 = vpack.c.bf16 %v3882_v62, %v3882_v62  ;;  %v4092_v62 = vmul.f32 %v4083_v29, %v6876_v19 }
 0x447   :  { %6076 = vmatmul.msk.bf16.gmra.mxu0 %vm25_vm0, %v3672_v31 }
 0x44a   :  { %6105 = vmatmul.msk.bf16.gmra.mxu1 %vm25_vm0, %v3783_v32 }
 0x44b   :  { %6134 = vmatmul.msk.bf16.gmra.mxu2 %vm25_vm0, %v3885_v4  ;;  %6163 = vmatmul.msk.bf16.gmra.mxu3 %vm25_vm0, %v3987_v16  ;;  %v4096_v16 = vpack.c.bf16 %v4088_v40, %v4087_v56  ;;  %v4085_v40 = vld [vmem:[#allocation5 + $0x43] sm:$0xff] }
 0x454   :  { %v3354_v42 = vpop.f32.mrf.mxu0 }
 0x457   :  { %v3425_v13 = vpop.f32.mrf.mxu1  ;;  %6077 = vmatmul.msk.bf16.gmra.mxu0 %vm25_vm0, %v3673_v39  ;;  %v4080_v39 = vld [vmem:[#allocation5 + $0x1b] sm:$0xff] }
 0x458   :  { %v3426_v41 = vadd.f32 %v3425_v13, %v3354_v42  ;;  %v4089_v47 = vmul.f32 %v4080_v39, %v6843_v55 }
 0x45a   :  { %6106 = vmatmul.msk.bf16.gmra.mxu1 %vm25_vm0, %v3784_v43 }
 0x45b   :  { %6135 = vmatmul.msk.bf16.gmra.mxu2 %vm25_vm0, %v3886_v63  ;;  %6164 = vmatmul.msk.bf16.gmra.mxu3 %vm25_vm0, %v3988_v5  ;;  %v4097_v63 = vpack.c.bf16 %v4090_v15, %v4089_v47  ;;  %v4191_v5 = vld [vmem:[#allocation4 + $0x18] sm:$0xff] }
 0x45c   :  { %v3356_v22 = vpop.f32.mrf.mxu0  ;;  %v4195_v47 = vld [vmem:[#allocation4 + $0x38] sm:$0xff] }
 0x45e   :  { %v3528_v54 = vpop.f32.mrf.mxu2  ;;  %v3630_v27 = vpop.f32.mrf.mxu3 }
 0x45f   :  { %v3551_v24 = vadd.f32 %v3528_v54, %v3426_v41  ;;  %v3427_v2 = vpop.f32.mrf.mxu1  ;;  %v4192_v41 = vld [vmem:[#allocation4 + $0x20] sm:$0xff] }
 0x460   :  { %v8071_v44 = vadd.f32 %v3427_v2, %v3356_v22  ;;  %v4199_v54 = vpack.c.bf16 %v4192_v41, %v4191_v5 }
 0x461   :  { %v8069_v9 = vadd.f32 %v3630_v27, %v3551_v24 }
 0x464   :  { %v3359_v59 = vpop.f32.mrf.mxu0 }
 0x466   :  { %v8075_v52 = vpop.f32.mrf.mxu2  ;;  %v8077_v17 = vpop.f32.mrf.mxu3 }
 0x467   :  { %v3430_v51 = vpop.f32.mrf.mxu1  ;;  %6078 = vmatmul.msk.bf16.gmra.mxu0 %vm25_vm0, %v3674_v3  ;;  %v3552_v41 = vadd.f32 %v8075_v52, %v8071_v44 }
 0x468   :  { %v3431_v34 = vadd.f32 %v3430_v51, %v3359_v59  ;;  %v4091_v59 = vmul.f32 %v4082_v7, %v6873_v18  ;;  %v4194_v51 = vld [vmem:[#allocation4 + $0x30] sm:$0xff]  ;;  %v6527_v18 = vld [vmem:[%s8355_s4 + $0x18] sm:$0xff] }
 0x469   :  { %4379 = vmatpush.bf16.msrb.mxu3 %v6527_v18  ;;  %v3654_v52 = vadd.f32 %v8077_v17, %v3552_v41 }
 0x46a   :  { %6107 = vmatmul.msk.bf16.gmra.mxu1 %vm25_vm0, %v3785_v58  ;;  %v4098_v58 = vpack.c.bf16 %v4092_v62, %v4091_v59  ;;  %v4086_v62 = vld [vmem:[#allocation5 + $0x4b] sm:$0xff] }
 0x46b   :  { %6136 = vmatmul.msk.bf16.gmra.mxu2 %vm25_vm0, %v3887_v36  ;;  %6165 = vmatmul.msk.bf16.gmra.mxu3 %vm25_vm0, %v3989_v61  ;;  %v4193_v61 = vld [vmem:[#allocation4 + $0x28] sm:$0xff] }
 0x46c   :  { %v3361_v46 = vpop.f32.mrf.mxu0 }
 0x46e   :  { %v3533_v11 = vpop.f32.mrf.mxu2  ;;  %v3635_v8 = vpop.f32.mrf.mxu3 }
 0x46f   :  { %v3553_v60 = vadd.f32 %v3533_v11, %v3431_v34  ;;  %v3432_v48 = vpop.f32.mrf.mxu1  ;;  %v4200_v11 = vpack.c.bf16 %v4194_v51, %v4193_v61 }
 0x470   :  { %v8085_v31 = vadd.f32 %v3432_v48, %v3361_v46 }
 0x471   :  { %v8083_v35 = vadd.f32 %v3635_v8, %v3553_v60  ;;  %v6525_v60 = vld [vmem:[%s8355_s4 + $0x8] sm:$0xff] }
 0x472   :  { %4344 = vmatpush.bf16.msrb.mxu2 %v6525_v60 }
 0x474   :  { %v3364_v32 = vpop.f32.mrf.mxu0 }
 0x476   :  { %v8089_v4 = vpop.f32.mrf.mxu2  ;;  %v8091_v37 = vpop.f32.mrf.mxu3 }
 0x477   :  { %v3435_v26 = vpop.f32.mrf.mxu1  ;;  %6190 = vmatmul.msk.bf16.vlgmr.msrb.gmra.mxu0 %vm25_vm0, %v4096_v16  ;;  %v4084_v16 = vld [vmem:[#allocation5 + $0x3b] sm:$0xff] }
 0x478   :  { %v4094_v26 = vmul.f32 %v4085_v40, %v8387_v12  ;;  %v4093_v25 = vmul.f32 %v4084_v16, %v8385_v6 }
 0x47a   :  { %6219 = vmatmul.msk.bf16.vlgmr.msrb.gmra.mxu1 %vm25_vm0, %v4198_v23  ;;  %v4629_v32 = vpop.permute.xlu0 %4628  ;;  %v4625_v23 = vld [vmem:[%s8356_s5 + $0x1] sm:$0x1]  ;;  %v4099_v39 = vpack.c.bf16 %v4094_v26, %v4093_v25 }
 0x47c   :  { %v3365_v10 = vpop.f32.mrf.mxu0 }
 0x47e   :  { %v3538_v53 = vpop.f32.mrf.mxu2  ;;  %v3640_v42 = vpop.f32.mrf.mxu3 }
 0x47f   :  { %v3436_v21 = vpop.f32.mrf.mxu1  ;;  %v4196_v42 = vld [vmem:[#allocation4 + $0x40] sm:$0xff] }
 0x480   :  { %v8095_v20 = vadd.f32 %v3436_v21, %v3365_v10  ;;  %v4201_v6 = vpack.c.bf16 %v4196_v42, %v4195_v47  ;;  %v6526_v42 = vld [vmem:[%s8355_s4 + $0x10] sm:$0xff] }
 0x481   :  { %4380 = vmatpush.bf16.msrb.mxu3 %v6526_v42  ;;  %v6531_v42 = vld [vmem:[%s8355_s4 + $0x38] sm:$0xff] }
 0x484   :  { %v3368_v38 = vpop.f32.mrf.mxu0 }
 0x485   :  { %4458 = vmatpush.bf16.msra.mxu3 %v6531_v42 }
 0x486   :  { %v8099_v13 = vpop.f32.mrf.mxu2  ;;  %v8101_v43 = vpop.f32.mrf.mxu3 }
 0x487   :  { %v3439_v33 = vpop.f32.mrf.mxu1  ;;  %6191 = vmatmul.msk.bf16.gmra.mxu0 %vm25_vm0, %v4097_v63  ;;  %v4632_v63 = vld [vmem:[%s8356_s5 + $0x2] sm:$0x1] }
 0x488   :  { %v3440_v22 = vadd.f32 %v3439_v33, %v3368_v38  ;;  %v4631_v38 = vmul.f32 %v4629_v32, %v4625_v23  ;;  %v4635_v33 = vpop.permute.xlu0 %4634 }
 0x489   :  { %v4637_v5 = vmul.f32 %v4635_v33, %v4632_v63 }
 0x48a   :  { %6220 = vmatmul.msk.bf16.gmra.mxu1 %vm25_vm0, %v4199_v54 }
 0x48b   :  { %v4638_v44 = vadd.f32 %v4637_v5, %v4631_v38  ;;  %v3555_v38 = vadd.f32 %v8099_v13, %v8095_v20 }
 0x48c   :  { %v8105_v24 = vpop.f32.mrf.mxu0 }
 0x48e   :  { %v3542_v57 = vpop.f32.mrf.mxu2  ;;  %v3644_v55 = vpop.f32.mrf.mxu3 }
 0x48f   :  { %v3556_v27 = vadd.f32 %v3542_v57, %v3440_v22  ;;  %v8107_v2 = vpop.f32.mrf.mxu1 }
 0x491   :  { %v8109_v30 = vadd.f32 %v3644_v55, %v3556_v27 }
 0x494   :  { %v3373_v3 = vpop.f32.mrf.mxu0 }
 0x496   :  { %v8113_v0 = vpop.f32.mrf.mxu2  ;;  %v8115_v34 = vpop.f32.mrf.mxu3 }
 0x497   :  { %v3444_v36 = vpop.f32.mrf.mxu1  ;;  %6192 = vmatmul.msk.bf16.gmra.mxu0 %vm25_vm0, %v4098_v58  ;;  %v4095_v58 = vmul.f32 %v4086_v62, %v8389_v1  ;;  %v3442_v62 = vadd.f32 %v8107_v2, %v8105_v24 }
 0x498   :  { %v3445_v46 = vadd.f32 %v3444_v36, %v3373_v3  ;;  %v4197_v36 = vld [vmem:[#allocation4 + $0x48] sm:$0xff] }
 0x499   :  { %v4100_v18 = vpack.c.bf16 %v4095_v58, %v4095_v58 }
 0x49a   :  { %6221 = vmatmul.msk.bf16.gmra.mxu1 %vm25_vm0, %v4200_v11 }
 0x49c   :  { %v3375_v19 = vpop.f32.mrf.mxu0 }
 0x49e   :  { %v3547_v8 = vpop.f32.mrf.mxu2  ;;  %v3649_v49 = vpop.f32.mrf.mxu3 }
 0x49f   :  { %v3558_v48 = vadd.f32 %v3547_v8, %v3445_v46  ;;  %v3446_v45 = vpop.f32.mrf.mxu1 }
 0x4a1   :  { %v8125_v56 = vadd.f32 %v3649_v49, %v3558_v48  ;;  %v4202_v48 = vpack.c.bf16 %v4197_v36, %v4197_v36  ;;  %v3554_v49 = vadd.f32 %v8089_v4, %v8085_v31  ;;  %v6524_v4 = vld [vmem:[%s8355_s4] sm:$0xff] }
 0x4a2   :  { %4345 = vmatpush.bf16.msrb.mxu2 %v6524_v4 }
 0x4a4   :  { %v3732_v53 = vpop.f32.mrf.mxu0 }
 0x4a5   :  { %v3755_v28 = vadd.f32 %v3732_v53, %v8069_v9  ;;  %v4639_v9 = vld [vmem:[%s8356_s5 + $0x3] sm:$0x1] }
 0x4a6   :  { %v3549_v10 = vpop.f32.mrf.mxu2  ;;  %v3651_v21 = vpop.f32.mrf.mxu3  ;;  %v4640_v57 = vadd.f32 %v4639_v9, %v4638_v44 }
 0x4a7   :  { %v3843_v15 = vpop.f32.mrf.mxu1  ;;  %6193 = vmatmul.msk.bf16.gmra.mxu0 %vm25_vm0, %v4099_v39 }
 0x4a8   :  { %v3866_v12 = vadd.f32 %v3843_v15, %v3755_v28  ;;  %v6296_v59 = vmul.f32 -1.442695, %v4640_v57 }
 0x4aa   :  { %6222 = vmatmul.msk.bf16.gmra.mxu1 %vm25_vm0, %v4201_v6  ;;  %6566 = vpow2.f32 %v6296_v59 }
 0x4ac   :  { %v3734_v22 = vpop.f32.mrf.mxu0 }
 0x4ad   :  { %v3756_v27 = vadd.f32 %v3734_v22, %v3654_v52  ;;  %v3657_v52 = vadd.f32 %v8101_v43, %v3555_v38  ;;  %v3557_v43 = vadd.f32 %v8113_v0, %v3442_v62  ;;  %v6530_v38 = vld [vmem:[%s8355_s4 + $0x30] sm:$0xff] }
 0x4ae   :  { %v3945_v54 = vpop.f32.mrf.mxu2  ;;  %v4047_v29 = vpop.f32.mrf.mxu3  ;;  %4459 = vmatpush.bf16.msra.mxu3 %v6530_v38 }
 0x4af   :  { %v3968_v55 = vadd.f32 %v3945_v54, %v3866_v12  ;;  %v3845_v7 = vpop.f32.mrf.mxu1 }
 0x4b0   :  { %v3867_v51 = vadd.f32 %v3845_v7, %v3756_v27  ;;  %v6567_v19 = vpop.eup %6566 }
 0x4b1   :  { %v8148_v3 = vadd.f32 %v4047_v29, %v3968_v55  ;;  %v4644_v1 = vadd.f32 1.0, %v6567_v19 }
 0x4b3   :  { %6568 = vrcp.f32 %v4644_v1  ;;  %vm4650_vm12 = vweird.f32 %v4644_v1  ;;  %v4654_v63 = vand.u32 2147483647, %v4644_v1  ;;  %v4656_v5 = vand.u32 2147483648, %v4644_v1 }
 0x4b4   :  { %v3737_v61 = vpop.f32.mrf.mxu0 }
 0x4b5   :  { %v3757_v17 = vadd.f32 %v3737_v61, %v8083_v35  ;;  %v3656_v35 = vadd.f32 %v8091_v37, %v3554_v49  ;;  %vm4655_vm15 = vcmp.eq.f32.partialorder %v4654_v63, 8.507059e+37  ;;  %v4657_v44 = vor.u32 1.1754944e-38, %v4656_v5 }
 0x4b6   :  { %v3947_v46 = vpop.f32.mrf.mxu2  ;;  %v4049_v60 = vpop.f32.mrf.mxu3 }
 0x4b7   :  { %v3969_v11 = vadd.f32 %v3947_v46, %v3867_v51  ;;  %v3848_v8 = vpop.f32.mrf.mxu1  ;;  %6194 = vmatmul.msk.bf16.gmra.mxu0 %vm25_vm0, %v4100_v18 }
 0x4b8   :  { %v3868_v40 = vadd.f32 %v3848_v8, %v3757_v17  ;;  %v3659_v17 = vadd.f32 %v8115_v34, %v3557_v43  ;;  %v6534_v43 = vld [vmem:[%s8355_s4 + $0x50] sm:$0xff] }
 0x4b9   :  { %v8154_v45 = vadd.f32 %v4049_v60, %v3969_v11  ;;  %v6569_v10 = vpop.eup %6568 }
 0x4ba   :  { %6223 = vmatmul.msk.bf16.gmra.mxu1 %vm25_vm0, %v4202_v48  ;;  %v4646_v37 = vmul.f32 %v6569_v10, %v4644_v1  ;;  %vm4651_vm13 = vweird.f32 %v6569_v10 }
 0x4bb   :  { %vm4652_vm14 = vmor %vm4650_vm12, %vm4651_vm13  ;;  %vm4705_vm13 = vcmask 0  }
 0x4bc   :  { %v3739_v32 = vpop.f32.mrf.mxu0  ;;  %v4647_v39 = vsub.f32 1.0, %v4646_v37 }
 0x4bd   :  { %v3758_v16 = vadd.f32 %v3739_v32, %v3656_v35 }
 0x4be   :  { %v3950_v14 = vpop.f32.mrf.mxu2  ;;  %v4052_v25 = vpop.f32.mrf.mxu3  ;;  %v4648_v12 = vmul.f32 %v6569_v10, %v4647_v39 }
 0x4bf   :  { %v3970_v26 = vadd.f32 %v3950_v14, %v3868_v40  ;;  %v3850_v23 = vpop.f32.mrf.mxu1 }
 0x4c0   :  { %v3869_v31 = vadd.f32 %v3850_v23, %v3758_v16  ;;  %v4649_v33 = vadd.f32 %v6569_v10, %v4648_v12  ;;  %v6545_v23 = vld [vmem:[%s8355_s4 + $0x28] sm:$0xff] }
 0x4c1   :  { %v8159_v53 = vadd.f32 %v4052_v25, %v3970_v26  ;;  %4832 = vmatpush.bf16.msra.mxu0 %v6545_v23 }
 0x4c2   :  { %v4653_v9 = vsel %vm4652_vm14, %v6569_v10, %v4649_v33  ;;  %v6547_v10 = vld [vmem:[%s8355_s4 + $0x38] sm:$0xff]  ;;  %vm4714_vm14 = vcmask 8200  }
 0x4c3   :  { %v4658_v57 = vsel %vm4655_vm15, %v4657_v44, %v4653_v9  ;;  %4867 = vmatpush.bf16.msra.mxu1 %v6547_v10 }
 0x4c4   :  { %v3742_v21 = vpop.f32.mrf.mxu0  ;;  %4670 = vperm.xlu1 %6563, %v4658_v57   ;;  %4664 = vperm.xlu2 %6564, %v4658_v57  }
 0x4c6   :  { %v3952_v28 = vpop.f32.mrf.mxu2  ;;  %v4054_v47 = vpop.f32.mrf.mxu3 }
 0x4c7   :  { %v3971_v15 = vadd.f32 %v3952_v28, %v3869_v31  ;;  %v3853_v41 = vpop.f32.mrf.mxu1  ;;  %v6528_v28 = vld [vmem:[%s8355_s4 + $0x20] sm:$0xff] }
 0x4c9   :  { %v8169_v6 = vadd.f32 %v4054_v47, %v3971_v15 }
 0x4cc   :  { %v3743_v22 = vpop.f32.mrf.mxu0 }
 0x4cd   :  { %v3759_v27 = vadd.f32 %v3743_v22, %v3657_v52 }
 0x4ce   :  { %v3955_v54 = vpop.f32.mrf.mxu2  ;;  %v4057_v20 = vpop.f32.mrf.mxu3 }
 0x4cf   :  { %v3854_v13 = vpop.f32.mrf.mxu1  ;;  %v6533_v20 = vld [vmem:[%s8355_s4 + $0x48] sm:$0xff] }
 0x4d0   :  { %v3870_v55 = vadd.f32 %v3854_v13, %v3759_v27 }
 0x4d4   :  { %v3746_v29 = vpop.f32.mrf.mxu0 }
 0x4d5   :  { %v3760_v59 = vadd.f32 %v3746_v29, %v8109_v30 }
 0x4d6   :  { %v3956_v7 = vpop.f32.mrf.mxu2  ;;  %v4058_v58 = vpop.f32.mrf.mxu3 }
 0x4d7   :  { %v3972_v51 = vadd.f32 %v3956_v7, %v3870_v55  ;;  %v3857_v36 = vpop.f32.mrf.mxu1  ;;  %v6535_v7 = vld [vmem:[%s8355_s4 + $0x58] sm:$0xff] }
 0x4d8   :  { %v3871_v46 = vadd.f32 %v3857_v36, %v3760_v59 }
 0x4d9   :  { %v8176_v61 = vadd.f32 %v4058_v58, %v3972_v51  ;;  %v6532_v58 = vld [vmem:[%s8355_s4 + $0x40] sm:$0xff] }
 0x4dc   :  { %v3748_v11 = vpop.f32.mrf.mxu0 }
 0x4dd   :  { %v3761_v18 = vadd.f32 %v3748_v11, %v3659_v17 }
 0x4de   :  { %v3959_v60 = vpop.f32.mrf.mxu2  ;;  %v4061_v8 = vpop.f32.mrf.mxu3 }
 0x4df   :  { %v3973_v19 = vadd.f32 %v3959_v60, %v3871_v46  ;;  %v3859_v48 = vpop.f32.mrf.mxu1 }
 0x4e0   :  { %v3872_v24 = vadd.f32 %v3859_v48, %v3761_v18 }
 0x4e1   :  { %v8179_v49 = vadd.f32 %v4061_v8, %v3973_v19 }
 0x4e4   :  { %v3751_v2 = vpop.f32.mrf.mxu0 }
 0x4e5   :  { %v3762_v40 = vadd.f32 %v3751_v2, %v8125_v56  ;;  %v6529_v56 = vld [vmem:[%s8355_s4 + $0x28] sm:$0xff] }
 0x4e6   :  { %v3961_v30 = vpop.f32.mrf.mxu2  ;;  %v4063_v0 = vpop.f32.mrf.mxu3  ;;  %4423 = vmatpush.bf16.msra.mxu2 %v6529_v56 }
 0x4e7   :  { %v3974_v1 = vadd.f32 %v3961_v30, %v3872_v24  ;;  %v3862_v35 = vpop.f32.mrf.mxu1  ;;  %v6537_v24 = vld [vmem:[%s8355_s4 + $0x68] sm:$0xff]  ;;  %v6539_v30 = vld [vmem:[%s8355_s4 + $0x78] sm:$0xff] }
 0x4e8   :  { %v3873_v14 = vadd.f32 %v3862_v35, %v3762_v40  ;;  %v6544_v40 = vld [vmem:[%s8355_s4 + $0x20] sm:$0xff] }
 0x4e9   :  { %v8182_v32 = vadd.f32 %v4063_v0, %v3974_v1  ;;  %4833 = vmatpush.bf16.msra.mxu0 %v6544_v40 }
 0x4ea   :  { %4424 = vmatpush.bf16.msra.mxu2 %v6528_v28 }
 0x4ec   :  { %v3753_v34 = vpop.f32.mrf.mxu0 }
 0x4ee   :  { %v3964_v16 = vpop.f32.mrf.mxu2  ;;  %v4066_v25 = vpop.f32.mrf.mxu3 }
 0x4ef   :  { %v3975_v26 = vadd.f32 %v3964_v16, %v3873_v14  ;;  %v3864_v31 = vpop.f32.mrf.mxu1  ;;  %v6546_v14 = vld [vmem:[%s8355_s4 + $0x30] sm:$0xff]  ;;  %v6536_v16 = vld [vmem:[%s8355_s4 + $0x60] sm:$0xff] }
 0x4f0   :  { %4868 = vmatpush.bf16.msra.mxu1 %v6546_v14 }
 0x4f1   :  { %v8193_v4 = vadd.f32 %v4066_v25, %v3975_v26  ;;  %v5038_v25 = vpop.permute.xlu1 %5037 }
 0x4f4   :  { %v4158_v21 = vpop.f32.mrf.mxu0 }
 0x4f5   :  { %v4181_v15 = vadd.f32 %v4158_v21, %v8148_v3  ;;  %v5034_v21 = vld [vmem:[%s8356_s5 + $0x1] sm:$0x1] }
 0x4f6   :  { %v3966_v37 = vpop.f32.mrf.mxu2  ;;  %v4068_v39 = vpop.f32.mrf.mxu3 }
 0x4f7   :  { %v4260_v47 = vpop.f32.mrf.mxu1  ;;  %v5040_v39 = vmul.f32 %v5038_v25, %v5034_v21 }
 0x4f8   :  { %v4283_v41 = vadd.f32 %v4260_v47, %v4181_v15  ;;  %v5041_v15 = vld [vmem:[%s8356_s5 + $0x2] sm:$0x1] }
 0x4f9   :  { %v5044_v47 = vpop.permute.xlu1 %5043 }
 0x4fa   :  { %v4291_v12 = vmax.f32 %v4283_v41, 0.0  ;;  %v5046_v38 = vmul.f32 %v5044_v47, %v5041_v15  ;;  %v6553_v41 = vld [vmem:[%s8355_s4 + $0x68] sm:$0xff] }
 0x4fb   :  { %4990 = vmatpush.bf16.msrb.mxu0 %v6553_v41 }
 0x4fc   :  { %v4309_v63 = vrot.slane %v4291_v12, 2  ;;  %v4160_v33 = vpop.f32.mrf.mxu0  ;;  %v4312_v9 = vrot.slane %v4291_v12, 4  ;;  %v4315_v54 = vrot.slane %v4291_v12, 6 }
 0x4fd   :  { %v4182_v44 = vadd.f32 %v4160_v33, %v8154_v45  ;;  %v6541_v33 = vld [vmem:[%s8355_s4 + $0x8] sm:$0xff] }
 0x4fe   :  { %v4311_v5 = vadd.f32 %v4309_v63, %v4291_v12 }
 0x4ff   :  { %v4262_v52 = vpop.f32.mrf.mxu1 }
 0x500   :  { %v4314_v22 = vadd.f32 %v4312_v9, %v4311_v5  ;;  %v4284_v57 = vadd.f32 %v4262_v52, %v4182_v44  ;;  %v5047_v5 = vadd.f32 %v5046_v38, %v5040_v39  ;;  %v6555_v9 = vld [vmem:[%s8355_s4 + $0x78] sm:$0xff]  ;;  %v5048_v44 = vld [vmem:[%s8356_s5 + $0x3] sm:$0x1] }
 0x501   :  { %5025 = vmatpush.bf16.msrb.mxu1 %v6555_v9 }
 0x502   :  { %v4317_v3 = vadd.f32 %v4315_v54, %v4314_v22  ;;  %v4292_v27 = vmax.f32 %v4284_v57, 0.0  ;;  %v6543_v54 = vld [vmem:[%s8355_s4 + $0x18] sm:$0xff]  ;;  %v5049_v57 = vadd.f32 %v5048_v44, %v5047_v5 }
 0x504   :  { %v4318_v13 = vpack.c.bf16 %v4317_v3, %v4317_v3  ;;  %v4388_v55 = vrot.slane %v4292_v27, 2  ;;  %v4163_v29 = vpop.f32.mrf.mxu0  ;;  %v4391_v36 = vrot.slane %v4292_v27, 4  ;;  %v6552_v3 = vld [vmem:[%s8355_s4 + $0x60] sm:$0xff] }
 0x505   :  { %v4183_v45 = vadd.f32 %v4163_v29, %v8159_v53  ;;  %v4394_v53 = vrot.slane %v4292_v27, 6  ;;  %v6370_v29 = vmul.f32 -1.442695, %v5049_v57  ;;  %4991 = vmatpush.bf16.msrb.mxu0 %v6552_v3 }
 0x506   :  { %v4356_v62 = vshrl.u32 %v4318_v13, 16  ;;  %v4390_v59 = vadd.f32 %v4388_v55, %v4292_v27  ;;  %6232 = vmatmul.msk.bf16.vlgmr.msrb.gmra.mxu2 %vm3241_vm11, %v4318_v13 }
 0x507   :  { %v4265_v51 = vpop.f32.mrf.mxu1  ;;  %4502 = vmatpush.bf16.msrb.mxu2 %v6533_v20  ;;  %6570 = vpow2.f32 %v6370_v29 }
 0x508   :  { %6241 = vmatmul.msk.bf16.vlgmr.msrb.gmra.mxu3 %vm3241_vm11, %v4356_v62  ;;  %v4393_v46 = vadd.f32 %v4391_v36, %v4390_v59  ;;  %v4285_v17 = vadd.f32 %v4265_v51, %v4183_v45 }
 0x509   :  { %4537 = vmatpush.bf16.msrb.mxu3 %v6535_v7  ;;  %v6540_v7 = vld [vmem:[%s8355_s4] sm:$0xff] }
 0x50a   :  { %v4396_v60 = vadd.f32 %v4394_v53, %v4393_v46  ;;  %v4293_v18 = vmax.f32 %v4285_v17, 0.0 }
 0x50b   :  { %4503 = vmatpush.bf16.msrb.mxu2 %v6532_v58 }
 0x50c   :  { %v4165_v11 = vpop.f32.mrf.mxu0  ;;  %v4397_v8 = vpack.c.bf16 %v4396_v60, %v4396_v60  ;;  %v4467_v48 = vrot.slane %v4293_v18, 2  ;;  %v4470_v26 = vrot.slane %v4293_v18, 4  ;;  %v4473_v56 = vrot.slane %v4293_v18, 6 }
 0x50d   :  { %4538 = vmatpush.bf16.msrb.mxu3 %v6534_v43  ;;  %v4184_v35 = vadd.f32 %v4165_v11, %v8169_v6  ;;  %v6538_v6 = vld [vmem:[%s8355_s4 + $0x70] sm:$0xff] }
 0x50e   :  { %v4435_v1 = vshrl.u32 %v4397_v8, 16  ;;  %v4469_v0 = vadd.f32 %v4467_v48, %v4293_v18  ;;  %v6571_v18 = vpop.eup %6570 }
 0x50f   :  { %v4267_v19 = vpop.f32.mrf.mxu1 }
 0x510   :  { %v4472_v23 = vadd.f32 %v4470_v26, %v4469_v0  ;;  %v4286_v10 = vadd.f32 %v4267_v19, %v4184_v35 }
 0x512   :  { %v4475_v42 = vadd.f32 %v4473_v56, %v4472_v23  ;;  %v4294_v37 = vmax.f32 %v4286_v10, 0.0  ;;  %v6548_v56 = vld [vmem:[%s8355_s4 + $0x40] sm:$0xff] }
 0x514   :  { %v4168_v2 = vpop.f32.mrf.mxu0  ;;  %v4476_v12 = vpack.c.bf16 %v4475_v42, %v4475_v42  ;;  %v4546_v63 = vrot.slane %v4294_v37, 2  ;;  %v4549_v62 = vrot.slane %v4294_v37, 4  ;;  %v4552_v36 = vrot.slane %v4294_v37, 6 }
 0x516   :  { %6250 = vmatmul.msk.bf16.vlgmr.msra.gmra.mxu2 %vm3241_vm11, %v4397_v8  ;;  %v4514_v27 = vshrl.u32 %v4476_v12, 16  ;;  %v4548_v20 = vadd.f32 %v4546_v63, %v4294_v37 }
 0x517   :  { %v4270_v34 = vpop.f32.mrf.mxu1  ;;  %4581 = vmatpush.bf16.msra.mxu2 %v6537_v24  ;;  %v5053_v24 = vadd.f32 1.0, %v6571_v18 }
 0x518   :  { %6259 = vmatmul.msk.bf16.vlgmr.msra.gmra.mxu3 %vm3241_vm11, %v4435_v1  ;;  %v4551_v51 = vadd.f32 %v4549_v62, %v4548_v20  ;;  %v6549_v1 = vld [vmem:[%s8355_s4 + $0x48] sm:$0xff]  ;;  %v6551_v34 = vld [vmem:[%s8355_s4 + $0x58] sm:$0xff] }
 0x519   :  { %4616 = vmatpush.bf16.msra.mxu3 %v6539_v30  ;;  %6572 = vrcp.f32 %v5053_v24  ;;  %v5065_v15 = vand.u32 2147483648, %v5053_v24  ;;  %vm5059_vm0 = vweird.f32 %v5053_v24  ;;  %v5063_v38 = vand.u32 2147483647, %v5053_v24 }
 0x51a   :  { %v4554_v53 = vadd.f32 %v4552_v36, %v4551_v51 }
 0x51b   :  { %4582 = vmatpush.bf16.msra.mxu2 %v6536_v16  ;;  %vm5064_vm3 = vcmp.eq.f32.partialorder %v5063_v38, 8.507059e+37 }
 0x51c   :  { %v4169_v31 = vpop.f32.mrf.mxu0  ;;  %v4555_v30 = vpack.c.bf16 %v4554_v53, %v4554_v53 }
 0x51d   :  { %4617 = vmatpush.bf16.msra.mxu3 %v6538_v6  ;;  %v4185_v52 = vadd.f32 %v4169_v31, %v8176_v61  ;;  %v6554_v61 = vld [vmem:[%s8355_s4 + $0x70] sm:$0xff] }
 0x51e   :  { %5026 = vmatpush.bf16.msrb.mxu1 %v6554_v61  ;;  %v4593_v16 = vshrl.u32 %v4555_v30, 16 }
 0x51f   :  { %v4271_v28 = vpop.f32.mrf.mxu1  ;;  %v6573_v31 = vpop.eup %6572 }
 0x520   :  { %v4287_v45 = vadd.f32 %v4271_v28, %v4185_v52  ;;  %v5055_v37 = vmul.f32 %v6573_v31, %v5053_v24  ;;  %vm5060_vm1 = vweird.f32 %v6573_v31  ;;  %v5066_v52 = vor.u32 1.1754944e-38, %v5065_v15 }
 0x521   :  { %vm5061_vm2 = vmor %vm5059_vm0, %vm5060_vm1 }
 0x522   :  { %v4295_v46 = vmax.f32 %v4287_v45, 0.0  ;;  %v5056_v47 = vsub.f32 1.0, %v5055_v37 }
 0x524   :  { %v4172_v22 = vpop.f32.mrf.mxu0  ;;  %v4718_v2 = vrot.slane %v4295_v46, 2  ;;  %v4721_v23 = vrot.slane %v4295_v46, 4  ;;  %v4724_v21 = vrot.slane %v4295_v46, 6 }
 0x525   :  { %v4186_v13 = vadd.f32 %v4172_v22, %v8179_v49  ;;  %v6542_v49 = vld [vmem:[%s8355_s4 + $0x10] sm:$0xff] }
 0x526   :  { %6268 = vmatmul.msk.bf16.vlgmr.msrb.gmra.mxu2 %vm3241_vm11, %v4476_v12  ;;  %v4720_v35 = vadd.f32 %v4718_v2, %v4295_v46 }
 0x527   :  { %v4274_v55 = vpop.f32.mrf.mxu1  ;;  %4753 = vmatpush.bf16.msrb.mxu2 %v6541_v33  ;;  %v5057_v33 = vmul.f32 %v6573_v31, %v5056_v47 }
 0x528   :  { %v4288_v59 = vadd.f32 %v4274_v55, %v4186_v13  ;;  %6277 = vmatmul.msk.bf16.vlgmr.msrb.gmra.mxu3 %vm3241_vm11, %v4514_v27 }
 0x529   :  { %4788 = vmatpush.bf16.msrb.mxu3 %v6543_v54  ;;  %v5058_v54 = vadd.f32 %v6573_v31, %v5057_v33 }
 0x52a   :  { %v4296_v58 = vmax.f32 %v4288_v59, 0.0 }
 0x52b   :  { %4754 = vmatpush.bf16.msrb.mxu2 %v6540_v7  ;;  %v5062_v27 = vsel %vm5061_vm2, %v6573_v31, %v5058_v54 }
 0x52c   :  { %v4797_v43 = vrot.slane %v4296_v58, 2  ;;  %v4174_v17 = vpop.f32.mrf.mxu0  ;;  %v4800_v60 = vrot.slane %v4296_v58, 4  ;;  %v4803_v48 = vrot.slane %v4296_v58, 6  ;;  %v5067_v55 = vsel %vm5064_vm3, %v5066_v52, %v5062_v27 }
 0x52d   :  { %4789 = vmatpush.bf16.msrb.mxu3 %v6542_v49  ;;  %v4187_v25 = vadd.f32 %v4174_v17, %v8182_v32  ;;  %v4723_v32 = vadd.f32 %v4721_v23, %v4720_v35  ;;  %5073 = vperm.xlu2 %6564, %v5067_v55   ;;  %v4660_v35 = vld [vmem:[%s8355_s4 + $0x80] sm:$0x1]  ;;  %v4665_v23 = vpop.permute.xlu2 %4664 }
 0x52e   :  { %v4799_v11 = vadd.f32 %v4797_v43, %v4296_v58 }
 0x52f   :  { %v4276_v19 = vpop.f32.mrf.mxu1  ;;  %v4726_v12 = vadd.f32 %v4724_v21, %v4723_v32 }
 0x530   :  { %v4802_v8 = vadd.f32 %v4800_v60, %v4799_v11  ;;  %v4289_v28 = vadd.f32 %v4276_v19, %v4187_v25  ;;  %v4661_v25 = vunpack.c.l.bf16 %v4660_v35 }
 0x531   :  { %v4727_v20 = vpack.c.bf16 %v4726_v12, %v4726_v12 }
 0x532   :  { %v4805_v40 = vadd.f32 %v4803_v48, %v4802_v8  ;;  %v4297_v5 = vmax.f32 %v4289_v28, 0.0  ;;  %v4667_v37 = vmul.f32 %v4665_v23, %v4661_v25 }
 0x533   :  { %v4765_v7 = vshrl.u32 %v4727_v20, 16 }
 0x534   :  { %v4806_v0 = vpack.c.bf16 %v4805_v40, %v4805_v40  ;;  %v4177_v14 = vpop.f32.mrf.mxu0  ;;  %v4876_v13 = vrot.slane %v4297_v5, 2  ;;  %v4879_v45 = vrot.slane %v4297_v5, 4  ;;  %v4882_v51 = vrot.slane %v4297_v5, 6 }
 0x535   :  { %v4188_v6 = vadd.f32 %v4177_v14, %v8193_v4  ;;  %v6550_v4 = vld [vmem:[%s8355_s4 + $0x50] sm:$0xff]  ;;  %6565 = vset.pattern.permute.xlu2 %v6610_v50  ;;  %v4307_v50 = vld [vmem:[%s8356_s5] sm:$0x1] }
 0x536   :  { %v4844_v26 = vshrl.u32 %v4806_v0, 16  ;;  %6286 = vmatmul.msk.bf16.vlgmr.msra.gmra.mxu2 %vm3241_vm11, %v4555_v30  ;;  %6324 = vmatmul.msk.bf16.vlgmr.msra.gmra.mxu0 %vm3241_vm11, %v4806_v0  ;;  %v4878_v62 = vadd.f32 %v4876_v13, %v4297_v5  ;;  %v4671_v31 = vpop.permute.xlu1 %4670  ;;  %v4716_v5 = vld [vmem:[%s8356_s5] sm:$0x1] }
 0x537   :  { %v4279_v10 = vpop.f32.mrf.mxu1  ;;  %4911 = vmatpush.bf16.msra.mxu2 %v6549_v1  ;;  %5079 = vperm.xlu2 %6565, %v5067_v55  }
 0x538   :  { %v4290_v42 = vadd.f32 %v4279_v10, %v4188_v6  ;;  %6295 = vmatmul.msk.bf16.vlgmr.msra.gmra.mxu3 %vm3241_vm11, %v4593_v16  ;;  %6333 = vmatmul.msk.bf16.vlgmr.msra.gmra.mxu1 %vm3241_vm11, %v4844_v26  ;;  %v4881_v49 = vadd.f32 %v4879_v45, %v4878_v62 }
 0x539   :  { %4946 = vmatpush.bf16.msra.mxu3 %v6551_v34 }
 0x53a   :  { %v4298_v39 = vmax.f32 %v4290_v42, 0.0  ;;  %v4884_v58 = vadd.f32 %v4882_v51, %v4881_v49 }
 0x53b   :  { %4912 = vmatpush.bf16.msra.mxu2 %v6548_v56  ;;  %v4674_v56 = vrot.slane %v4661_v25, 1 }
 0x53c   :  { %v4955_v41 = vrot.slane %v4298_v39, 2  ;;  %v4179_v63 = vpop.f32.mrf.mxu0  ;;  %v4958_v44 = vrot.slane %v4298_v39, 4  ;;  %v4961_v3 = vrot.slane %v4298_v39, 6  ;;  %v4885_v36 = vpack.c.bf16 %v4884_v58, %v4884_v58 }
 0x53d   :  { %4947 = vmatpush.bf16.msra.mxu3 %v6550_v4 }
 0x53e   :  { %v4957_v9 = vadd.f32 %v4955_v41, %v4298_v39  ;;  %v4923_v43 = vshrl.u32 %v4885_v36, 16  ;;  %v4676_v39 = vmul.f32 %v4674_v56, %v4671_v31 }
 0x53f   :  { %v4281_v22 = vpop.f32.mrf.mxu1 }
 0x540   :  { %v4960_v57 = vadd.f32 %v4958_v44, %v4957_v9 }
 0x542   :  { %v4963_v61 = vadd.f32 %v4961_v3, %v4960_v57 }
 0x544   :  { %v4964_v29 = vpack.c.bf16 %v4963_v61, %v4963_v61 }
 0x546   :  { %v5002_v59 = vshrl.u32 %v4964_v29, 16  ;;  %6306 = vmatmul.msk.bf16.vlgmr.msrb.gmra.mxu2 %vm3241_vm11, %v4727_v20  ;;  %6360 = vmatmul.msk.bf16.vlgmr.msrb.gmra.mxu0 %vm3241_vm11, %v4964_v29 }
 0x548   :  { %6315 = vmatmul.msk.bf16.vlgmr.msrb.gmra.mxu3 %vm3241_vm11, %v4765_v7  ;;  %6369 = vmatmul.msk.bf16.vlgmr.msrb.gmra.mxu1 %vm3241_vm11, %v5002_v59  ;;  %v5069_v59 = vld [vmem:[%s8355_s4 + $0x80] sm:$0x1] }
 0x556   :  { %6342 = vmatmul.msk.bf16.vlgmr.msra.gmra.mxu2 %vm3241_vm11, %v4885_v36 }
 0x558   :  { %6351 = vmatmul.msk.bf16.vlgmr.msra.gmra.mxu3 %vm3241_vm11, %v4923_v43  ;;  %v5070_v43 = vunpack.c.l.bf16 %v5069_v59 }
 0x587   :  { %v5074_v7 = vpop.permute.xlu2 %5073 }
 0x589   :  { %v4347_v46 = vpop.f32.mrf.mxu2 }
 0x58a   :  { %v4351_v48 = vadd.f32 %v4347_v46, %v4307_v50 }
 0x58b   :  { %v4382_v17 = vpop.f32.mrf.mxu3 }
 0x58c   :  { %v4386_v30 = vadd.f32 %v4382_v17, %v4351_v48  ;;  %v5083_v48 = vrot.slane %v5070_v43, 1 }
 0x591   :  { %v4349_v53 = vpop.f32.mrf.mxu2 }
 0x593   :  { %v4384_v11 = vpop.f32.mrf.mxu3 }
 0x599   :  { %v4426_v60 = vpop.f32.mrf.mxu2 }
 0x59a   :  { %v4430_v40 = vadd.f32 %v4426_v60, %v4386_v30  ;;  %v4707_v60 = vld [vmem:[%s8356_s5 + $0x6] sm:$0x1] }
 0x59b   :  { %v4461_v18 = vpop.f32.mrf.mxu3 }
 0x59c   :  { %v4465_v0 = vadd.f32 %v4461_v18, %v4430_v40  ;;  %v4697_v18 = vld [vmem:[%s8356_s5 + $0x5] sm:$0x1]  ;;  %v5080_v40 = vpop.permute.xlu2 %5079 }
 0x5a1   :  { %v4428_v19 = vpop.f32.mrf.mxu2 }
 0x5a3   :  { %v4463_v8 = vpop.f32.mrf.mxu3 }
 0x5a9   :  { %v4505_v24 = vpop.f32.mrf.mxu2 }
 0x5aa   :  { %v4509_v16 = vadd.f32 %v4505_v24, %v4465_v0 }
 0x5ab   :  { %v4540_v2 = vpop.f32.mrf.mxu3 }
 0x5ac   :  { %v4544_v6 = vadd.f32 %v4540_v2, %v4509_v16  ;;  %v5085_v16 = vmul.f32 %v5083_v48, %v5080_v40 }
 0x5b1   :  { %v4507_v1 = vpop.f32.mrf.mxu2 }
 0x5b2   :  { %v5076_v1 = vmul.f32 %v5074_v7, %v5070_v43 }
 0x5b3   :  { %v4542_v14 = vpop.f32.mrf.mxu3  ;;  %v4835_v34 = vpop.f32.mrf.mxu0 }
 0x5b5   :  { %v4870_v26 = vpop.f32.mrf.mxu1 }
 0x5b9   :  { %v4584_v10 = vpop.f32.mrf.mxu2 }
 0x5ba   :  { %v4588_v42 = vadd.f32 %v4584_v10, %v4544_v6 }
 0x5bb   :  { %v4619_v32 = vpop.f32.mrf.mxu3  ;;  %v4837_v4 = vpop.f32.mrf.mxu0 }
 0x5bc   :  { %v4623_v21 = vadd.f32 %v4619_v32, %v4588_v42 }
 0x5bd   :  { %v4872_v28 = vpop.f32.mrf.mxu1 }
 0x5be   :  { %v4668_v15 = vadd.f32 %v4667_v37, %v4623_v21 }
 0x5c0   :  { %v4677_v47 = vadd.f32 %v4676_v39, %v4668_v15  ;;  %v5114_v15 = vld [vmem:[%s8356_s5 + $0x6] sm:$0x1] }
 0x5c1   :  { %v4586_v38 = vpop.f32.mrf.mxu2 }
 0x5c2   :  { %v6297_v41 = vmul.f32 -1.442695, %v4677_v47  ;;  %v5106_v47 = vld [vmem:[%s8356_s5 + $0x5] sm:$0x1] }
 0x5c3   :  { %v4621_v12 = vpop.f32.mrf.mxu3  ;;  %v4993_v63 = vpop.f32.mrf.mxu0 }
 0x5c4   :  { %6574 = vpow2.f32 %v6297_v41 }
 0x5c5   :  { %v5028_v33 = vpop.f32.mrf.mxu1 }
 0x5c9   :  { %v4756_v9 = vpop.f32.mrf.mxu2 }
 0x5ca   :  { %v6575_v44 = vpop.eup %6574  ;;  %v4760_v57 = vadd.f32 %v4756_v9, %v4716_v5  ;;  %v4712_v9 = vld [vmem:[%s8356_s5 + $0x4] sm:$0x1] }
 0x5cb   :  { %v4681_v52 = vadd.f32 1.0, %v6575_v44  ;;  %v4791_v22 = vpop.f32.mrf.mxu3  ;;  %v4995_v54 = vpop.f32.mrf.mxu0  ;;  %v4703_v44 = vld [vmem:[%s8356_s5 + $0x4] sm:$0x1] }
 0x5cc   :  { %v4795_v27 = vadd.f32 %v4791_v22, %v4760_v57 }
 0x5cd   :  { %6576 = vrcp.f32 %v4681_v52  ;;  %v5030_v3 = vpop.f32.mrf.mxu1  ;;  %v4693_v45 = vand.u32 2147483648, %v4681_v52  ;;  %v4691_v58 = vand.u32 2147483647, %v4681_v52  ;;  %vm4687_vm5 = vweird.f32 %v4681_v52 }
 0x5ce   :  { %v4839_v55 = vadd.f32 %v4835_v34, %v4795_v27  ;;  %v5119_v3 = vld [vmem:[%s8356_s5 + $0x4] sm:$0x1] }
 0x5cf   :  { %v4694_v11 = vor.u32 1.1754944e-38, %v4693_v45  ;;  %vm4692_vm7 = vcmp.eq.f32.partialorder %v4691_v58, 8.507059e+37  ;;  %v5111_v27 = vld [vmem:[%s8356_s5 + $0x4] sm:$0x1] }
 0x5d0   :  { %v4874_v49 = vadd.f32 %v4870_v26, %v4839_v55 }
 0x5d1   :  { %v4758_v20 = vpop.f32.mrf.mxu2 }
 0x5d3   :  { %v6577_v13 = vpop.eup %6576  ;;  %v4793_v61 = vpop.f32.mrf.mxu3 }
 0x5d4   :  { %v4683_v29 = vmul.f32 %v6577_v13, %v4681_v52  ;;  %vm4688_vm4 = vweird.f32 %v6577_v13 }
 0x5d5   :  { %vm4689_vm6 = vmor %vm4687_vm5, %vm4688_vm4 }
 0x5d6   :  { %v4684_v62 = vsub.f32 1.0, %v4683_v29 }
 0x5d8   :  { %v4685_v51 = vmul.f32 %v6577_v13, %v4684_v62 }
 0x5d9   :  { %v4914_v36 = vpop.f32.mrf.mxu2 }
 0x5da   :  { %v4918_v46 = vadd.f32 %v4914_v36, %v4874_v49  ;;  %v4686_v17 = vadd.f32 %v6577_v13, %v4685_v51 }
 0x5db   :  { %v4949_v53 = vpop.f32.mrf.mxu3 }
 0x5dc   :  { %v4953_v19 = vadd.f32 %v4949_v53, %v4918_v46  ;;  %v4690_v8 = vsel %vm4689_vm6, %v6577_v13, %v4686_v17 }
 0x5dd   :  { %v4695_v50 = vsel %vm4692_vm7, %v4694_v11, %v4690_v8 }
 0x5de   :  { %v4997_v24 = vadd.f32 %v4993_v63, %v4953_v19  ;;  %v4708_v2 = vmul.f32 %v4707_v60, %v4695_v50  ;;  %v4698_v30 = vmul.f32 %v4697_v18, %v4695_v50 }
 0x5e0   :  { %v5032_v0 = vadd.f32 %v5028_v33, %v4997_v24  ;;  %v4709_v35 = vsel %vm4699_vm8, %v4708_v2, 0.0  ;;  %v4700_v14 = vsel %vm4699_vm8, %v4698_v30, 0.0 }
 0x5e1   :  { %4710 = vadd.xlane.f32.xlu2 %v4709_v35  ;;  %4701 = vadd.xlane.f32.xlu0 %v4700_v14  ;;  %v4916_v34 = vpop.f32.mrf.mxu2 }
 0x5e2   :  { %v5077_v26 = vadd.f32 %v5076_v1, %v5032_v0 }
 0x5e3   :  { %v4951_v25 = vpop.f32.mrf.mxu3 }
 0x5e4   :  { %v5086_v6 = vadd.f32 %v5085_v16, %v5077_v26 }
 0x5e6   :  { %v6371_v23 = vmul.f32 -1.442695, %v5086_v6 }
 0x5e8   :  { %6578 = vpow2.f32 %v6371_v23 }
 0x5ee   :  { %v6579_v10 = vpop.eup %6578 }
 0x5ef   :  { %v5090_v56 = vadd.f32 1.0, %v6579_v10 }
 0x5f1   :  { %6580 = vrcp.f32 %v5090_v56  ;;  %v5102_v4 = vand.u32 2147483648, %v5090_v56  ;;  %v5100_v21 = vand.u32 2147483647, %v5090_v56  ;;  %vm5096_vm10 = vweird.f32 %v5090_v56 }
 0x5f3   :  { %v5103_v39 = vor.u32 1.1754944e-38, %v5102_v4  ;;  %vm5101_vm12 = vcmp.eq.f32.partialorder %v5100_v21, 8.507059e+37 }
 0x5f7   :  { %v6581_v31 = vpop.eup %6580 }
 0x5f8   :  { %v5092_v42 = vmul.f32 %v6581_v31, %v5090_v56  ;;  %vm5097_vm9 = vweird.f32 %v6581_v31 }
 0x5f9   :  { %vm5098_vm11 = vmor %vm5096_vm10, %vm5097_vm9 }
 0x5fa   :  { %v5093_v32 = vsub.f32 1.0, %v5092_v42 }
 0x5fc   :  { %v5094_v37 = vmul.f32 %v6581_v31, %v5093_v32 }
 0x5fe   :  { %v5095_v28 = vadd.f32 %v6581_v31, %v5094_v37 }
 0x600   :  { %v5099_v38 = vsel %vm5098_vm11, %v6581_v31, %v5095_v28 }
 0x601   :  { %v5104_v41 = vsel %vm5101_vm12, %v5103_v39, %v5099_v38 }
 0x602   :  { %v5115_v12 = vmul.f32 %v5114_v15, %v5104_v41  ;;  %v5107_v63 = vmul.f32 %v5106_v47, %v5104_v41 }
 0x604   :  { %v5116_v33 = vsel %vm4699_vm8, %v5115_v12, 0.0  ;;  %v5108_v5 = vsel %vm4699_vm8, %v5107_v63, 0.0 }
 0x605   :  { %5117 = vadd.xlane.f32.xlu2 %v5116_v33  ;;  %5109 = vadd.xlane.f32.xlu1 %v5108_v5 }
 0x654   :  { %v4711_v52 = vpop.xlane.xlu2 %4710  ;;  %v4702_v22 = vpop.xlane.xlu0 %4701 }
 0x655   :  { %v4713_v54 = vadd.f32 %v4712_v9, %v4711_v52  ;;  %v4704_v57 = vadd.f32 %v4703_v44, %v4702_v22 }
 0x657   :  { %4706 = vst.msk [vmem:[#allocation6] sm:$0x1] %vm4705_vm13, %v4704_v57 }
 0x658   :  { %4715 = vst.msk [vmem:[#allocation6] sm:$0x1] %vm4714_vm14, %v4713_v54 }
 0x678   :  { %v5118_v20 = vpop.xlane.xlu2 %5117  ;;  %v5110_v13 = vpop.xlane.xlu1 %5109 }
 0x679   :  { %v5120_v61 = vadd.f32 %v5119_v3, %v5118_v20  ;;  %v5112_v55 = vadd.f32 %v5111_v27, %v5110_v13 }
 0x67b   :  { %5113 = vst.msk [vmem:[#allocation6 + $0x1] sm:$0x1] %vm4705_vm13, %v5112_v55 }
 0x67c   :  { %5121 = vst.msk [vmem:[#allocation6 + $0x1] sm:$0x1] %vm4714_vm14, %v5120_v61 }
 0x67d   :  { %5132 = dma.vmem_to_hbm [thread:$0]  %s5128_s0, 32, %s5130_s7, [#allocation7]  }
 0x67e   :  { %6606 = dma.done.wait [#allocation7], 32  }
 0x67f   :  { %6607 = vsyncadd [#allocation7], 4294967264 }
 0x680   :  { %5137 = vsyncpa [#allocation7], 1 }

</bundles_post_ra>
